<compile_context>
chip_gen: v7x
topology: tpu7x:2x2x1
jax: 0.10.0
libtpu: 0.0.40
codegen_flags: <defaults>
</compile_context>

<pallas_src>
import jax
import jax.numpy as jnp
from jax.experimental import pallas as pl
from jax.experimental.pallas import tpu as pltpu


_VMEM_LIMIT = 32 * 1024 * 1024  # well under v7x 64 MiB / v5e-v6e 128 MiB


# ----------------------------------------------------------------------------
# Tiling helpers
# ----------------------------------------------------------------------------
def _round_up(x, m):
    return (x + m - 1) // m * m


def _pick_tile_m(M, min_tm=128, max_tm=512):
    """Pick an M tile (multiple of 8) that minimizes pad waste, prefer larger."""
    Mr = _round_up(M, 8)
    if Mr <= max_tm:
        return Mr
    best_key, best_tm = None, min_tm
    for tm in range(min_tm, max_tm + 1, 8):
        waste = _round_up(Mr, tm) - Mr
        key = (waste, -tm)
        if best_key is None or key < best_key:
            best_key, best_tm = key, tm
    return best_tm


def _pick_tile_k(K, N, tile_m, budget_bytes=8 << 20):
    """Largest K chunk whose double-buffered bf16 blocks fit the budget."""
    per_k = 2 * 2 * (tile_m + N)  # bf16 bytes per unit K, x & w, double-buffered
    if K * per_k <= budget_bytes:
        return K
    max_tk = max(128, (budget_bytes // per_k) // 128 * 128)
    tk = max_tk
    while tk >= 128:
        if K % tk == 0:
            return tk
        tk -= 128
    return K


# ----------------------------------------------------------------------------
# Pallas kernels
# ----------------------------------------------------------------------------
def _matmul_bias_relu_kernel(x_ref, w_ref, b_ref, o_ref):
    # o = relu(x @ w + b); x:[TM,K] bf16, w:[K,N] bf16, b:[1,N] f32.
    y = jnp.dot(x_ref[...], w_ref[...], preferred_element_type=jnp.float32)
    y = y + b_ref[...]
    o_ref[...] = jnp.maximum(y, 0.0).astype(o_ref.dtype)


def _fc_ln_relu_kernel(x_ref, w_ref, b_ref, g_ref, beta_ref, o_ref, acc_ref):
    # Grid = (M tiles, K tiles); K is the reduction axis (last, "arbitrary").
    k = pl.program_id(1)

    @pl.when(k == 0)
    def _():
        acc_ref[...] = jnp.zeros_like(acc_ref)

    acc_ref[...] += jnp.dot(x_ref[...], w_ref[...],
                            preferred_element_type=jnp.float32)

    @pl.when(k == pl.num_programs(1) - 1)
    def _():
        y = acc_ref[...] + b_ref[...]
        mean = jnp.mean(y, axis=-1, keepdims=True)
        var = jnp.mean((y - mean) ** 2, axis=-1, keepdims=True)  # biased var
        yn = (y - mean) * jax.lax.rsqrt(var + 1e-5)
        yn = yn * g_ref[...] + beta_ref[...]
        o_ref[...] = jnp.maximum(yn, 0.0).astype(o_ref.dtype)


# ----------------------------------------------------------------------------
# pallas_call wrappers
# ----------------------------------------------------------------------------
def matmul_bias_relu(x, w, b, *, out_dtype=jnp.bfloat16):
    M, K = x.shape
    N = w.shape[1]
    tile_m = _pick_tile_m(M)
    Mp = _round_up(M, tile_m)
    xp = jnp.pad(x, ((0, Mp - M), (0, 0))) if Mp != M else x

    cost = pl.CostEstimate(
        flops=2 * Mp * K * N,
        transcendentals=0,
        bytes_accessed=(Mp * K + K * N) * 2 + Mp * N * jnp.dtype(out_dtype).itemsize,
    )
    out = pl.pallas_call(
        _matmul_bias_relu_kernel,
        out_shape=jax.ShapeDtypeStruct((Mp, N), out_dtype),
        grid=(Mp // tile_m,),
        in_specs=[
            pl.BlockSpec((tile_m, K), lambda i: (i, 0)),
            pl.BlockSpec((K, N), lambda i: (0, 0)),
            pl.BlockSpec((1, N), lambda i: (0, 0)),
        ],
        out_specs=pl.BlockSpec((tile_m, N), lambda i: (i, 0)),
        compiler_params=pltpu.CompilerParams(
            dimension_semantics=("parallel",),
            vmem_limit_bytes=_VMEM_LIMIT,
        ),
        cost_estimate=cost,
    )(xp, w, b)
    return out[:M] if Mp != M else out


def fc_ln_relu(x, w, b, g, beta):
    M, K = x.shape
    N = w.shape[1]
    tile_m = _pick_tile_m(M)
    Mp = _round_up(M, tile_m)
    xp = jnp.pad(x, ((0, Mp - M), (0, 0))) if Mp != M else x
    tile_k = _pick_tile_k(K, N, tile_m)

    cost = pl.CostEstimate(
        flops=2 * Mp * K * N,
        transcendentals=Mp,
        bytes_accessed=(Mp * K + K * N) * 2 + Mp * N * 4,
    )
    out = pl.pallas_call(
        _fc_ln_relu_kernel,
        out_shape=jax.ShapeDtypeStruct((Mp, N), jnp.float32),
        grid=(Mp // tile_m, K // tile_k),
        in_specs=[
            pl.BlockSpec((tile_m, tile_k), lambda i, k: (i, k)),
            pl.BlockSpec((tile_k, N), lambda i, k: (k, 0)),
            pl.BlockSpec((1, N), lambda i, k: (0, 0)),
            pl.BlockSpec((1, N), lambda i, k: (0, 0)),
            pl.BlockSpec((1, N), lambda i, k: (0, 0)),
        ],
        out_specs=pl.BlockSpec((tile_m, N), lambda i, k: (i, 0)),
        scratch_shapes=[pltpu.VMEM((tile_m, N), jnp.float32)],
        compiler_params=pltpu.CompilerParams(
            dimension_semantics=("parallel", "arbitrary"),
            vmem_limit_bytes=_VMEM_LIMIT,
        ),
        cost_estimate=cost,
    )(xp, w, b, g, beta)
    return out[:M] if Mp != M else out


# ----------------------------------------------------------------------------
# Glue: im2col patch extraction (NHWC, patch order kH, kW, C)
# ----------------------------------------------------------------------------
def im2col(x_nhwc, k=3, stride=2, pad=1):
    B, H, W, C = x_nhwc.shape
    xp = jnp.pad(x_nhwc, ((0, 0), (pad, pad), (pad, pad), (0, 0)))
    Ho = (H + 2 * pad - k) // stride + 1
    Wo = (W + 2 * pad - k) // stride + 1
    patches = []
    for di in range(k):
        for dj in range(k):
            patches.append(
                xp[:, di:di + stride * Ho:stride, dj:dj + stride * Wo:stride, :]
            )
    p = jnp.stack(patches, axis=3)  # [B, Ho, Wo, kH*kW, C]
    return p.reshape(B * Ho * Wo, k * k * C), B, Ho, Wo


def conv2d_s2_relu(x_nhwc, w_km, b):
    """3x3 / stride 2 / pad 1 conv + ReLU via im2col + fused Pallas matmul."""
    cols, B, Ho, Wo = im2col(x_nhwc, k=3, stride=2, pad=1)
    y = matmul_bias_relu(cols, w_km, b, out_dtype=jnp.bfloat16)
    return y.reshape(B, Ho, Wo, w_km.shape[1])


# ----------------------------------------------------------------------------
# Parameters: pre-transformed once at init (no per-call transposes)
# ----------------------------------------------------------------------------
def init_params(key, input_channels, hidden_dim):
    ks = jax.random.split(key, 8)

    def u(k, shape, fan_in):
        bound = 1.0 / jnp.sqrt(float(fan_in))
        return jax.random.uniform(k, shape, jnp.float32, -bound, bound)

    def conv_pack(w_oihw):
        # [O,I,kH,kW] -> [kH*kW*I, O], matching im2col patch order (kH,kW,C).
        o, i, kh, kw = w_oihw.shape
        return jnp.transpose(w_oihw, (2, 3, 1, 0)).reshape(kh * kw * i, o)

    p = {}
    w1 = u(ks[0], (32, input_channels, 3, 3), input_channels * 9)
    w2 = u(ks[2], (64, 32, 3, 3), 32 * 9)
    w3 = u(ks[4], (128, 64, 3, 3), 64 * 9)
    p["conv1_w"] = conv_pack(w1).astype(jnp.bfloat16)
    p["conv1_b"] = u(ks[1], (1, 32), input_channels * 9)
    p["conv2_w"] = conv_pack(w2).astype(jnp.bfloat16)
    p["conv2_b"] = u(ks[3], (1, 64), 32 * 9)
    p["conv3_w"] = conv_pack(w3).astype(jnp.bfloat16)
    p["conv3_b"] = u(ks[5], (1, 128), 64 * 9)

    fc_in = 128 * 9 * 9
    fc_w_pt = u(ks[6], (hidden_dim, fc_in), fc_in)        # PyTorch [out, in]
    # Permute rows of [in, out] so the NHWC flatten (h,w,c) of conv3's output
    # selects exactly the same weights as PyTorch's NCHW (c,h,w) flatten.
    perm = jnp.arange(fc_in).reshape(128, 9, 9).transpose(1, 2, 0).reshape(-1)
    p["fc_w"] = fc_w_pt.T[perm].astype(jnp.bfloat16)      # [fc_in, hidden]
    p["fc_b"] = u(ks[7], (1, hidden_dim), fc_in)
    p["ln_g"] = jnp.ones((1, hidden_dim), jnp.float32)
    p["ln_b"] = jnp.zeros((1, hidden_dim), jnp.float32)
    return p


# ----------------------------------------------------------------------------
# Forward
# ----------------------------------------------------------------------------
@jax.jit
def state_encoder_forward(x_nchw, params):
    # NCHW (PyTorch) -> NHWC (kernel layout), bf16 activations for the MXU.
    x = jnp.transpose(x_nchw, (0, 2, 3, 1)).astype(jnp.bfloat16)

    x = conv2d_s2_relu(x, params["conv1_w"], params["conv1_b"])   # [B,36,36, 32]
    x = conv2d_s2_relu(x, params["conv2_w"], params["conv2_b"])   # [B,18,18, 64]
    x = conv2d_s2_relu(x, params["conv3_w"], params["conv3_b"])   # [B, 9, 9,128]

    # Free NHWC flatten (fc_w rows already permuted to this order at init).
    B = x.shape[0]
    flat = x.reshape(B, -1)                                       # [B, 10368]

    return fc_ln_relu(flat, params["fc_w"], params["fc_b"],
                      params["ln_g"], params["ln_b"])             # [B, hidden]


# ----------------------------------------------------------------------------
# Pure-JAX reference (same bf16 weights/activations) for a correctness check
# ----------------------------------------------------------------------------
@jax.jit
def reference_forward(x_nchw, params):
    x = jnp.transpose(x_nchw, (0, 2, 3, 1)).astype(jnp.bfloat16)
    for wn, bn in (("conv1_w", "conv1_b"), ("conv2_w", "conv2_b"),
                   ("conv3_w", "conv3_b")):
        w = params[wn]
        kk, cout = w.shape
        cin = kk // 9
        w = w.reshape(3, 3, cin, cout)
        y = jax.lax.conv_general_dilated(
            x, w, window_strides=(2, 2), padding=((1, 1), (1, 1)),
            dimension_numbers=("NHWC", "HWIO", "NHWC"),
            preferred_element_type=jnp.float32)
        x = jnp.maximum(y + params[bn].reshape(-1), 0.0).astype(jnp.bfloat16)
    flat = x.reshape(x.shape[0], -1)
    y = jnp.dot(flat, params["fc_w"],
                preferred_element_type=jnp.float32) + params["fc_b"]
    mean = jnp.mean(y, axis=-1, keepdims=True)
    var = jnp.mean((y - mean) ** 2, axis=-1, keepdims=True)
    y = (y - mean) * jax.lax.rsqrt(var + 1e-5) * params["ln_g"] + params["ln_b"]
    return jnp.maximum(y, 0.0)


if __name__ == "__main__":
    key = jax.random.PRNGKey(0)
    k_params, k_x = jax.random.split(key)

    input_channels = 4
    hidden_dim = 32
    batch = 2
    spatial = 72  # forced by fc expecting 128*9*9 after 72 -> 36 -> 18 -> 9

    params = init_params(k_params, input_channels, hidden_dim)
    x = jax.random.normal(k_x, (batch, input_channels, spatial, spatial),
                          jnp.float32)

    out = jax.block_until_ready(state_encoder_forward(x, params))
    ref = jax.block_until_ready(reference_forward(x, params))

    assert out.shape == (batch, hidden_dim)
    assert bool(jnp.all(jnp.isfinite(out)))
    assert bool(jnp.all(out >= 0.0))  # final ReLU
    max_diff = float(jnp.max(jnp.abs(out - ref)))
    assert max_diff < 5e-2, f"mismatch vs reference: {max_diff}"
    print("KERNEL_OK")
</pallas_src>

<mosaic_0001>
module attributes {stable_mosaic.version = 11 : i64} {
  func.func @_matmul_bias_relu_kernel(%arg0: i32, %arg1: memref<432x36xbf16, #tpu.memory_space<vmem>>, %arg2: memref<36x32xbf16, #tpu.memory_space<vmem>>, %arg3: memref<1x32xf32, #tpu.memory_space<vmem>>, %arg4: memref<432x32xbf16, #tpu.memory_space<vmem>>) attributes {dimension_semantics = [#tpu.dimension_semantics<parallel>], iteration_bounds = array<i64: 6>, scalar_prefetch = 0 : i64, scratch_operands = 0 : i64, tpu.core_type = #tpu.core_type<tc>, window_params = [{transform_indices = @transform_0, window_bounds = array<i64: 432, 36>}, {pipeline_mode = #tpu.pipeline_mode<synchronous>, transform_indices = @transform_1, window_bounds = array<i64: 36, 32>}, {pipeline_mode = #tpu.pipeline_mode<synchronous>, transform_indices = @transform_2, window_bounds = array<i64: 1, 32>}, {transform_indices = @transform_3, window_bounds = array<i64: 432, 32>}]} {
    %c0 = arith.constant 0 : index
    %c0_0 = arith.constant 0 : index
    %0 = vector.load %arg1[%c0, %c0_0] : memref<432x36xbf16, #tpu.memory_space<vmem>>, vector<432x36xbf16>
    %c0_1 = arith.constant 0 : index
    %c0_2 = arith.constant 0 : index
    %1 = vector.load %arg2[%c0_1, %c0_2] : memref<36x32xbf16, #tpu.memory_space<vmem>>, vector<36x32xbf16>
    %cst = arith.constant dense<0.000000e+00> : vector<432x32xf32>
    %2 = tpu.matmul %0, %1, %cst {dimension_numbers = #tpu.dot_dimension_numbers<[1], [0], [0], [1], [0, 0, 1, 1], [], []>} : vector<432x36xbf16>, vector<36x32xbf16>, vector<432x32xf32> -> vector<432x32xf32>
    %c0_3 = arith.constant 0 : index
    %c0_4 = arith.constant 0 : index
    %3 = vector.load %arg3[%c0_3, %c0_4] : memref<1x32xf32, #tpu.memory_space<vmem>>, vector<1x32xf32>
    %4 = vector.broadcast %3 : vector<1x32xf32> to vector<432x32xf32>
    %5 = arith.addf %2, %4 : vector<432x32xf32>
    %cst_5 = arith.constant 0.000000e+00 : f32
    %6 = vector.broadcast %cst_5 : f32 to vector<432x32xf32>
    %7 = arith.maximumf %5, %6 : vector<432x32xf32>
    %8 = arith.truncf %7 : vector<432x32xf32> to vector<432x32xbf16>
    %c0_6 = arith.constant 0 : index
    %c0_7 = arith.constant 0 : index
    %9 = vector.load %arg4[%c0_6, %c0_7] : memref<432x32xbf16, #tpu.memory_space<vmem>>, vector<432x32xbf16>
    tpu.vector_store %arg4[%c0_6, %c0_7], %8 {strides = array<i32>} : memref<432x32xbf16, #tpu.memory_space<vmem>>, vector<432x32xbf16>,
    return
  }
  func.func @transform_0(%arg0: i32) -> (i32, i32) {
    %c0_i32 = arith.constant 0 : i32
    %c0_i32_0 = arith.constant 0 : i32
    return %arg0, %c0_i32 : i32, i32
  }
  func.func @transform_1(%arg0: i32) -> (i32, i32) {
    %c0_i32 = arith.constant 0 : i32
    %c0_i32_0 = arith.constant 0 : i32
    %c0_i32_1 = arith.constant 0 : i32
    return %c0_i32, %c0_i32_0 : i32, i32
  }
  func.func @transform_2(%arg0: i32) -> (i32, i32) {
    %c0_i32 = arith.constant 0 : i32
    %c0_i32_0 = arith.constant 0 : i32
    %c0_i32_1 = arith.constant 0 : i32
    return %c0_i32, %c0_i32_0 : i32, i32
  }
  func.func @transform_3(%arg0: i32) -> (i32, i32) {
    %c0_i32 = arith.constant 0 : i32
    %c0_i32_0 = arith.constant 0 : i32
    return %arg0, %c0_i32 : i32, i32
  }
}

module attributes {stable_mosaic.version = 11 : i64} {
  func.func @_matmul_bias_relu_kernel(%arg0: i32, %arg1: memref<216x288xbf16, #tpu.memory_space<vmem>>, %arg2: memref<288x64xbf16, #tpu.memory_space<vmem>>, %arg3: memref<1x64xf32, #tpu.memory_space<vmem>>, %arg4: memref<216x64xbf16, #tpu.memory_space<vmem>>) attributes {dimension_semantics = [#tpu.dimension_semantics<parallel>], iteration_bounds = array<i64: 3>, scalar_prefetch = 0 : i64, scratch_operands = 0 : i64, tpu.core_type = #tpu.core_type<tc>, window_params = [{transform_indices = @transform_0, window_bounds = array<i64: 216, 288>}, {pipeline_mode = #tpu.pipeline_mode<synchronous>, transform_indices = @transform_1, window_bounds = array<i64: 288, 64>}, {pipeline_mode = #tpu.pipeline_mode<synchronous>, transform_indices = @transform_2, window_bounds = array<i64: 1, 64>}, {transform_indices = @transform_3, window_bounds = array<i64: 216, 64>}]} {
    %c0 = arith.constant 0 : index
    %c0_0 = arith.constant 0 : index
    %0 = vector.load %arg1[%c0, %c0_0] : memref<216x288xbf16, #tpu.memory_space<vmem>>, vector<216x288xbf16>
    %c0_1 = arith.constant 0 : index
    %c0_2 = arith.constant 0 : index
    %1 = vector.load %arg2[%c0_1, %c0_2] : memref<288x64xbf16, #tpu.memory_space<vmem>>, vector<288x64xbf16>
    %cst = arith.constant dense<0.000000e+00> : vector<216x64xf32>
    %2 = tpu.matmul %0, %1, %cst {dimension_numbers = #tpu.dot_dimension_numbers<[1], [0], [0], [1], [0, 0, 1, 1], [], []>} : vector<216x288xbf16>, vector<288x64xbf16>, vector<216x64xf32> -> vector<216x64xf32>
    %c0_3 = arith.constant 0 : index
    %c0_4 = arith.constant 0 : index
    %3 = vector.load %arg3[%c0_3, %c0_4] : memref<1x64xf32, #tpu.memory_space<vmem>>, vector<1x64xf32>
    %4 = vector.broadcast %3 : vector<1x64xf32> to vector<216x64xf32>
    %5 = arith.addf %2, %4 : vector<216x64xf32>
    %cst_5 = arith.constant 0.000000e+00 : f32
    %6 = vector.broadcast %cst_5 : f32 to vector<216x64xf32>
    %7 = arith.maximumf %5, %6 : vector<216x64xf32>
    %8 = arith.truncf %7 : vector<216x64xf32> to vector<216x64xbf16>
    %c0_6 = arith.constant 0 : index
    %c0_7 = arith.constant 0 : index
    %9 = vector.load %arg4[%c0_6, %c0_7] : memref<216x64xbf16, #tpu.memory_space<vmem>>, vector<216x64xbf16>
    tpu.vector_store %arg4[%c0_6, %c0_7], %8 {strides = array<i32>} : memref<216x64xbf16, #tpu.memory_space<vmem>>, vector<216x64xbf16>,
    return
  }
  func.func @transform_0(%arg0: i32) -> (i32, i32) {
    %c0_i32 = arith.constant 0 : i32
    %c0_i32_0 = arith.constant 0 : i32
    return %arg0, %c0_i32 : i32, i32
  }
  func.func @transform_1(%arg0: i32) -> (i32, i32) {
    %c0_i32 = arith.constant 0 : i32
    %c0_i32_0 = arith.constant 0 : i32
    %c0_i32_1 = arith.constant 0 : i32
    return %c0_i32, %c0_i32_0 : i32, i32
  }
  func.func @transform_2(%arg0: i32) -> (i32, i32) {
    %c0_i32 = arith.constant 0 : i32
    %c0_i32_0 = arith.constant 0 : i32
    %c0_i32_1 = arith.constant 0 : i32
    return %c0_i32, %c0_i32_0 : i32, i32
  }
  func.func @transform_3(%arg0: i32) -> (i32, i32) {
    %c0_i32 = arith.constant 0 : i32
    %c0_i32_0 = arith.constant 0 : i32
    return %arg0, %c0_i32 : i32, i32
  }
}

module attributes {stable_mosaic.version = 11 : i64} {
  func.func @_matmul_bias_relu_kernel(%arg0: i32, %arg1: memref<168x576xbf16, #tpu.memory_space<vmem>>, %arg2: memref<576x128xbf16, #tpu.memory_space<vmem>>, %arg3: memref<1x128xf32, #tpu.memory_space<vmem>>, %arg4: memref<168x128xbf16, #tpu.memory_space<vmem>>) attributes {dimension_semantics = [#tpu.dimension_semantics<parallel>], iteration_bounds = array<i64: 1>, scalar_prefetch = 0 : i64, scratch_operands = 0 : i64, tpu.core_type = #tpu.core_type<tc>, window_params = [{transform_indices = @transform_0, window_bounds = array<i64: 168, 576>}, {pipeline_mode = #tpu.pipeline_mode<synchronous>, transform_indices = @transform_1, window_bounds = array<i64: 576, 128>}, {pipeline_mode = #tpu.pipeline_mode<synchronous>, transform_indices = @transform_2, window_bounds = array<i64: 1, 128>}, {transform_indices = @transform_3, window_bounds = array<i64: 168, 128>}]} {
    %c0 = arith.constant 0 : index
    %c0_0 = arith.constant 0 : index
    %0 = vector.load %arg1[%c0, %c0_0] : memref<168x576xbf16, #tpu.memory_space<vmem>>, vector<168x576xbf16>
    %c0_1 = arith.constant 0 : index
    %c0_2 = arith.constant 0 : index
    %1 = vector.load %arg2[%c0_1, %c0_2] : memref<576x128xbf16, #tpu.memory_space<vmem>>, vector<576x128xbf16>
    %cst = arith.constant dense<0.000000e+00> : vector<168x128xf32>
    %2 = tpu.matmul %0, %1, %cst {dimension_numbers = #tpu.dot_dimension_numbers<[1], [0], [0], [1], [0, 0, 1, 1], [], []>} : vector<168x576xbf16>, vector<576x128xbf16>, vector<168x128xf32> -> vector<168x128xf32>
    %c0_3 = arith.constant 0 : index
    %c0_4 = arith.constant 0 : index
    %3 = vector.load %arg3[%c0_3, %c0_4] : memref<1x128xf32, #tpu.memory_space<vmem>>, vector<1x128xf32>
    %4 = vector.broadcast %3 : vector<1x128xf32> to vector<168x128xf32>
    %5 = arith.addf %2, %4 : vector<168x128xf32>
    %cst_5 = arith.constant 0.000000e+00 : f32
    %6 = vector.broadcast %cst_5 : f32 to vector<168x128xf32>
    %7 = arith.maximumf %5, %6 : vector<168x128xf32>
    %8 = arith.truncf %7 : vector<168x128xf32> to vector<168x128xbf16>
    %c0_6 = arith.constant 0 : index
    %c0_7 = arith.constant 0 : index
    %9 = vector.load %arg4[%c0_6, %c0_7] : memref<168x128xbf16, #tpu.memory_space<vmem>>, vector<168x128xbf16>
    tpu.vector_store %arg4[%c0_6, %c0_7], %8 {strides = array<i32>} : memref<168x128xbf16, #tpu.memory_space<vmem>>, vector<168x128xbf16>,
    return
  }
  func.func @transform_0(%arg0: i32) -> (i32, i32) {
    %c0_i32 = arith.constant 0 : i32
    %c0_i32_0 = arith.constant 0 : i32
    return %arg0, %c0_i32 : i32, i32
  }
  func.func @transform_1(%arg0: i32) -> (i32, i32) {
    %c0_i32 = arith.constant 0 : i32
    %c0_i32_0 = arith.constant 0 : i32
    %c0_i32_1 = arith.constant 0 : i32
    return %c0_i32, %c0_i32_0 : i32, i32
  }
  func.func @transform_2(%arg0: i32) -> (i32, i32) {
    %c0_i32 = arith.constant 0 : i32
    %c0_i32_0 = arith.constant 0 : i32
    %c0_i32_1 = arith.constant 0 : i32
    return %c0_i32, %c0_i32_0 : i32, i32
  }
  func.func @transform_3(%arg0: i32) -> (i32, i32) {
    %c0_i32 = arith.constant 0 : i32
    %c0_i32_0 = arith.constant 0 : i32
    return %arg0, %c0_i32 : i32, i32
  }
}

module attributes {stable_mosaic.version = 11 : i64} {
  func.func @_fc_ln_relu_kernel(%arg0: i32, %arg1: i32, %arg2: memref<8x10368xbf16, #tpu.memory_space<vmem>>, %arg3: memref<10368x32xbf16, #tpu.memory_space<vmem>>, %arg4: memref<1x32xf32, #tpu.memory_space<vmem>>, %arg5: memref<1x32xf32, #tpu.memory_space<vmem>>, %arg6: memref<1x32xf32, #tpu.memory_space<vmem>>, %arg7: memref<8x32xf32, #tpu.memory_space<vmem>>, %arg8: memref<8x32xf32, #tpu.memory_space<vmem>>) attributes {dimension_semantics = [#tpu.dimension_semantics<parallel>, #tpu.dimension_semantics<arbitrary>], iteration_bounds = array<i64: 1, 1>, scalar_prefetch = 0 : i64, scratch_operands = 1 : i64, tpu.core_type = #tpu.core_type<tc>, window_params = [{transform_indices = @transform_0, window_bounds = array<i64: 8, 10368>}, {transform_indices = @transform_1, window_bounds = array<i64: 10368, 32>}, {pipeline_mode = #tpu.pipeline_mode<synchronous>, transform_indices = @transform_2, window_bounds = array<i64: 1, 32>}, {pipeline_mode = #tpu.pipeline_mode<synchronous>, transform_indices = @transform_3, window_bounds = array<i64: 1, 32>}, {pipeline_mode = #tpu.pipeline_mode<synchronous>, transform_indices = @transform_4, window_bounds = array<i64: 1, 32>}, {transform_indices = @transform_5, window_bounds = array<i64: 8, 32>}]} {
    %c0_i32 = arith.constant 0 : i32
    %0 = arith.cmpi eq, %arg1, %c0_i32 : i32
    %1 = arith.extui %0 : i1 to i32
    %c0_i32_0 = arith.constant 0 : i32
    %2 = arith.cmpi ne, %1, %c0_i32_0 : i32
    scf.if %2 {
      %cst_10 = arith.constant 0.000000e+00 : f32
      %12 = vector.broadcast %cst_10 : f32 to vector<8x32xf32>
      %c0_11 = arith.constant 0 : index
      %c0_12 = arith.constant 0 : index
      %13 = vector.load %arg8[%c0_11, %c0_12] : memref<8x32xf32, #tpu.memory_space<vmem>>, vector<8x32xf32>
      tpu.vector_store %arg8[%c0_11, %c0_12], %12 {strides = array<i32>} : memref<8x32xf32, #tpu.memory_space<vmem>>, vector<8x32xf32>,
    } else {
    }
    %c0 = arith.constant 0 : index
    %c0_1 = arith.constant 0 : index
    %3 = vector.load %arg8[%c0, %c0_1] : memref<8x32xf32, #tpu.memory_space<vmem>>, vector<8x32xf32>
    %c0_2 = arith.constant 0 : index
    %c0_3 = arith.constant 0 : index
    %4 = vector.load %arg2[%c0_2, %c0_3] : memref<8x10368xbf16, #tpu.memory_space<vmem>>, vector<8x10368xbf16>
    %c0_4 = arith.constant 0 : index
    %c0_5 = arith.constant 0 : index
    %5 = vector.load %arg3[%c0_4, %c0_5] : memref<10368x32xbf16, #tpu.memory_space<vmem>>, vector<10368x32xbf16>
    %cst = arith.constant dense<0.000000e+00> : vector<8x32xf32>
    %6 = tpu.matmul %4, %5, %cst {dimension_numbers = #tpu.dot_dimension_numbers<[1], [0], [0], [1], [0, 0, 1, 1], [], []>} : vector<8x10368xbf16>, vector<10368x32xbf16>, vector<8x32xf32> -> vector<8x32xf32>
    %7 = arith.addf %3, %6 : vector<8x32xf32>
    %c0_6 = arith.constant 0 : index
    %c0_7 = arith.constant 0 : index
    %8 = vector.load %arg8[%c0_6, %c0_7] : memref<8x32xf32, #tpu.memory_space<vmem>>, vector<8x32xf32>
    tpu.vector_store %arg8[%c0_6, %c0_7], %7 {strides = array<i32>} : memref<8x32xf32, #tpu.memory_space<vmem>>, vector<8x32xf32>,
    %c0_i32_8 = arith.constant 0 : i32
    %9 = arith.cmpi eq, %arg1, %c0_i32_8 : i32
    %10 = arith.extui %9 : i1 to i32
    %c0_i32_9 = arith.constant 0 : i32
    %11 = arith.cmpi ne, %10, %c0_i32_9 : i32
    scf.if %11 {
      %c0_10 = arith.constant 0 : index
      %c0_11 = arith.constant 0 : index
      %12 = vector.load %arg8[%c0_10, %c0_11] : memref<8x32xf32, #tpu.memory_space<vmem>>, vector<8x32xf32>
      %c0_12 = arith.constant 0 : index
      %c0_13 = arith.constant 0 : index
      %13 = vector.load %arg4[%c0_12, %c0_13] : memref<1x32xf32, #tpu.memory_space<vmem>>, vector<1x32xf32>
      %14 = vector.broadcast %13 : vector<1x32xf32> to vector<8x32xf32>
      %15 = arith.addf %12, %14 : vector<8x32xf32>
      %cst_14 = arith.constant dense<0.000000e+00> : vector<8xf32>
      %16 = vector.multi_reduction <add>, %15, %cst_14 [1] : vector<8x32xf32> to vector<8xf32>
      %17 = vector.shape_cast %16 : vector<8xf32> to vector<8x1xf32>
      %cst_15 = arith.constant 3.200000e+01 : f32
      %18 = vector.broadcast %cst_15 : f32 to vector<8x1xf32>
      %19 = arith.divf %17, %18 : vector<8x1xf32>
      %20 = vector.broadcast %19 : vector<8x1xf32> to vector<8x32xf32>
      %21 = arith.subf %15, %20 : vector<8x32xf32>
      %22 = arith.mulf %21, %21 : vector<8x32xf32>
      %cst_16 = arith.constant dense<0.000000e+00> : vector<8xf32>
      %23 = vector.multi_reduction <add>, %22, %cst_16 [1] : vector<8x32xf32> to vector<8xf32>
      %24 = vector.shape_cast %23 : vector<8xf32> to vector<8x1xf32>
      %cst_17 = arith.constant 3.200000e+01 : f32
      %25 = vector.broadcast %cst_17 : f32 to vector<8x1xf32>
      %26 = arith.divf %24, %25 : vector<8x1xf32>
      %27 = vector.broadcast %19 : vector<8x1xf32> to vector<8x32xf32>
      %28 = arith.subf %15, %27 : vector<8x32xf32>
      %cst_18 = arith.constant 9.99999974E-6 : f32
      %29 = vector.broadcast %cst_18 : f32 to vector<8x1xf32>
      %30 = arith.addf %26, %29 : vector<8x1xf32>
      %31 = math.rsqrt %30 : vector<8x1xf32>
      %32 = vector.broadcast %31 : vector<8x1xf32> to vector<8x32xf32>
      %33 = arith.mulf %28, %32 : vector<8x32xf32>
      %c0_19 = arith.constant 0 : index
      %c0_20 = arith.constant 0 : index
      %34 = vector.load %arg5[%c0_19, %c0_20] : memref<1x32xf32, #tpu.memory_space<vmem>>, vector<1x32xf32>
      %35 = vector.broadcast %34 : vector<1x32xf32> to vector<8x32xf32>
      %36 = arith.mulf %33, %35 : vector<8x32xf32>
      %c0_21 = arith.constant 0 : index
      %c0_22 = arith.constant 0 : index
      %37 = vector.load %arg6[%c0_21, %c0_22] : memref<1x32xf32, #tpu.memory_space<vmem>>, vector<1x32xf32>
      %38 = vector.broadcast %37 : vector<1x32xf32> to vector<8x32xf32>
      %39 = arith.addf %36, %38 : vector<8x32xf32>
      %cst_23 = arith.constant 0.000000e+00 : f32
      %40 = vector.broadcast %cst_23 : f32 to vector<8x32xf32>
      %41 = arith.maximumf %39, %40 : vector<8x32xf32>
      %c0_24 = arith.constant 0 : index
      %c0_25 = arith.constant 0 : index
      %42 = vector.load %arg7[%c0_24, %c0_25] : memref<8x32xf32, #tpu.memory_space<vmem>>, vector<8x32xf32>
      tpu.vector_store %arg7[%c0_24, %c0_25], %41 {strides = array<i32>} : memref<8x32xf32, #tpu.memory_space<vmem>>, vector<8x32xf32>,
    } else {
    }
    return
  }
  func.func @transform_0(%arg0: i32, %arg1: i32) -> (i32, i32) {
    %c0_i32 = arith.constant 0 : i32
    return %arg0, %arg1 : i32, i32
  }
  func.func @transform_1(%arg0: i32, %arg1: i32) -> (i32, i32) {
    %c0_i32 = arith.constant 0 : i32
    %c0_i32_0 = arith.constant 0 : i32
    return %arg1, %c0_i32 : i32, i32
  }
  func.func @transform_2(%arg0: i32, %arg1: i32) -> (i32, i32) {
    %c0_i32 = arith.constant 0 : i32
    %c0_i32_0 = arith.constant 0 : i32
    %c0_i32_1 = arith.constant 0 : i32
    return %c0_i32, %c0_i32_0 : i32, i32
  }
  func.func @transform_3(%arg0: i32, %arg1: i32) -> (i32, i32) {
    %c0_i32 = arith.constant 0 : i32
    %c0_i32_0 = arith.constant 0 : i32
    %c0_i32_1 = arith.constant 0 : i32
    return %c0_i32, %c0_i32_0 : i32, i32
  }
  func.func @transform_4(%arg0: i32, %arg1: i32) -> (i32, i32) {
    %c0_i32 = arith.constant 0 : i32
    %c0_i32_0 = arith.constant 0 : i32
    %c0_i32_1 = arith.constant 0 : i32
    return %c0_i32, %c0_i32_0 : i32, i32
  }
  func.func @transform_5(%arg0: i32, %arg1: i32) -> (i32, i32) {
    %c0_i32 = arith.constant 0 : i32
    %c0_i32_0 = arith.constant 0 : i32
    return %arg0, %c0_i32 : i32, i32
  }
}

</mosaic_0001>

<bundles_post_ra>
// kernel: state_encoder_forward.4
= control target key start
LH: loop header
LB: loop body
LE: loop exit
PB: predicated region body
PF: predicated region fallthrough
CT: control target
= control target key end

     0   :  { %s1502_s12 = smov 0   ;;  %s1820_s0 = inlined_call_operand.vmem [shape: bf16[2592,36], index: 0, kind: input, shape index: {}]   ;;  %s1821_s1 = inlined_call_operand.vmem [shape: bf16[36,32], index: 1, kind: input, shape index: {}]   ;;  %s1822_s2 = inlined_call_operand.vmem [shape: f32[1,32], index: 2, kind: input, shape index: {}]   ;;  %s1823_s3 = inlined_call_operand.vmem [shape: bf16[2592,32], index: 3, kind: output, shape index: {}]  }
   0x1 LB: > { %s1107_s13 = sadd.s32 4294967295, %s1478_s12   ;;  %p1111_p0 = scmp.ge.s32.totalorder %s1478_s12, 1  ;;  %s1478_s12 = sphi %s1502_s12, %s13_s12  }
   0x2   : > { %p138_p1 = scmp.lt.s32.totalorder %s1478_s12, 7 }
   0x4   : > { %p139_p2 = pnand %p1111_p0, %p138_p1 }
   0x5   : > { %v1442_v0 = vld [vmem:[%s1821_s1] sm:$0xff] (!%p139_p2)   ;;  %v1480_v1 = vmov (!%p139_p2), 0.0   ;;  %v1443_v2 = vld [vmem:[%s1821_s1 + $0x8] sm:$0xff] (!%p139_p2)   ;;  %v1444_v3 = vld [vmem:[%s1821_s1 + $0x10] ss:$0 sps:$4 sm:$0x33] (!%p139_p2)  }
   0x6   : > { %142 = sbr.rel (%p139_p2) target bundleno = 343 (0x157), region = 32  ;;  %1312 = vmatprep.subr.bf16.mxu0 (!%p139_p2), %v1480_v1  ;;  %1426 = vmatprep.subr.bf16.mxu1 (!%p139_p2), %v1480_v1  ;;  %vm473_vm0 = vcmask (!%p139_p2), 1041408   ;;  %vm1481_vm1 = vmmov (!%p139_p2), 0   ;;  %vm391_vm2 = vcmask (!%p139_p2), 293888   ;;  %v1646_v32 = vld [vmem:[%s1822_s2] ss:$0 sm:$0xff] (!%p139_p2) }
   0x7   : > { %1313 = vmatpush3.bf16.msra.mxu0 (!%p139_p2), %v1442_v0  ;;  %1429 = vmatpush3.bf16.msra.mxu1 (!%p139_p2), %v1442_v0  ;;  %s162_s20 = smul.u32 (!%p139_p2), 54, %s1107_s13  ;;  %v475_v4 = vsel (!%p139_p2), %vm473_vm0, %v1444_v3, 0  ;;  %vm996_vm3 = vcmask (!%p139_p2), 257024  }
   0x8   : > { %1314 = vmatprep.subr.bf16.mxu0 (!%p139_p2), %v1480_v1  ;;  %1427 = vmatprep.subr.bf16.mxu1 (!%p139_p2), %v1480_v1 }
   0x9   : > { %1318 = vmatprep.mubr.msk.bf16.mxu0 (!%p139_p2), %vm1481_vm1, %v1480_v1  ;;  %1374 = vmatprep.mubr.msk.bf16.mxu1 (!%p139_p2), %vm1481_vm1, %v1480_v1  ;;  %p163_p3 = scmp.lt.s32.totalorder (!%p139_p2), %s162_s20, 323 }
   0xb   : > { %1315 = vmatpush3.bf16.msra.mxu0 (!%p139_p2), %v1443_v2  ;;  %1430 = vmatpush3.bf16.msra.mxu1 (!%p139_p2), %v1443_v2 }
   0xc   : > { %1316 = vmatprep.subr.bf16.mxu0 (!%p139_p2), %v1480_v1  ;;  %1428 = vmatprep.subr.bf16.mxu1 (!%p139_p2), %v1480_v1 }
   0xd   : > { %s1825_s20 = smov (!%p163_p3, %s162_s20), 323 }
   0xe   : > { %s1112_s21 = sshll.u32 %s1825_s20, 2 }
   0xf   : > { %1317 = vmatpush3.bf16.msra.mxu0 %v475_v4  ;;  %s1537_s24 = scalar_lea.vmem %s1820_s0, %s1112_s21  ;;  %1431 = vmatpush3.bf16.msra.mxu1 %v475_v4  ;;  %s1656_s29 = scalar_lea.vmem %s1823_s3, %s1112_s21 }
  0x10   : > { %v1445_v5 = vld [vmem:[%s1537_s24] sm:$0xff]   ;;  %v1446_v6 = vld [vmem:[%s1537_s24 + $0x70] sm:$0xff]   ;;  %v1447_v7 = vld [vmem:[%s1537_s24 + $0x8] sm:$0xff]  }
  0x11   : > { %v1448_v8 = vld [vmem:[%s1537_s24 + $0x78] sm:$0xff]   ;;  %v1449_v9 = vld [vmem:[%s1537_s24 + $0x10] sm:$0xff]   ;;  %v1450_v10 = vld [vmem:[%s1537_s24 + $0x80] sm:$0xff]  }
  0x12   : > { %1319 = vmatmul.mubr.msk.bf16.vlgmr.msra.gmra.mrb[0].mxu0 %vm391_vm2, %v1445_v5  ;;  %1375 = vmatmul.mubr.msk.bf16.vlgmr.msra.gmra.mrb[0].mxu1 %vm391_vm2, %v1446_v6  ;;  %v1451_v11 = vld [vmem:[%s1537_s24 + $0x18] sm:$0xff]   ;;  %v1452_v12 = vld [vmem:[%s1537_s24 + $0x88] sm:$0xff]   ;;  %v1453_v13 = vld [vmem:[%s1537_s24 + $0x20] sm:$0xff]  }
  0x13   : > { %1322 = vmatprep.mubr.msk.bf16.mxu0 %vm1481_vm1, %v1480_v1  ;;  %1378 = vmatprep.mubr.msk.bf16.mxu1 %vm1481_vm1, %v1480_v1  ;;  %v1454_v14 = vld [vmem:[%s1537_s24 + $0x90] sm:$0xff]   ;;  %v1455_v15 = vld [vmem:[%s1537_s24 + $0x28] sm:$0xff]   ;;  %v1456_v16 = vld [vmem:[%s1537_s24 + $0x98] sm:$0xff]  }
  0x14   : > { %v1457_v17 = vld [vmem:[%s1537_s24 + $0x30] sm:$0xff]   ;;  %v1458_v18 = vld [vmem:[%s1537_s24 + $0xa0] sm:$0xff]   ;;  %v1459_v19 = vld [vmem:[%s1537_s24 + $0x38] sm:$0xff]  }
  0x15   : > { %v1460_v20 = vld [vmem:[%s1537_s24 + $0xa8] sm:$0xff]   ;;  %v1461_v21 = vld [vmem:[%s1537_s24 + $0x40] sm:$0xff]   ;;  %v1462_v22 = vld [vmem:[%s1537_s24 + $0xb0] sm:$0xff]  }
  0x16   : > { %v1463_v23 = vld [vmem:[%s1537_s24 + $0x48] sm:$0xff]   ;;  %v1464_v24 = vld [vmem:[%s1537_s24 + $0xb8] sm:$0xff]   ;;  %v1465_v25 = vld [vmem:[%s1537_s24 + $0x50] sm:$0xff]  }
  0x17   : > { %v1466_v26 = vld [vmem:[%s1537_s24 + $0xc0] sm:$0xff]   ;;  %v1467_v27 = vld [vmem:[%s1537_s24 + $0x58] sm:$0xff]   ;;  %v1468_v28 = vld [vmem:[%s1537_s24 + $0xc8] sm:$0xff]  }
  0x18   : > { %v1469_v29 = vld [vmem:[%s1537_s24 + $0x60] sm:$0xff]   ;;  %v1470_v30 = vld [vmem:[%s1537_s24 + $0xd0] sm:$0xff]   ;;  %v1471_v31 = vld [vmem:[%s1537_s24 + $0x68] sm:$0xff]  }
  0x1a   : > { %1323 = vmatmul.mubr.msk.bf16.gmra.mrb[4].mxu0 %vm391_vm2, %v1447_v7  ;;  %1379 = vmatmul.mubr.msk.bf16.gmra.mrb[4].mxu1 %vm391_vm2, %v1448_v8 }
  0x1b   : > { %1326 = vmatprep.mubr.msk.bf16.mxu0 %vm1481_vm1, %v1480_v1  ;;  %1382 = vmatprep.mubr.msk.bf16.mxu1 %vm1481_vm1, %v1480_v1 }
  0x22   : > { %1327 = vmatmul.mubr.msk.bf16.gmra.mrb[8].mxu0 %vm391_vm2, %v1449_v9  ;;  %1383 = vmatmul.mubr.msk.bf16.gmra.mrb[8].mxu1 %vm391_vm2, %v1450_v10 }
  0x23   : > { %1330 = vmatprep.mubr.msk.bf16.mxu0 %vm1481_vm1, %v1480_v1  ;;  %1386 = vmatprep.mubr.msk.bf16.mxu1 %vm1481_vm1, %v1480_v1 }
  0x2a   : > { %1331 = vmatmul.mubr.msk.bf16.gmra.mrb[12].mxu0 %vm391_vm2, %v1451_v11  ;;  %1387 = vmatmul.mubr.msk.bf16.gmra.mrb[12].mxu1 %vm391_vm2, %v1452_v12 }
  0x2b   : > { %1334 = vmatprep.mubr.msk.bf16.mxu0 %vm1481_vm1, %v1480_v1  ;;  %1390 = vmatprep.mubr.msk.bf16.mxu1 %vm1481_vm1, %v1480_v1 }
  0x32   : > { %1335 = vmatmul.mubr.msk.bf16.gmra.mrb[16].mxu0 %vm391_vm2, %v1453_v13  ;;  %1391 = vmatmul.mubr.msk.bf16.gmra.mrb[16].mxu1 %vm391_vm2, %v1454_v14 }
  0x33   : > { %1338 = vmatprep.mubr.msk.bf16.mxu0 %vm1481_vm1, %v1480_v1  ;;  %1394 = vmatprep.mubr.msk.bf16.mxu1 %vm1481_vm1, %v1480_v1 }
  0x3a   : > { %1339 = vmatmul.mubr.msk.bf16.gmra.mrb[20].mxu0 %vm391_vm2, %v1455_v15  ;;  %1395 = vmatmul.mubr.msk.bf16.gmra.mrb[20].mxu1 %vm391_vm2, %v1456_v16 }
  0x3b   : > { %1342 = vmatprep.mubr.msk.bf16.mxu0 %vm1481_vm1, %v1480_v1  ;;  %1398 = vmatprep.mubr.msk.bf16.mxu1 %vm1481_vm1, %v1480_v1 }
  0x42   : > { %1343 = vmatmul.mubr.msk.bf16.gmra.mrb[24].mxu0 %vm391_vm2, %v1457_v17  ;;  %1399 = vmatmul.mubr.msk.bf16.gmra.mrb[24].mxu1 %vm391_vm2, %v1458_v18 }
  0x43   : > { %1346 = vmatprep.mubr.msk.bf16.mxu0 %vm1481_vm1, %v1480_v1  ;;  %1402 = vmatprep.mubr.msk.bf16.mxu1 %vm1481_vm1, %v1480_v1 }
  0x4a   : > { %1347 = vmatmul.mubr.msk.bf16.gmra.mrb[28].mxu0 %vm391_vm2, %v1459_v19  ;;  %1403 = vmatmul.mubr.msk.bf16.gmra.mrb[28].mxu1 %vm391_vm2, %v1460_v20 }
  0x4b   : > { %1350 = vmatprep.mubr.msk.bf16.mxu0 %vm1481_vm1, %v1480_v1  ;;  %1406 = vmatprep.mubr.msk.bf16.mxu1 %vm1481_vm1, %v1480_v1 }
  0x52   : > { %1351 = vmatmul.mubr.msk.bf16.gmra.mrb[32].mxu0 %vm391_vm2, %v1461_v21  ;;  %1407 = vmatmul.mubr.msk.bf16.gmra.mrb[32].mxu1 %vm391_vm2, %v1462_v22 }
  0x53   : > { %1354 = vmatprep.mubr.msk.bf16.mxu0 %vm1481_vm1, %v1480_v1  ;;  %1410 = vmatprep.mubr.msk.bf16.mxu1 %vm1481_vm1, %v1480_v1 }
  0x5a   : > { %1355 = vmatmul.mubr.msk.bf16.gmra.mrb[36].mxu0 %vm391_vm2, %v1463_v23  ;;  %1411 = vmatmul.mubr.msk.bf16.gmra.mrb[36].mxu1 %vm391_vm2, %v1464_v24 }
  0x5b   : > { %1358 = vmatprep.mubr.msk.bf16.mxu0 %vm1481_vm1, %v1480_v1  ;;  %1414 = vmatprep.mubr.msk.bf16.mxu1 %vm1481_vm1, %v1480_v1 }
  0x62   : > { %1359 = vmatmul.mubr.msk.bf16.gmra.mrb[40].mxu0 %vm391_vm2, %v1465_v25  ;;  %1415 = vmatmul.mubr.msk.bf16.gmra.mrb[40].mxu1 %vm391_vm2, %v1466_v26 }
  0x63   : > { %1362 = vmatprep.mubr.msk.bf16.mxu0 %vm1481_vm1, %v1480_v1  ;;  %1418 = vmatprep.mubr.msk.bf16.mxu1 %vm1481_vm1, %v1480_v1 }
  0x6a   : > { %1363 = vmatmul.mubr.msk.bf16.gmra.mrb[44].mxu0 %vm391_vm2, %v1467_v27  ;;  %1419 = vmatmul.mubr.msk.bf16.gmra.mrb[44].mxu1 %vm391_vm2, %v1468_v28 }
  0x6b   : > { %1366 = vmatprep.mubr.msk.bf16.mxu0 %vm1481_vm1, %v1480_v1  ;;  %1422 = vmatprep.mubr.msk.bf16.mxu1 %vm1481_vm1, %v1480_v1 }
  0x72   : > { %1367 = vmatmul.mubr.msk.bf16.gmra.mrb[48].mxu0 %vm391_vm2, %v1469_v29  ;;  %1423 = vmatmul.mubr.msk.bf16.gmra.mrb[48].mxu1 %vm391_vm2, %v1470_v30 }
  0x73   : > { %1370 = vmatprep.mubr.msk.bf16.mxu0 %vm1481_vm1, %v1480_v1 }
  0x7a   : > { %1371 = vmatmul.mubr.msk.bf16.gmra.mrb[52].mxu0 %vm391_vm2, %v1471_v31 }
  0xe5   : > { %v511_v33 = vpop.f32.mrb[0].mxu0  ;;  %v623_v36 = vpop.f32.mrb[0].mxu1 }
  0xe6   : > { %v512_v34 = vadd.f32 %v1646_v32, %v511_v33  ;;  %v1320_v35 = vpop.f32.mrb[1].mxu0  ;;  %v624_v38 = vadd.f32 %v1646_v32, %v623_v36  ;;  %v1376_v39 = vpop.f32.mrb[1].mxu1 }
  0xe7   : > { %v514_v37 = vpop.f32.mrb[2].mxu0  ;;  %v626_v43 = vpop.f32.mrb[2].mxu1 }
  0xe8   : > { %v726_v40 = vmax.f32 %v512_v34, 0.0  ;;  %v515_v41 = vadd.f32 %v1646_v32, %v514_v37  ;;  %v1321_v42 = vpop.f32.mrb[3].mxu0  ;;  %v754_v44 = vmax.f32 %v624_v38, 0.0  ;;  %v627_v45 = vadd.f32 %v1646_v32, %v626_v43  ;;  %v1377_v46 = vpop.f32.mrb[3].mxu1 }
  0xea   : > { %v1228_v47 = vpack.c.bf16 %v726_v40, %v726_v40  ;;  %v727_v48 = vmax.f32 %v515_v41, 0.0  ;;  %v1256_v49 = vpack.c.bf16 %v754_v44, %v754_v44  ;;  %v755_v50 = vmax.f32 %v627_v45, 0.0 }
  0xec   : > { %997 = vst.msk [vmem:[%s1656_s29] sm:$0xf] %vm996_vm3, %v1228_v47  ;;  %v1229_v51 = vpack.c.bf16 %v727_v48, %v727_v48  ;;  %1025 = vst.msk [vmem:[%s1656_s29 + $0x70] sm:$0xf] %vm996_vm3, %v1256_v49  ;;  %v1257_v52 = vpack.c.bf16 %v755_v50, %v755_v50 }
  0xed   : > { %v519_v53 = vpop.f32.mrb[4].mxu0  ;;  %v631_v56 = vpop.f32.mrb[4].mxu1 }
  0xee   : > { %998 = vst.msk [vmem:[%s1656_s29 + $0x4] sm:$0xf] %vm996_vm3, %v1229_v51  ;;  %v520_v54 = vadd.f32 %v1646_v32, %v519_v53  ;;  %v1324_v55 = vpop.f32.mrb[5].mxu0  ;;  %1026 = vst.msk [vmem:[%s1656_s29 + $0x74] sm:$0xf] %vm996_vm3, %v1257_v52  ;;  %v632_v58 = vadd.f32 %v1646_v32, %v631_v56  ;;  %v1380_v59 = vpop.f32.mrb[5].mxu1 }
  0xef   : > { %v522_v57 = vpop.f32.mrb[6].mxu0  ;;  %v634_v63 = vpop.f32.mrb[6].mxu1 }
  0xf0   : > { %v728_v60 = vmax.f32 %v520_v54, 0.0  ;;  %v523_v61 = vadd.f32 %v1646_v32, %v522_v57  ;;  %v1325_v62 = vpop.f32.mrb[7].mxu0  ;;  %v756_v0 = vmax.f32 %v632_v58, 0.0  ;;  %v635_v1 = vadd.f32 %v1646_v32, %v634_v63  ;;  %v1381_v2 = vpop.f32.mrb[7].mxu1 }
  0xf2   : > { %v1230_v3 = vpack.c.bf16 %v728_v60, %v728_v60  ;;  %v729_v4 = vmax.f32 %v523_v61, 0.0  ;;  %v1258_v5 = vpack.c.bf16 %v756_v0, %v756_v0  ;;  %v757_v6 = vmax.f32 %v635_v1, 0.0 }
  0xf4   : > { %999 = vst.msk [vmem:[%s1656_s29 + $0x8] sm:$0xf] %vm996_vm3, %v1230_v3  ;;  %v1231_v7 = vpack.c.bf16 %v729_v4, %v729_v4  ;;  %1027 = vst.msk [vmem:[%s1656_s29 + $0x78] sm:$0xf] %vm996_vm3, %v1258_v5  ;;  %v1259_v8 = vpack.c.bf16 %v757_v6, %v757_v6 }
  0xf5   : > { %v527_v9 = vpop.f32.mrb[8].mxu0  ;;  %v639_v12 = vpop.f32.mrb[8].mxu1 }
  0xf6   : > { %1000 = vst.msk [vmem:[%s1656_s29 + $0xc] sm:$0xf] %vm996_vm3, %v1231_v7  ;;  %v528_v10 = vadd.f32 %v1646_v32, %v527_v9  ;;  %v1328_v11 = vpop.f32.mrb[9].mxu0  ;;  %1028 = vst.msk [vmem:[%s1656_s29 + $0x7c] sm:$0xf] %vm996_vm3, %v1259_v8  ;;  %v640_v14 = vadd.f32 %v1646_v32, %v639_v12  ;;  %v1384_v15 = vpop.f32.mrb[9].mxu1 }
  0xf7   : > { %v530_v13 = vpop.f32.mrb[10].mxu0  ;;  %v642_v19 = vpop.f32.mrb[10].mxu1 }
  0xf8   : > { %v730_v16 = vmax.f32 %v528_v10, 0.0  ;;  %v531_v17 = vadd.f32 %v1646_v32, %v530_v13  ;;  %v1329_v18 = vpop.f32.mrb[11].mxu0  ;;  %v758_v20 = vmax.f32 %v640_v14, 0.0  ;;  %v643_v21 = vadd.f32 %v1646_v32, %v642_v19  ;;  %v1385_v22 = vpop.f32.mrb[11].mxu1 }
  0xfa   : > { %v1232_v23 = vpack.c.bf16 %v730_v16, %v730_v16  ;;  %v731_v24 = vmax.f32 %v531_v17, 0.0  ;;  %v1260_v25 = vpack.c.bf16 %v758_v20, %v758_v20  ;;  %v759_v26 = vmax.f32 %v643_v21, 0.0 }
  0xfc   : > { %1001 = vst.msk [vmem:[%s1656_s29 + $0x10] sm:$0xf] %vm996_vm3, %v1232_v23  ;;  %v1233_v27 = vpack.c.bf16 %v731_v24, %v731_v24  ;;  %1029 = vst.msk [vmem:[%s1656_s29 + $0x80] sm:$0xf] %vm996_vm3, %v1260_v25  ;;  %v1261_v28 = vpack.c.bf16 %v759_v26, %v759_v26 }
  0xfd   : > { %v535_v29 = vpop.f32.mrb[12].mxu0  ;;  %v647_v33 = vpop.f32.mrb[12].mxu1 }
  0xfe   : > { %1002 = vst.msk [vmem:[%s1656_s29 + $0x14] sm:$0xf] %vm996_vm3, %v1233_v27  ;;  %v536_v30 = vadd.f32 %v1646_v32, %v535_v29  ;;  %v1332_v31 = vpop.f32.mrb[13].mxu0  ;;  %1030 = vst.msk [vmem:[%s1656_s29 + $0x84] sm:$0xf] %vm996_vm3, %v1261_v28  ;;  %v648_v35 = vadd.f32 %v1646_v32, %v647_v33  ;;  %v1388_v36 = vpop.f32.mrb[13].mxu1 }
  0xff   : > { %v538_v34 = vpop.f32.mrb[14].mxu0  ;;  %v650_v40 = vpop.f32.mrb[14].mxu1 }
 0x100   : > { %v732_v37 = vmax.f32 %v536_v30, 0.0  ;;  %v539_v38 = vadd.f32 %v1646_v32, %v538_v34  ;;  %v1333_v39 = vpop.f32.mrb[15].mxu0  ;;  %v760_v41 = vmax.f32 %v648_v35, 0.0  ;;  %v651_v42 = vadd.f32 %v1646_v32, %v650_v40  ;;  %v1389_v43 = vpop.f32.mrb[15].mxu1 }
 0x102   : > { %v1234_v44 = vpack.c.bf16 %v732_v37, %v732_v37  ;;  %v733_v45 = vmax.f32 %v539_v38, 0.0  ;;  %v1262_v46 = vpack.c.bf16 %v760_v41, %v760_v41  ;;  %v761_v47 = vmax.f32 %v651_v42, 0.0 }
 0x104   : > { %1003 = vst.msk [vmem:[%s1656_s29 + $0x18] sm:$0xf] %vm996_vm3, %v1234_v44  ;;  %v1235_v48 = vpack.c.bf16 %v733_v45, %v733_v45  ;;  %1031 = vst.msk [vmem:[%s1656_s29 + $0x88] sm:$0xf] %vm996_vm3, %v1262_v46  ;;  %v1263_v49 = vpack.c.bf16 %v761_v47, %v761_v47 }
 0x105   : > { %v543_v50 = vpop.f32.mrb[16].mxu0  ;;  %v655_v53 = vpop.f32.mrb[16].mxu1 }
 0x106   : > { %1004 = vst.msk [vmem:[%s1656_s29 + $0x1c] sm:$0xf] %vm996_vm3, %v1235_v48  ;;  %v544_v51 = vadd.f32 %v1646_v32, %v543_v50  ;;  %v1336_v52 = vpop.f32.mrb[17].mxu0  ;;  %1032 = vst.msk [vmem:[%s1656_s29 + $0x8c] sm:$0xf] %vm996_vm3, %v1263_v49  ;;  %v656_v55 = vadd.f32 %v1646_v32, %v655_v53  ;;  %v1392_v56 = vpop.f32.mrb[17].mxu1 }
 0x107   : > { %v546_v54 = vpop.f32.mrb[18].mxu0  ;;  %v658_v60 = vpop.f32.mrb[18].mxu1 }
 0x108   : > { %v734_v57 = vmax.f32 %v544_v51, 0.0  ;;  %v547_v58 = vadd.f32 %v1646_v32, %v546_v54  ;;  %v1337_v59 = vpop.f32.mrb[19].mxu0  ;;  %v762_v61 = vmax.f32 %v656_v55, 0.0  ;;  %v659_v62 = vadd.f32 %v1646_v32, %v658_v60  ;;  %v1393_v63 = vpop.f32.mrb[19].mxu1 }
 0x10a   : > { %v1236_v0 = vpack.c.bf16 %v734_v57, %v734_v57  ;;  %v735_v1 = vmax.f32 %v547_v58, 0.0  ;;  %v1264_v2 = vpack.c.bf16 %v762_v61, %v762_v61  ;;  %v763_v3 = vmax.f32 %v659_v62, 0.0 }
 0x10c   : > { %1005 = vst.msk [vmem:[%s1656_s29 + $0x20] sm:$0xf] %vm996_vm3, %v1236_v0  ;;  %v1237_v4 = vpack.c.bf16 %v735_v1, %v735_v1  ;;  %1033 = vst.msk [vmem:[%s1656_s29 + $0x90] sm:$0xf] %vm996_vm3, %v1264_v2  ;;  %v1265_v5 = vpack.c.bf16 %v763_v3, %v763_v3 }
 0x10d   : > { %v551_v6 = vpop.f32.mrb[20].mxu0  ;;  %v663_v9 = vpop.f32.mrb[20].mxu1 }
 0x10e   : > { %1006 = vst.msk [vmem:[%s1656_s29 + $0x24] sm:$0xf] %vm996_vm3, %v1237_v4  ;;  %v552_v7 = vadd.f32 %v1646_v32, %v551_v6  ;;  %v1340_v8 = vpop.f32.mrb[21].mxu0  ;;  %1034 = vst.msk [vmem:[%s1656_s29 + $0x94] sm:$0xf] %vm996_vm3, %v1265_v5  ;;  %v664_v11 = vadd.f32 %v1646_v32, %v663_v9  ;;  %v1396_v12 = vpop.f32.mrb[21].mxu1 }
 0x10f   : > { %v554_v10 = vpop.f32.mrb[22].mxu0  ;;  %v666_v16 = vpop.f32.mrb[22].mxu1 }
 0x110   : > { %v736_v13 = vmax.f32 %v552_v7, 0.0  ;;  %v555_v14 = vadd.f32 %v1646_v32, %v554_v10  ;;  %v1341_v15 = vpop.f32.mrb[23].mxu0  ;;  %v764_v17 = vmax.f32 %v664_v11, 0.0  ;;  %v667_v18 = vadd.f32 %v1646_v32, %v666_v16  ;;  %v1397_v19 = vpop.f32.mrb[23].mxu1 }
 0x112   : > { %v1238_v20 = vpack.c.bf16 %v736_v13, %v736_v13  ;;  %v737_v21 = vmax.f32 %v555_v14, 0.0  ;;  %v1266_v22 = vpack.c.bf16 %v764_v17, %v764_v17  ;;  %v765_v23 = vmax.f32 %v667_v18, 0.0 }
 0x114   : > { %1007 = vst.msk [vmem:[%s1656_s29 + $0x28] sm:$0xf] %vm996_vm3, %v1238_v20  ;;  %v1239_v24 = vpack.c.bf16 %v737_v21, %v737_v21  ;;  %1035 = vst.msk [vmem:[%s1656_s29 + $0x98] sm:$0xf] %vm996_vm3, %v1266_v22  ;;  %v1267_v25 = vpack.c.bf16 %v765_v23, %v765_v23 }
 0x115   : > { %v559_v26 = vpop.f32.mrb[24].mxu0  ;;  %v671_v29 = vpop.f32.mrb[24].mxu1 }
 0x116   : > { %1008 = vst.msk [vmem:[%s1656_s29 + $0x2c] sm:$0xf] %vm996_vm3, %v1239_v24  ;;  %v560_v27 = vadd.f32 %v1646_v32, %v559_v26  ;;  %v1344_v28 = vpop.f32.mrb[25].mxu0  ;;  %1036 = vst.msk [vmem:[%s1656_s29 + $0x9c] sm:$0xf] %vm996_vm3, %v1267_v25  ;;  %v672_v31 = vadd.f32 %v1646_v32, %v671_v29  ;;  %v1400_v33 = vpop.f32.mrb[25].mxu1 }
 0x117   : > { %v562_v30 = vpop.f32.mrb[26].mxu0  ;;  %v674_v37 = vpop.f32.mrb[26].mxu1 }
 0x118   : > { %v738_v34 = vmax.f32 %v560_v27, 0.0  ;;  %v563_v35 = vadd.f32 %v1646_v32, %v562_v30  ;;  %v1345_v36 = vpop.f32.mrb[27].mxu0  ;;  %v766_v38 = vmax.f32 %v672_v31, 0.0  ;;  %v675_v39 = vadd.f32 %v1646_v32, %v674_v37  ;;  %v1401_v40 = vpop.f32.mrb[27].mxu1 }
 0x11a   : > { %v1240_v41 = vpack.c.bf16 %v738_v34, %v738_v34  ;;  %v739_v42 = vmax.f32 %v563_v35, 0.0  ;;  %v1268_v43 = vpack.c.bf16 %v766_v38, %v766_v38  ;;  %v767_v44 = vmax.f32 %v675_v39, 0.0 }
 0x11c   : > { %1009 = vst.msk [vmem:[%s1656_s29 + $0x30] sm:$0xf] %vm996_vm3, %v1240_v41  ;;  %v1241_v45 = vpack.c.bf16 %v739_v42, %v739_v42  ;;  %1037 = vst.msk [vmem:[%s1656_s29 + $0xa0] sm:$0xf] %vm996_vm3, %v1268_v43  ;;  %v1269_v46 = vpack.c.bf16 %v767_v44, %v767_v44 }
 0x11d   : > { %v567_v47 = vpop.f32.mrb[28].mxu0  ;;  %v679_v50 = vpop.f32.mrb[28].mxu1 }
 0x11e   : > { %1010 = vst.msk [vmem:[%s1656_s29 + $0x34] sm:$0xf] %vm996_vm3, %v1241_v45  ;;  %v568_v48 = vadd.f32 %v1646_v32, %v567_v47  ;;  %v1348_v49 = vpop.f32.mrb[29].mxu0  ;;  %1038 = vst.msk [vmem:[%s1656_s29 + $0xa4] sm:$0xf] %vm996_vm3, %v1269_v46  ;;  %v680_v52 = vadd.f32 %v1646_v32, %v679_v50  ;;  %v1404_v53 = vpop.f32.mrb[29].mxu1 }
 0x11f   : > { %v570_v51 = vpop.f32.mrb[30].mxu0  ;;  %v682_v57 = vpop.f32.mrb[30].mxu1 }
 0x120   : > { %v740_v54 = vmax.f32 %v568_v48, 0.0  ;;  %v571_v55 = vadd.f32 %v1646_v32, %v570_v51  ;;  %v1349_v56 = vpop.f32.mrb[31].mxu0  ;;  %v768_v58 = vmax.f32 %v680_v52, 0.0  ;;  %v683_v59 = vadd.f32 %v1646_v32, %v682_v57  ;;  %v1405_v60 = vpop.f32.mrb[31].mxu1 }
 0x122   : > { %v1242_v61 = vpack.c.bf16 %v740_v54, %v740_v54  ;;  %v741_v62 = vmax.f32 %v571_v55, 0.0  ;;  %v1270_v63 = vpack.c.bf16 %v768_v58, %v768_v58  ;;  %v769_v0 = vmax.f32 %v683_v59, 0.0 }
 0x124   : > { %1011 = vst.msk [vmem:[%s1656_s29 + $0x38] sm:$0xf] %vm996_vm3, %v1242_v61  ;;  %v1243_v1 = vpack.c.bf16 %v741_v62, %v741_v62  ;;  %1039 = vst.msk [vmem:[%s1656_s29 + $0xa8] sm:$0xf] %vm996_vm3, %v1270_v63  ;;  %v1271_v2 = vpack.c.bf16 %v769_v0, %v769_v0 }
 0x125   : > { %v575_v3 = vpop.f32.mrb[32].mxu0  ;;  %v687_v6 = vpop.f32.mrb[32].mxu1 }
 0x126   : > { %1012 = vst.msk [vmem:[%s1656_s29 + $0x3c] sm:$0xf] %vm996_vm3, %v1243_v1  ;;  %v576_v4 = vadd.f32 %v1646_v32, %v575_v3  ;;  %v1352_v5 = vpop.f32.mrb[33].mxu0  ;;  %1040 = vst.msk [vmem:[%s1656_s29 + $0xac] sm:$0xf] %vm996_vm3, %v1271_v2  ;;  %v688_v8 = vadd.f32 %v1646_v32, %v687_v6  ;;  %v1408_v9 = vpop.f32.mrb[33].mxu1 }
 0x127   : > { %v578_v7 = vpop.f32.mrb[34].mxu0  ;;  %v690_v13 = vpop.f32.mrb[34].mxu1 }
 0x128   : > { %v742_v10 = vmax.f32 %v576_v4, 0.0  ;;  %v579_v11 = vadd.f32 %v1646_v32, %v578_v7  ;;  %v1353_v12 = vpop.f32.mrb[35].mxu0  ;;  %v770_v14 = vmax.f32 %v688_v8, 0.0  ;;  %v691_v15 = vadd.f32 %v1646_v32, %v690_v13  ;;  %v1409_v16 = vpop.f32.mrb[35].mxu1 }
 0x12a   : > { %v1244_v17 = vpack.c.bf16 %v742_v10, %v742_v10  ;;  %v743_v18 = vmax.f32 %v579_v11, 0.0  ;;  %v1272_v19 = vpack.c.bf16 %v770_v14, %v770_v14  ;;  %v771_v20 = vmax.f32 %v691_v15, 0.0 }
 0x12c   : > { %1013 = vst.msk [vmem:[%s1656_s29 + $0x40] sm:$0xf] %vm996_vm3, %v1244_v17  ;;  %v1245_v21 = vpack.c.bf16 %v743_v18, %v743_v18  ;;  %1041 = vst.msk [vmem:[%s1656_s29 + $0xb0] sm:$0xf] %vm996_vm3, %v1272_v19  ;;  %v1273_v22 = vpack.c.bf16 %v771_v20, %v771_v20 }
 0x12d   : > { %v583_v23 = vpop.f32.mrb[36].mxu0  ;;  %v695_v26 = vpop.f32.mrb[36].mxu1 }
 0x12e   : > { %1014 = vst.msk [vmem:[%s1656_s29 + $0x44] sm:$0xf] %vm996_vm3, %v1245_v21  ;;  %v584_v24 = vadd.f32 %v1646_v32, %v583_v23  ;;  %v1356_v25 = vpop.f32.mrb[37].mxu0  ;;  %1042 = vst.msk [vmem:[%s1656_s29 + $0xb4] sm:$0xf] %vm996_vm3, %v1273_v22  ;;  %v696_v28 = vadd.f32 %v1646_v32, %v695_v26  ;;  %v1412_v29 = vpop.f32.mrb[37].mxu1 }
 0x12f   : > { %v586_v27 = vpop.f32.mrb[38].mxu0  ;;  %v698_v34 = vpop.f32.mrb[38].mxu1 }
 0x130   : > { %v744_v30 = vmax.f32 %v584_v24, 0.0  ;;  %v587_v31 = vadd.f32 %v1646_v32, %v586_v27  ;;  %v1357_v33 = vpop.f32.mrb[39].mxu0  ;;  %v772_v35 = vmax.f32 %v696_v28, 0.0  ;;  %v699_v36 = vadd.f32 %v1646_v32, %v698_v34  ;;  %v1413_v37 = vpop.f32.mrb[39].mxu1 }
 0x132   : > { %v1246_v38 = vpack.c.bf16 %v744_v30, %v744_v30  ;;  %v745_v39 = vmax.f32 %v587_v31, 0.0  ;;  %v1274_v40 = vpack.c.bf16 %v772_v35, %v772_v35  ;;  %v773_v41 = vmax.f32 %v699_v36, 0.0 }
 0x134   : > { %1015 = vst.msk [vmem:[%s1656_s29 + $0x48] sm:$0xf] %vm996_vm3, %v1246_v38  ;;  %v1247_v42 = vpack.c.bf16 %v745_v39, %v745_v39  ;;  %1043 = vst.msk [vmem:[%s1656_s29 + $0xb8] sm:$0xf] %vm996_vm3, %v1274_v40  ;;  %v1275_v43 = vpack.c.bf16 %v773_v41, %v773_v41 }
 0x135   : > { %v591_v44 = vpop.f32.mrb[40].mxu0  ;;  %v703_v47 = vpop.f32.mrb[40].mxu1 }
 0x136   : > { %1016 = vst.msk [vmem:[%s1656_s29 + $0x4c] sm:$0xf] %vm996_vm3, %v1247_v42  ;;  %v592_v45 = vadd.f32 %v1646_v32, %v591_v44  ;;  %v1360_v46 = vpop.f32.mrb[41].mxu0  ;;  %1044 = vst.msk [vmem:[%s1656_s29 + $0xbc] sm:$0xf] %vm996_vm3, %v1275_v43  ;;  %v704_v49 = vadd.f32 %v1646_v32, %v703_v47  ;;  %v1416_v50 = vpop.f32.mrb[41].mxu1 }
 0x137   : > { %v594_v48 = vpop.f32.mrb[42].mxu0  ;;  %v706_v54 = vpop.f32.mrb[42].mxu1 }
 0x138   : > { %v746_v51 = vmax.f32 %v592_v45, 0.0  ;;  %v595_v52 = vadd.f32 %v1646_v32, %v594_v48  ;;  %v1361_v53 = vpop.f32.mrb[43].mxu0  ;;  %v774_v55 = vmax.f32 %v704_v49, 0.0  ;;  %v707_v56 = vadd.f32 %v1646_v32, %v706_v54  ;;  %v1417_v57 = vpop.f32.mrb[43].mxu1 }
 0x13a   : > { %v1248_v58 = vpack.c.bf16 %v746_v51, %v746_v51  ;;  %v747_v59 = vmax.f32 %v595_v52, 0.0  ;;  %v1276_v60 = vpack.c.bf16 %v774_v55, %v774_v55  ;;  %v775_v61 = vmax.f32 %v707_v56, 0.0 }
 0x13c   : > { %1017 = vst.msk [vmem:[%s1656_s29 + $0x50] sm:$0xf] %vm996_vm3, %v1248_v58  ;;  %v1249_v62 = vpack.c.bf16 %v747_v59, %v747_v59  ;;  %1045 = vst.msk [vmem:[%s1656_s29 + $0xc0] sm:$0xf] %vm996_vm3, %v1276_v60  ;;  %v1277_v63 = vpack.c.bf16 %v775_v61, %v775_v61 }
 0x13d   : > { %v599_v0 = vpop.f32.mrb[44].mxu0  ;;  %v711_v3 = vpop.f32.mrb[44].mxu1 }
 0x13e   : > { %1018 = vst.msk [vmem:[%s1656_s29 + $0x54] sm:$0xf] %vm996_vm3, %v1249_v62  ;;  %v600_v1 = vadd.f32 %v1646_v32, %v599_v0  ;;  %v1364_v2 = vpop.f32.mrb[45].mxu0  ;;  %1046 = vst.msk [vmem:[%s1656_s29 + $0xc4] sm:$0xf] %vm996_vm3, %v1277_v63  ;;  %v712_v5 = vadd.f32 %v1646_v32, %v711_v3  ;;  %v1420_v6 = vpop.f32.mrb[45].mxu1 }
 0x13f   : > { %v602_v4 = vpop.f32.mrb[46].mxu0  ;;  %v714_v10 = vpop.f32.mrb[46].mxu1 }
 0x140   : > { %v748_v7 = vmax.f32 %v600_v1, 0.0  ;;  %v603_v8 = vadd.f32 %v1646_v32, %v602_v4  ;;  %v1365_v9 = vpop.f32.mrb[47].mxu0  ;;  %v776_v11 = vmax.f32 %v712_v5, 0.0  ;;  %v715_v12 = vadd.f32 %v1646_v32, %v714_v10  ;;  %v1421_v13 = vpop.f32.mrb[47].mxu1 }
 0x142   : > { %v1250_v14 = vpack.c.bf16 %v748_v7, %v748_v7  ;;  %v749_v15 = vmax.f32 %v603_v8, 0.0  ;;  %v1278_v16 = vpack.c.bf16 %v776_v11, %v776_v11  ;;  %v777_v17 = vmax.f32 %v715_v12, 0.0 }
 0x144   : > { %1019 = vst.msk [vmem:[%s1656_s29 + $0x58] sm:$0xf] %vm996_vm3, %v1250_v14  ;;  %v1251_v18 = vpack.c.bf16 %v749_v15, %v749_v15  ;;  %1047 = vst.msk [vmem:[%s1656_s29 + $0xc8] sm:$0xf] %vm996_vm3, %v1278_v16  ;;  %v1279_v19 = vpack.c.bf16 %v777_v17, %v777_v17 }
 0x145   : > { %v607_v20 = vpop.f32.mrb[48].mxu0  ;;  %v719_v23 = vpop.f32.mrb[48].mxu1 }
 0x146   : > { %1020 = vst.msk [vmem:[%s1656_s29 + $0x5c] sm:$0xf] %vm996_vm3, %v1251_v18  ;;  %v608_v21 = vadd.f32 %v1646_v32, %v607_v20  ;;  %v1368_v22 = vpop.f32.mrb[49].mxu0  ;;  %1048 = vst.msk [vmem:[%s1656_s29 + $0xcc] sm:$0xf] %vm996_vm3, %v1279_v19  ;;  %v720_v25 = vadd.f32 %v1646_v32, %v719_v23  ;;  %v1424_v26 = vpop.f32.mrb[49].mxu1 }
 0x147   : > { %v610_v24 = vpop.f32.mrb[50].mxu0  ;;  %v722_v30 = vpop.f32.mrb[50].mxu1 }
 0x148   : > { %v750_v27 = vmax.f32 %v608_v21, 0.0  ;;  %v611_v28 = vadd.f32 %v1646_v32, %v610_v24  ;;  %v1369_v29 = vpop.f32.mrb[51].mxu0  ;;  %v778_v31 = vmax.f32 %v720_v25, 0.0  ;;  %v723_v33 = vadd.f32 %v1646_v32, %v722_v30  ;;  %v1425_v34 = vpop.f32.mrb[51].mxu1 }
 0x14a   : > { %v1252_v35 = vpack.c.bf16 %v750_v27, %v750_v27  ;;  %v751_v36 = vmax.f32 %v611_v28, 0.0  ;;  %v1280_v37 = vpack.c.bf16 %v778_v31, %v778_v31  ;;  %v779_v38 = vmax.f32 %v723_v33, 0.0 }
 0x14c   : > { %1021 = vst.msk [vmem:[%s1656_s29 + $0x60] sm:$0xf] %vm996_vm3, %v1252_v35  ;;  %v1253_v39 = vpack.c.bf16 %v751_v36, %v751_v36  ;;  %1049 = vst.msk [vmem:[%s1656_s29 + $0xd0] sm:$0xf] %vm996_vm3, %v1280_v37  ;;  %v1281_v40 = vpack.c.bf16 %v779_v38, %v779_v38 }
 0x14d   : > { %v615_v41 = vpop.f32.mrb[52].mxu0 }
 0x14e   : > { %1022 = vst.msk [vmem:[%s1656_s29 + $0x64] sm:$0xf] %vm996_vm3, %v1253_v39  ;;  %v616_v42 = vadd.f32 %v1646_v32, %v615_v41  ;;  %v1372_v43 = vpop.f32.mrb[53].mxu0  ;;  %1050 = vst.msk [vmem:[%s1656_s29 + $0xd4] sm:$0xf] %vm996_vm3, %v1281_v40 }
 0x14f   : > { %v618_v44 = vpop.f32.mrb[54].mxu0 }
 0x150   : > { %v752_v45 = vmax.f32 %v616_v42, 0.0  ;;  %v619_v46 = vadd.f32 %v1646_v32, %v618_v44  ;;  %v1373_v47 = vpop.f32.mrb[55].mxu0 }
 0x152   : > { %v1254_v48 = vpack.c.bf16 %v752_v45, %v752_v45  ;;  %v753_v49 = vmax.f32 %v619_v46, 0.0 }
 0x154   : > { %1023 = vst.msk [vmem:[%s1656_s29 + $0x68] sm:$0xf] %vm996_vm3, %v1254_v48  ;;  %v1255_v50 = vpack.c.bf16 %v753_v49, %v753_v49 }
 0x156   : > { %1024 = vst.msk [vmem:[%s1656_s29 + $0x6c] sm:$0xf] %vm996_vm3, %v1255_v50 }
 0x157 PF: > { %s13_s12 = sadd.s32 1, %s1478_s12  }
 0x158   : > { %p10_p4 = scmp.ge.s32.totalorder %s13_s12, 8  }
 0x15a   :  { %12 = sbr.rel (!%p10_p4) target bundleno = 1 (0x1), region = 62 }

// kernel: state_encoder_forward.5
= control target key start
LH: loop header
LB: loop body
LE: loop exit
PB: predicated region body
PF: predicated region fallthrough
CT: control target
= control target key end

     0   :  { %s1551_s12 = smov 0   ;;  %s1798_s0 = inlined_call_operand.vmem [shape: bf16[648,288], index: 0, kind: input, shape index: {}]   ;;  %s1799_s1 = inlined_call_operand.vmem [shape: bf16[288,64], index: 1, kind: input, shape index: {}]   ;;  %s1800_s2 = inlined_call_operand.vmem [shape: f32[1,64], index: 2, kind: input, shape index: {}]   ;;  %s1801_s3 = inlined_call_operand.vmem [shape: bf16[648,64], index: 3, kind: output, shape index: {}]  }
   0x1 LB: > { %s1139_s13 = sadd.s32 4294967295, %s1529_s12   ;;  %p1143_p0 = scmp.ge.s32.totalorder %s1529_s12, 1  ;;  %s1529_s12 = sphi %s1551_s12, %s13_s12  }
   0x2   : > { %p139_p1 = scmp.lt.s32.totalorder %s1529_s12, 4 }
   0x4   : > { %p140_p2 = pnand %p1143_p0, %p139_p1 }
   0x5   : > { %v1450_v0 = vld [vmem:[%s1799_s1 + $0x40] sm:$0xff] (!%p140_p2)   ;;  %s164_s16 = smul.u32 (!%p140_p2), 27, %s1139_s13  ;;  %v1452_v2 = vld [vmem:[%s1799_s1 + $0x48] sm:$0xff] (!%p140_p2)   ;;  %v1454_v4 = vld [vmem:[%s1799_s1 + $0x50] sm:$0xff] (!%p140_p2)   ;;  %vm588_vm0 = vcmask (!%p140_p2), 261120   ;;  %vm1055_vm1 = vcmask (!%p140_p2), 519168  }
   0x6   : > { %143 = sbr.rel (%p140_p2) target bundleno = 344 (0x158), region = 32  ;;  %v1451_v1 = vld [vmem:[%s1799_s1] sm:$0xff] (!%p140_p2)   ;;  %1277 = vmatprep.subr.bf16.mxu0 (!%p140_p2), %v1450_v0  ;;  %1425 = vmatprep.subr.bf16.mxu1 (!%p140_p2), %v1450_v0  ;;  %v1453_v3 = vld [vmem:[%s1799_s1 + $0x8] sm:$0xff] (!%p140_p2)   ;;  %v1455_v5 = vld [vmem:[%s1799_s1 + $0x10] sm:$0xff] (!%p140_p2)  }
   0x7   : > { %p165_p3 = scmp.lt.s32.totalorder (!%p140_p2), %s164_s16, 80  ;;  %1278 = vmatpush3.bf16.msra.mxu0 (!%p140_p2), %v1451_v1  ;;  %1433 = vmatpush3.bf16.msra.mxu1 (!%p140_p2), %v1451_v1  ;;  %v1456_v6 = vld [vmem:[%s1799_s1 + $0x58] sm:$0xff] (!%p140_p2)   ;;  %v1458_v8 = vld [vmem:[%s1799_s1 + $0x60] sm:$0xff] (!%p140_p2)   ;;  %v1460_v10 = vld [vmem:[%s1799_s1 + $0x68] sm:$0xff] (!%p140_p2)  }
   0x8   : > { %1279 = vmatprep.subr.bf16.mxu0 (!%p140_p2), %v1452_v2  ;;  %1426 = vmatprep.subr.bf16.mxu1 (!%p140_p2), %v1452_v2  ;;  %v1457_v7 = vld [vmem:[%s1799_s1 + $0x18] sm:$0xff] (!%p140_p2)   ;;  %v1459_v9 = vld [vmem:[%s1799_s1 + $0x20] sm:$0xff] (!%p140_p2)   ;;  %v1461_v13 = vld [vmem:[%s1799_s1 + $0x28] sm:$0xff] (!%p140_p2)  }
   0x9   : > { %v1462_v14 = vld [vmem:[%s1799_s1 + $0x70] sm:$0xff] (!%p140_p2)   ;;  %v1464_v16 = vld [vmem:[%s1799_s1 + $0x78] sm:$0xff] (!%p140_p2)   ;;  %v1478_v18 = vld [vmem:[%s1799_s1 + $0x80] sm:$0xff] (!%p140_p2)  }
   0xa   : > { %v1463_v15 = vld [vmem:[%s1799_s1 + $0x30] sm:$0xff] (!%p140_p2)   ;;  %v1465_v17 = vld [vmem:[%s1799_s1 + $0x38] sm:$0xff] (!%p140_p2)   ;;  %v1484_v23 = vld [vmem:[%s1799_s1 + $0x88] sm:$0xff] (!%p140_p2)  }
   0xb   : > { %1280 = vmatpush3.bf16.msra.mxu0 (!%p140_p2), %v1453_v3  ;;  %1434 = vmatpush3.bf16.msra.mxu1 (!%p140_p2), %v1453_v3 }
   0xc   : > { %1281 = vmatprep.subr.bf16.mxu0 (!%p140_p2), %v1454_v4  ;;  %1427 = vmatprep.subr.bf16.mxu1 (!%p140_p2), %v1454_v4 }
   0xd   : > { %s1803_s16 = smov (!%p165_p3, %s164_s16), 80 }
   0xe   : > { %s1441_s29 = smul.u32 12, %s1803_s16  ;;  %s1145_s5 = sshll.u32 %s1803_s16, 2 }
   0xf   : > { %1282 = vmatpush3.bf16.msra.mxu0 %v1455_v5  ;;  %1435 = vmatpush3.bf16.msra.mxu1 %v1455_v5  ;;  %s1699_s8 = scalar_lea.vmem %s1801_s3, %s1145_s5 }
  0x10   : > { %1283 = vmatprep.subr.bf16.mxu0 %v1456_v6  ;;  %1428 = vmatprep.subr.bf16.mxu1 %v1456_v6  ;;  %s1592_s9 = scalar_lea.vmem %s1798_s0, %s1441_s29 }
  0x11   : > { %v1468_v11 = vld [vmem:[%s1592_s9 + $0x4] ss:$12 sps:$4 sm:$0xff]   ;;  %v1471_v12 = vld [vmem:[%s1592_s9 + $0x10c] ss:$12 sps:$4 sm:$0xff]   ;;  %v1469_v20 = vld [vmem:[%s1592_s9 + $0x108] ss:$12 sps:$4 sm:$0xff]  }
  0x12   : > { %663 = vmatprep.mubr.bf16.mxu0 %v1468_v11  ;;  %751 = vmatprep.mubr.bf16.mxu1 %v1471_v12  ;;  %v1466_v19 = vld [vmem:[%s1592_s9] ss:$12 sps:$4 sm:$0xff]   ;;  %v1472_v21 = vld [vmem:[%s1592_s9 + $0x1c] ss:$12 sps:$4 sm:$0xff]   ;;  %v1474_v22 = vld [vmem:[%s1592_s9 + $0x124] ss:$12 sps:$4 sm:$0xff]  }
  0x13   : > { %1284 = vmatpush3.bf16.msra.mxu0 %v1457_v7  ;;  %1436 = vmatpush3.bf16.msra.mxu1 %v1457_v7  ;;  %v230_v24 = vld [vmem:[%s1592_s9 + $0x138] sm:$0xff]  ;;  %v1477_v26 = vld [vmem:[%s1592_s9 + $0x120] ss:$12 sps:$4 sm:$0xff]   ;;  %v1487_v32 = vld [vmem:[%s1592_s9 + $0x8] ss:$12 sps:$4 sm:$0xff]  }
  0x14   : > { %1285 = vmatprep.subr.bf16.mxu0 %v1458_v8  ;;  %1429 = vmatprep.subr.bf16.mxu1 %v1458_v8  ;;  %v1476_v25 = vld [vmem:[%s1592_s9 + $0x18] ss:$12 sps:$4 sm:$0xff]   ;;  %v1479_v27 = vld [vmem:[%s1592_s9 + $0x34] ss:$12 sps:$4 sm:$0xff]   ;;  %v1187_v28 = vcombine.high %v230_v24, %v230_v24  ;;  %v1482_v29 = vld [vmem:[%s1592_s9 + $0x30] ss:$12 sps:$4 sm:$0xff]   ;;  %v1186_v30 = vcombine.low %v230_v24, %v230_v24 }
  0x15   : > { %v1485_v31 = vld [vmem:[%s1592_s9 + $0x4c] ss:$12 sps:$4 sm:$0xff]   ;;  %v1488_v33 = vld [vmem:[%s1592_s9 + $0x48] ss:$12 sps:$4 sm:$0xff]   ;;  %v1490_v35 = vld [vmem:[%s1592_s9 + $0x64] ss:$12 sps:$4 sm:$0xff]  }
  0x16   : > { %v1489_v34 = vld [vmem:[%s1592_s9 + $0x20] ss:$12 sps:$4 sm:$0xff]   ;;  %v1492_v36 = vld [vmem:[%s1592_s9 + $0x38] ss:$12 sps:$4 sm:$0xff]   ;;  %v1494_v38 = vld [vmem:[%s1592_s9 + $0x50] ss:$12 sps:$4 sm:$0xff]  }
  0x17   : > { %1286 = vmatpush3.bf16.msra.mxu0 %v1459_v9  ;;  %1437 = vmatpush3.bf16.msra.mxu1 %v1459_v9  ;;  %v1493_v37 = vld [vmem:[%s1592_s9 + $0x60] ss:$12 sps:$4 sm:$0xff]   ;;  %v1495_v39 = vld [vmem:[%s1592_s9 + $0x7c] ss:$12 sps:$4 sm:$0xff]   ;;  %v1498_v41 = vld [vmem:[%s1592_s9 + $0x78] ss:$12 sps:$4 sm:$0xff]  }
  0x18   : > { %1287 = vmatprep.subr.bf16.mxu0 %v1460_v10  ;;  %1430 = vmatprep.subr.bf16.mxu1 %v1460_v10  ;;  %v1497_v40 = vld [vmem:[%s1592_s9 + $0x68] ss:$12 sps:$4 sm:$0xff]   ;;  %v1499_v42 = vld [vmem:[%s1592_s9 + $0x80] ss:$12 sps:$4 sm:$0xff]   ;;  %v1502_v44 = vld [vmem:[%s1592_s9 + $0x98] ss:$12 sps:$4 sm:$0xff]  }
  0x19   : > { %v1500_v43 = vld [vmem:[%s1592_s9 + $0x94] ss:$12 sps:$4 sm:$0xff]   ;;  %v1503_v45 = vld [vmem:[%s1592_s9 + $0x90] ss:$12 sps:$4 sm:$0xff]   ;;  %v1505_v47 = vld [vmem:[%s1592_s9 + $0xac] ss:$12 sps:$4 sm:$0xff]  }
  0x1a   : > { %v1504_v46 = vld [vmem:[%s1592_s9 + $0xb0] ss:$12 sps:$4 sm:$0xff]   ;;  %v1507_v48 = vld [vmem:[%s1592_s9 + $0xc8] ss:$12 sps:$4 sm:$0xff]   ;;  %v1509_v50 = vld [vmem:[%s1592_s9 + $0xe0] ss:$12 sps:$4 sm:$0xff]  }
  0x1b   : > { %1288 = vmatpush3.bf16.msra.mxu0 %v1461_v13  ;;  %1438 = vmatpush3.bf16.msra.mxu1 %v1461_v13  ;;  %v1508_v49 = vld [vmem:[%s1592_s9 + $0xa8] ss:$12 sps:$4 sm:$0xff]   ;;  %v1510_v51 = vld [vmem:[%s1592_s9 + $0xc4] ss:$12 sps:$4 sm:$0xff]   ;;  %v1513_v53 = vld [vmem:[%s1592_s9 + $0xc0] ss:$12 sps:$4 sm:$0xff]  }
  0x1c   : > { %1289 = vmatprep.subr.bf16.mxu0 %v1462_v14  ;;  %1431 = vmatprep.subr.bf16.mxu1 %v1462_v14  ;;  %v1512_v52 = vld [vmem:[%s1592_s9 + $0xf8] ss:$12 sps:$4 sm:$0xff]   ;;  %v1514_v54 = vld [vmem:[%s1592_s9 + $0x110] ss:$12 sps:$4 sm:$0xff]   ;;  %v1517_v56 = vld [vmem:[%s1592_s9 + $0x128] ss:$12 sps:$4 sm:$0xff]  }
  0x1d   : > { %v1515_v55 = vld [vmem:[%s1592_s9 + $0xdc] ss:$12 sps:$4 sm:$0xff]   ;;  %v1518_v57 = vld [vmem:[%s1592_s9 + $0xd8] ss:$12 sps:$4 sm:$0xff]   ;;  %v1519_v58 = vld [vmem:[%s1592_s9 + $0x140] ss:$0 sps:$4 sm:$0xff]  }
  0x1e   : > { %v1520_v59 = vld [vmem:[%s1592_s9 + $0xf4] ss:$12 sps:$4 sm:$0xff]   ;;  %v1522_v60 = vld [vmem:[%s1592_s9 + $0xf0] ss:$12 sps:$4 sm:$0xff]  }
  0x1f   : > { %1290 = vmatpush3.bf16.msra.mxu0 %v1463_v15  ;;  %1439 = vmatpush3.bf16.msra.mxu1 %v1463_v15 }
  0x20   : > { %1291 = vmatprep.subr.bf16.mxu0 %v1464_v16  ;;  %1432 = vmatprep.subr.bf16.mxu1 %v1464_v16 }
  0x23   : > { %1292 = vmatpush3.bf16.msra.mxu0 %v1465_v17  ;;  %1440 = vmatpush3.bf16.msra.mxu1 %v1465_v17 }
  0x24   : > { %1393 = vmatprep.subr.bf16.mxu1 %v1478_v18 }
  0x26   : > { %664 = vmatmul.mubr.bf16.vlgmr.msra.gmra.mrb[0].mxu0 %v1466_v19  ;;  %752 = vmatmul.mubr.bf16.vlgmr.msra.gmra.mrb[0].mxu1 %v1469_v20 }
  0x27   : > { %671 = vmatprep.mubr.bf16.mxu0 %v1472_v21  ;;  %759 = vmatprep.mubr.bf16.mxu1 %v1474_v22 }
  0x28   : > { %1394 = vmatpush3.bf16.msra.mxu1 %v1478_v18 }
  0x29   : > { %1395 = vmatprep.subr.bf16.mxu1 %v1484_v23 }
  0x2c   : > { %1396 = vmatpush3.bf16.msra.mxu1 %v1484_v23 }
  0x2e   : > { %672 = vmatmul.mubr.bf16.gmra.mrb[4].mxu0 %v1476_v25  ;;  %760 = vmatmul.mubr.bf16.gmra.mrb[4].mxu1 %v1477_v26 }
  0x2f   : > { %679 = vmatprep.mubr.bf16.mxu0 %v1479_v27  ;;  %767 = vmatprep.mubr.bf16.mxu1 %v1187_v28 }
  0x36   : > { %680 = vmatmul.mubr.bf16.gmra.mrb[8].mxu0 %v1482_v29  ;;  %768 = vmatmul.mubr.bf16.gmra.mrb[8].mxu1 %v1186_v30 }
  0x37   : > { %687 = vmatprep.mubr.bf16.mxu0 %v1485_v31  ;;  %1397 = vmatprep.mubr.msk.bf16.mxu1 %vm588_vm0, %v1487_v32  ;;  %v1689_v32 = vld [vmem:[%s1800_s2] ss:$0 sm:$0xff] }
  0x3e   : > { %688 = vmatmul.mubr.bf16.gmra.mrb[12].mxu0 %v1488_v33  ;;  %1398 = vmatmul.mubr.msk.bf16.vlgmr.msra.gmra.mrb[12].mxu1 %vm588_vm0, %v1489_v34 }
  0x3f   : > { %695 = vmatprep.mubr.bf16.mxu0 %v1490_v35  ;;  %1401 = vmatprep.mubr.msk.bf16.mxu1 %vm588_vm0, %v1492_v36 }
  0x46   : > { %696 = vmatmul.mubr.bf16.gmra.mrb[16].mxu0 %v1493_v37  ;;  %1402 = vmatmul.mubr.msk.bf16.gmra.mrb[16].mxu1 %vm588_vm0, %v1494_v38 }
  0x47   : > { %703 = vmatprep.mubr.bf16.mxu0 %v1495_v39  ;;  %1405 = vmatprep.mubr.msk.bf16.mxu1 %vm588_vm0, %v1497_v40 }
  0x4e   : > { %704 = vmatmul.mubr.bf16.gmra.mrb[20].mxu0 %v1498_v41  ;;  %1406 = vmatmul.mubr.msk.bf16.gmra.mrb[20].mxu1 %vm588_vm0, %v1499_v42 }
  0x4f   : > { %711 = vmatprep.mubr.bf16.mxu0 %v1500_v43  ;;  %1409 = vmatprep.mubr.msk.bf16.mxu1 %vm588_vm0, %v1502_v44 }
  0x56   : > { %712 = vmatmul.mubr.bf16.gmra.mrb[24].mxu0 %v1503_v45  ;;  %1410 = vmatmul.mubr.msk.bf16.gmra.mrb[24].mxu1 %vm588_vm0, %v1504_v46 }
  0x57   : > { %719 = vmatprep.mubr.bf16.mxu0 %v1505_v47  ;;  %1413 = vmatprep.mubr.msk.bf16.mxu1 %vm588_vm0, %v1507_v48 }
  0x5e   : > { %720 = vmatmul.mubr.bf16.gmra.mrb[28].mxu0 %v1508_v49  ;;  %1414 = vmatmul.mubr.msk.bf16.gmra.mrb[28].mxu1 %vm588_vm0, %v1509_v50 }
  0x5f   : > { %727 = vmatprep.mubr.bf16.mxu0 %v1510_v51  ;;  %1417 = vmatprep.mubr.msk.bf16.mxu1 %vm588_vm0, %v1512_v52 }
  0x66   : > { %728 = vmatmul.mubr.bf16.gmra.mrb[32].mxu0 %v1513_v53  ;;  %1418 = vmatmul.mubr.msk.bf16.gmra.mrb[32].mxu1 %vm588_vm0, %v1514_v54 }
  0x67   : > { %735 = vmatprep.mubr.bf16.mxu0 %v1515_v55  ;;  %1421 = vmatprep.mubr.msk.bf16.mxu1 %vm588_vm0, %v1517_v56 }
  0x6e   : > { %736 = vmatmul.mubr.bf16.gmra.mrb[36].mxu0 %v1518_v57  ;;  %1422 = vmatmul.mubr.msk.bf16.gmra.mrb[36].mxu1 %vm588_vm0, %v1519_v58 }
  0x6f   : > { %743 = vmatprep.mubr.bf16.mxu0 %v1520_v59 }
  0x76   : > { %744 = vmatmul.mubr.bf16.gmra.mrb[40].mxu0 %v1522_v60 }
  0xf9   : > { %v1293_v61 = vpop.f32.mrb[0].mxu0  ;;  %v1359_v62 = vpop.f32.mrb[0].mxu1 }
  0xfa   : > { %v1294_v63 = vpop.f32.mrb[1].mxu0  ;;  %v1360_v0 = vpop.f32.mrb[1].mxu1 }
  0xfb   : > { %v1295_v1 = vadd.f32 %v1294_v63, %v1293_v61  ;;  %v1296_v2 = vpop.f32.mrb[2].mxu0  ;;  %v1676_v3 = vadd.f32 %v1360_v0, %v1359_v62  ;;  %v1362_v4 = vpop.f32.mrb[2].mxu1 }
  0xfc   : > { %v1297_v5 = vpop.f32.mrb[3].mxu0  ;;  %v1363_v6 = vpop.f32.mrb[3].mxu1 }
  0xfd   : > { %v1298_v7 = vadd.f32 %v1297_v5, %v1296_v2  ;;  %v1678_v8 = vadd.f32 %v1363_v6, %v1362_v4  ;;  %v666_v36 = vadd.f32 %v1295_v1, %v1689_v32 }
  0xff   : > { %v669_v45 = vadd.f32 %v1298_v7, %v1689_v32 }
 0x101   : > { %v1299_v9 = vpop.f32.mrb[4].mxu0  ;;  %v1365_v10 = vpop.f32.mrb[4].mxu1 }
 0x102   : > { %v1300_v11 = vpop.f32.mrb[5].mxu0  ;;  %v1366_v12 = vpop.f32.mrb[5].mxu1 }
 0x103   : > { %v1301_v13 = vadd.f32 %v1300_v11, %v1299_v9  ;;  %v1302_v14 = vpop.f32.mrb[6].mxu0  ;;  %v1680_v15 = vadd.f32 %v1366_v12, %v1365_v10  ;;  %v1368_v16 = vpop.f32.mrb[6].mxu1 }
 0x104   : > { %v1303_v17 = vpop.f32.mrb[7].mxu0  ;;  %v1369_v18 = vpop.f32.mrb[7].mxu1 }
 0x105   : > { %v1304_v19 = vadd.f32 %v1303_v17, %v1302_v14  ;;  %v1682_v20 = vadd.f32 %v1369_v18, %v1368_v16  ;;  %v674_v33 = vadd.f32 %v1301_v13, %v1689_v32 }
 0x107   : > { %v677_v40 = vadd.f32 %v1304_v19, %v1689_v32 }
 0x109   : > { %v1305_v21 = vpop.f32.mrb[8].mxu0  ;;  %v1371_v22 = vpop.f32.mrb[8].mxu1 }
 0x10a   : > { %v1306_v23 = vpop.f32.mrb[9].mxu0  ;;  %v1372_v24 = vpop.f32.mrb[9].mxu1 }
 0x10b   : > { %v1307_v25 = vadd.f32 %v1306_v23, %v1305_v21  ;;  %v1308_v26 = vpop.f32.mrb[10].mxu0  ;;  %v1684_v27 = vadd.f32 %v1372_v24, %v1371_v22  ;;  %v1374_v28 = vpop.f32.mrb[10].mxu1 }
 0x10c   : > { %v1309_v29 = vpop.f32.mrb[11].mxu0  ;;  %v1375_v30 = vpop.f32.mrb[11].mxu1 }
 0x10d   : > { %v1310_v31 = vadd.f32 %v1309_v29, %v1308_v26  ;;  %v682_v62 = vadd.f32 %v1307_v25, %v1689_v32 }
 0x10f   : > { %v685_v9 = vadd.f32 %v1310_v31, %v1689_v32 }
 0x111   : > { %v1311_v34 = vpop.f32.mrb[12].mxu0  ;;  %v1399_v35 = vpop.f32.mrb[12].mxu1 }
 0x112   : > { %v818_v37 = vadd.f32 %v1399_v35, %v674_v33  ;;  %v1312_v38 = vpop.f32.mrb[13].mxu0  ;;  %v809_v39 = vpop.f32.mrb[13].mxu1 }
 0x113   : > { %v1313_v41 = vadd.f32 %v1312_v38, %v1311_v34  ;;  %v810_v42 = vadd.f32 %v809_v39, %v666_v36  ;;  %v1314_v43 = vpop.f32.mrb[14].mxu0  ;;  %v1400_v44 = vpop.f32.mrb[14].mxu1 }
 0x114   : > { %v921_v46 = vmax.f32 %v818_v37, 0.0  ;;  %v821_v47 = vadd.f32 %v1400_v44, %v677_v40  ;;  %v1315_v48 = vpop.f32.mrb[15].mxu0  ;;  %v812_v49 = vpop.f32.mrb[15].mxu1 }
 0x115   : > { %v919_v50 = vmax.f32 %v810_v42, 0.0  ;;  %v1316_v51 = vadd.f32 %v1315_v48, %v1314_v43  ;;  %v813_v52 = vadd.f32 %v812_v49, %v669_v45  ;;  %v690_v58 = vadd.f32 %v1313_v41, %v1689_v32 }
 0x116   : > { %v1252_v53 = vpack.c.bf16 %v921_v46, %v921_v46  ;;  %v922_v54 = vmax.f32 %v821_v47, 0.0 }
 0x117   : > { %v1250_v55 = vpack.c.bf16 %v919_v50, %v919_v50  ;;  %v920_v56 = vmax.f32 %v813_v52, 0.0  ;;  %v693_v2 = vadd.f32 %v1316_v51, %v1689_v32 }
 0x118   : > { %1058 = vst.msk [vmem:[%s1699_s8 + $0x8] sm:$0xf] %vm1055_vm1, %v1252_v53  ;;  %v1253_v57 = vpack.c.bf16 %v922_v54, %v922_v54 }
 0x119   : > { %1056 = vst.msk [vmem:[%s1699_s8] sm:$0xf] %vm1055_vm1, %v1250_v55  ;;  %v1251_v59 = vpack.c.bf16 %v920_v56, %v920_v56  ;;  %v1317_v60 = vpop.f32.mrb[16].mxu0  ;;  %v1403_v61 = vpop.f32.mrb[16].mxu1 }
 0x11a   : > { %1059 = vst.msk [vmem:[%s1699_s8 + $0xc] sm:$0xf] %vm1055_vm1, %v1253_v57  ;;  %v834_v63 = vadd.f32 %v1403_v61, %v690_v58  ;;  %v1318_v0 = vpop.f32.mrb[17].mxu0  ;;  %v825_v1 = vpop.f32.mrb[17].mxu1 }
 0x11b   : > { %1057 = vst.msk [vmem:[%s1699_s8 + $0x4] sm:$0xf] %vm1055_vm1, %v1251_v59  ;;  %v1319_v4 = vadd.f32 %v1318_v0, %v1317_v60  ;;  %v826_v5 = vadd.f32 %v825_v1, %v682_v62  ;;  %v1320_v6 = vpop.f32.mrb[18].mxu0  ;;  %v1404_v7 = vpop.f32.mrb[18].mxu1 }
 0x11c   : > { %v925_v10 = vmax.f32 %v834_v63, 0.0  ;;  %v837_v11 = vadd.f32 %v1404_v7, %v693_v2  ;;  %v1321_v12 = vpop.f32.mrb[19].mxu0  ;;  %v828_v13 = vpop.f32.mrb[19].mxu1 }
 0x11d   : > { %v923_v14 = vmax.f32 %v826_v5, 0.0  ;;  %v1322_v16 = vadd.f32 %v1321_v12, %v1320_v6  ;;  %v829_v17 = vadd.f32 %v828_v13, %v685_v9  ;;  %v698_v28 = vadd.f32 %v1319_v4, %v1689_v32 }
 0x11e   : > { %v1256_v18 = vpack.c.bf16 %v925_v10, %v925_v10  ;;  %v926_v19 = vmax.f32 %v837_v11, 0.0 }
 0x11f   : > { %v1254_v21 = vpack.c.bf16 %v923_v14, %v923_v14  ;;  %v924_v22 = vmax.f32 %v829_v17, 0.0  ;;  %v701_v36 = vadd.f32 %v1322_v16, %v1689_v32 }
 0x120   : > { %1062 = vst.msk [vmem:[%s1699_s8 + $0x18] sm:$0xf] %vm1055_vm1, %v1256_v18  ;;  %v1257_v23 = vpack.c.bf16 %v926_v19, %v926_v19 }
 0x121   : > { %1060 = vst.msk [vmem:[%s1699_s8 + $0x10] sm:$0xf] %vm1055_vm1, %v1254_v21  ;;  %v1255_v24 = vpack.c.bf16 %v924_v22, %v924_v22  ;;  %v1323_v25 = vpop.f32.mrb[20].mxu0  ;;  %v1407_v26 = vpop.f32.mrb[20].mxu1 }
 0x122   : > { %1063 = vst.msk [vmem:[%s1699_s8 + $0x1c] sm:$0xf] %vm1055_vm1, %v1257_v23  ;;  %v1324_v29 = vpop.f32.mrb[21].mxu0  ;;  %v841_v30 = vpop.f32.mrb[21].mxu1 }
 0x123   : > { %1061 = vst.msk [vmem:[%s1699_s8 + $0x14] sm:$0xf] %vm1055_vm1, %v1255_v24  ;;  %v1325_v31 = vadd.f32 %v1324_v29, %v1323_v25  ;;  %v842_v33 = vadd.f32 %v841_v30, %v698_v28  ;;  %v1326_v34 = vpop.f32.mrb[22].mxu0  ;;  %v1408_v35 = vpop.f32.mrb[22].mxu1  ;;  %v754_v24 = vadd.f32 %v1676_v3, %v1689_v32 }
 0x124   : > { %v1327_v37 = vpop.f32.mrb[23].mxu0  ;;  %v844_v38 = vpop.f32.mrb[23].mxu1 }
 0x125   : > { %v706_v39 = vadd.f32 %v1325_v31, %v1689_v32  ;;  %v927_v40 = vmax.f32 %v842_v33, 0.0  ;;  %v1328_v41 = vadd.f32 %v1327_v37, %v1326_v34  ;;  %v845_v42 = vadd.f32 %v844_v38, %v701_v36 }
 0x126   : > { %v757_v34 = vadd.f32 %v1678_v8, %v1689_v32 }
 0x127   : > { %v850_v43 = vadd.f32 %v1407_v26, %v706_v39  ;;  %v1258_v44 = vpack.c.bf16 %v927_v40, %v927_v40  ;;  %v709_v45 = vadd.f32 %v1328_v41, %v1689_v32  ;;  %v928_v46 = vmax.f32 %v845_v42, 0.0 }
 0x129   : > { %v929_v47 = vmax.f32 %v850_v43, 0.0  ;;  %1064 = vst.msk [vmem:[%s1699_s8 + $0x20] sm:$0xf] %vm1055_vm1, %v1258_v44  ;;  %v853_v48 = vadd.f32 %v1408_v35, %v709_v45  ;;  %v1259_v49 = vpack.c.bf16 %v928_v46, %v928_v46  ;;  %v1329_v50 = vpop.f32.mrb[24].mxu0  ;;  %v1411_v51 = vpop.f32.mrb[24].mxu1 }
 0x12a   : > { %v1330_v52 = vpop.f32.mrb[25].mxu0  ;;  %v857_v53 = vpop.f32.mrb[25].mxu1 }
 0x12b   : > { %v1260_v54 = vpack.c.bf16 %v929_v47, %v929_v47  ;;  %v930_v55 = vmax.f32 %v853_v48, 0.0  ;;  %1065 = vst.msk [vmem:[%s1699_s8 + $0x24] sm:$0xf] %vm1055_vm1, %v1259_v49  ;;  %v1331_v56 = vadd.f32 %v1330_v52, %v1329_v50  ;;  %v1332_v57 = vpop.f32.mrb[26].mxu0  ;;  %v1412_v58 = vpop.f32.mrb[26].mxu1  ;;  %v770_v50 = vadd.f32 %v1684_v27, %v1689_v32 }
 0x12c   : > { %v1333_v59 = vpop.f32.mrb[27].mxu0  ;;  %v860_v60 = vpop.f32.mrb[27].mxu1 }
 0x12d   : > { %1066 = vst.msk [vmem:[%s1699_s8 + $0x28] sm:$0xf] %vm1055_vm1, %v1260_v54  ;;  %v1261_v61 = vpack.c.bf16 %v930_v55, %v930_v55  ;;  %v1334_v62 = vadd.f32 %v1333_v59, %v1332_v57  ;;  %v714_v63 = vadd.f32 %v1331_v56, %v1689_v32  ;;  %v762_v55 = vadd.f32 %v1680_v15, %v1689_v32 }
 0x12f   : > { %1067 = vst.msk [vmem:[%s1699_s8 + $0x2c] sm:$0xf] %vm1055_vm1, %v1261_v61  ;;  %v858_v0 = vadd.f32 %v857_v53, %v714_v63  ;;  %v717_v1 = vadd.f32 %v1334_v62, %v1689_v32 }
 0x131   : > { %v931_v2 = vmax.f32 %v858_v0, 0.0  ;;  %v861_v4 = vadd.f32 %v860_v60, %v717_v1  ;;  %v1335_v5 = vpop.f32.mrb[28].mxu0  ;;  %v1735_v6 = vpop.f32.mrb[28].mxu1 }
 0x132   : > { %v1336_v7 = vpop.f32.mrb[29].mxu0  ;;  %v873_v9 = vpop.f32.mrb[29].mxu1 }
 0x133   : > { %v1262_v10 = vpack.c.bf16 %v931_v2, %v931_v2  ;;  %v932_v11 = vmax.f32 %v861_v4, 0.0  ;;  %v1337_v12 = vadd.f32 %v1336_v7, %v1335_v5  ;;  %v1338_v13 = vpop.f32.mrb[30].mxu0  ;;  %v1737_v14 = vpop.f32.mrb[30].mxu1  ;;  %v765_v2 = vadd.f32 %v1682_v20, %v1689_v32 }
 0x134   : > { %v1339_v16 = vpop.f32.mrb[31].mxu0  ;;  %v876_v17 = vpop.f32.mrb[31].mxu1 }
 0x135   : > { %1068 = vst.msk [vmem:[%s1699_s8 + $0x30] sm:$0xf] %vm1055_vm1, %v1262_v10  ;;  %v1263_v18 = vpack.c.bf16 %v932_v11, %v932_v11  ;;  %v722_v19 = vadd.f32 %v1337_v12, %v1689_v32  ;;  %v1340_v21 = vadd.f32 %v1339_v16, %v1338_v13 }
 0x137   : > { %1069 = vst.msk [vmem:[%s1699_s8 + $0x34] sm:$0xf] %vm1055_vm1, %v1263_v18  ;;  %v866_v22 = vadd.f32 %v1411_v51, %v722_v19  ;;  %v725_v23 = vadd.f32 %v1340_v21, %v1689_v32 }
 0x139   : > { %v933_v25 = vmax.f32 %v866_v22, 0.0  ;;  %v869_v26 = vadd.f32 %v1412_v58, %v725_v23  ;;  %v1341_v28 = vpop.f32.mrb[32].mxu0  ;;  %v1419_v29 = vpop.f32.mrb[32].mxu1 }
 0x13a   : > { %v898_v30 = vadd.f32 %v1419_v29, %v754_v24  ;;  %v1342_v31 = vpop.f32.mrb[33].mxu0  ;;  %v1747_v33 = vpop.f32.mrb[33].mxu1 }
 0x13b   : > { %v1264_v35 = vpack.c.bf16 %v933_v25, %v933_v25  ;;  %v934_v36 = vmax.f32 %v869_v26, 0.0  ;;  %v1343_v37 = vadd.f32 %v1342_v31, %v1341_v28  ;;  %v1344_v38 = vpop.f32.mrb[34].mxu0  ;;  %v1420_v39 = vpop.f32.mrb[34].mxu1 }
 0x13c   : > { %v941_v3 = vmax.f32 %v898_v30, 0.0  ;;  %v901_v40 = vadd.f32 %v1420_v39, %v757_v34  ;;  %v1345_v41 = vpop.f32.mrb[35].mxu0  ;;  %v1751_v42 = vpop.f32.mrb[35].mxu1 }
 0x13d   : > { %1070 = vst.msk [vmem:[%s1699_s8 + $0x38] sm:$0xf] %vm1055_vm1, %v1264_v35  ;;  %v1265_v43 = vpack.c.bf16 %v934_v36, %v934_v36  ;;  %v730_v44 = vadd.f32 %v1343_v37, %v1689_v32  ;;  %v1346_v45 = vadd.f32 %v1345_v41, %v1344_v38 }
 0x13e   : > { %v1272_v8 = vpack.c.bf16 %v941_v3, %v941_v3  ;;  %v942_v46 = vmax.f32 %v901_v40, 0.0 }
 0x13f   : > { %1071 = vst.msk [vmem:[%s1699_s8 + $0x3c] sm:$0xf] %vm1055_vm1, %v1265_v43  ;;  %v874_v47 = vadd.f32 %v873_v9, %v730_v44  ;;  %v733_v48 = vadd.f32 %v1346_v45, %v1689_v32 }
 0x140   : > { %1078 = vst.msk [vmem:[%s1699_s8 + $0x58] sm:$0xf] %vm1055_vm1, %v1272_v8  ;;  %v1273_v49 = vpack.c.bf16 %v942_v46, %v942_v46 }
 0x141   : > { %v935_v51 = vmax.f32 %v874_v47, 0.0  ;;  %v877_v52 = vadd.f32 %v876_v17, %v733_v48  ;;  %v1347_v53 = vpop.f32.mrb[36].mxu0  ;;  %v1423_v54 = vpop.f32.mrb[36].mxu1 }
 0x142   : > { %1079 = vst.msk [vmem:[%s1699_s8 + $0x5c] sm:$0xf] %vm1055_vm1, %v1273_v49  ;;  %v914_v56 = vadd.f32 %v1423_v54, %v770_v50  ;;  %v1348_v57 = vpop.f32.mrb[37].mxu0  ;;  %v905_v58 = vpop.f32.mrb[37].mxu1 }
 0x143   : > { %v1266_v59 = vpack.c.bf16 %v935_v51, %v935_v51  ;;  %v936_v60 = vmax.f32 %v877_v52, 0.0  ;;  %v1349_v61 = vadd.f32 %v1348_v57, %v1347_v53  ;;  %v906_v62 = vadd.f32 %v905_v58, %v762_v55  ;;  %v1350_v63 = vpop.f32.mrb[38].mxu0  ;;  %v1424_v27 = vpop.f32.mrb[38].mxu1 }
 0x144   : > { %v945_v0 = vmax.f32 %v914_v56, 0.0  ;;  %v1351_v1 = vpop.f32.mrb[39].mxu0  ;;  %v908_v15 = vpop.f32.mrb[39].mxu1 }
 0x145   : > { %1072 = vst.msk [vmem:[%s1699_s8 + $0x40] sm:$0xf] %vm1055_vm1, %v1266_v59  ;;  %v1267_v4 = vpack.c.bf16 %v936_v60, %v936_v60  ;;  %v738_v5 = vadd.f32 %v1349_v61, %v1689_v32  ;;  %v943_v7 = vmax.f32 %v906_v62, 0.0  ;;  %v1352_v9 = vadd.f32 %v1351_v1, %v1350_v63 }
 0x146   : > { %v1276_v10 = vpack.c.bf16 %v945_v0, %v945_v0  ;;  %v909_v11 = vadd.f32 %v908_v15, %v765_v2 }
 0x147   : > { %1073 = vst.msk [vmem:[%s1699_s8 + $0x44] sm:$0xf] %vm1055_vm1, %v1267_v4  ;;  %v882_v12 = vadd.f32 %v1735_v6, %v738_v5  ;;  %v1274_v13 = vpack.c.bf16 %v943_v7, %v943_v7  ;;  %v741_v20 = vadd.f32 %v1352_v9, %v1689_v32 }
 0x148   : > { %1082 = vst.msk [vmem:[%s1699_s8 + $0x68] sm:$0xf] %vm1055_vm1, %v1276_v10  ;;  %v944_v16 = vmax.f32 %v909_v11, 0.0 }
 0x149   : > { %v937_v17 = vmax.f32 %v882_v12, 0.0  ;;  %1080 = vst.msk [vmem:[%s1699_s8 + $0x60] sm:$0xf] %vm1055_vm1, %v1274_v13  ;;  %v885_v18 = vadd.f32 %v1737_v14, %v741_v20  ;;  %v1353_v19 = vpop.f32.mrb[40].mxu0 }
 0x14a   : > { %v1275_v21 = vpack.c.bf16 %v944_v16, %v944_v16  ;;  %v1354_v22 = vpop.f32.mrb[41].mxu0 }
 0x14b   : > { %v1268_v23 = vpack.c.bf16 %v937_v17, %v937_v17  ;;  %v938_v24 = vmax.f32 %v885_v18, 0.0  ;;  %v1355_v6 = vadd.f32 %v1354_v22, %v1353_v19  ;;  %v1356_v25 = vpop.f32.mrb[42].mxu0 }
 0x14c   : > { %1081 = vst.msk [vmem:[%s1699_s8 + $0x64] sm:$0xf] %vm1055_vm1, %v1275_v21  ;;  %v1357_v26 = vpop.f32.mrb[43].mxu0 }
 0x14d   : > { %1074 = vst.msk [vmem:[%s1699_s8 + $0x48] sm:$0xf] %vm1055_vm1, %v1268_v23  ;;  %v1269_v28 = vpack.c.bf16 %v938_v24, %v938_v24  ;;  %v746_v29 = vadd.f32 %v1355_v6, %v1689_v32  ;;  %v1358_v30 = vadd.f32 %v1357_v26, %v1356_v25 }
 0x14f   : > { %1075 = vst.msk [vmem:[%s1699_s8 + $0x4c] sm:$0xf] %vm1055_vm1, %v1269_v28  ;;  %v890_v14 = vadd.f32 %v1747_v33, %v746_v29  ;;  %v749_v31 = vadd.f32 %v1358_v30, %v1689_v32 }
 0x151   : > { %v939_v34 = vmax.f32 %v890_v14, 0.0  ;;  %v893_v35 = vadd.f32 %v1751_v42, %v749_v31 }
 0x153   : > { %v1270_v36 = vpack.c.bf16 %v939_v34, %v939_v34  ;;  %v940_v37 = vmax.f32 %v893_v35, 0.0 }
 0x155   : > { %1076 = vst.msk [vmem:[%s1699_s8 + $0x50] sm:$0xf] %vm1055_vm1, %v1270_v36  ;;  %v1271_v38 = vpack.c.bf16 %v940_v37, %v940_v37 }
 0x157   : > { %1077 = vst.msk [vmem:[%s1699_s8 + $0x54] sm:$0xf] %vm1055_vm1, %v1271_v38 }
 0x158 PF: > { %s13_s12 = sadd.s32 1, %s1529_s12  }
 0x159   : > { %p10_p4 = scmp.ge.s32.totalorder %s13_s12, 5  }
 0x15b   :  { %12 = sbr.rel (!%p10_p4) target bundleno = 1 (0x1), region = 62 }

// kernel: state_encoder_forward.6
= control target key start
LH: loop header
LB: loop body
LE: loop exit
PB: predicated region body
PF: predicated region fallthrough
CT: control target
= control target key end

     0   :  { %v1729_v24 = vmov 0.0   ;;  %vm1730_vm0 = vmmov 0   ;;  %vm640_vm1 = vcmask 523264   ;;  %s2177_s1 = inlined_call_operand.vmem [shape: bf16[576,128], index: 1, kind: input, shape index: {}]   ;;  %s2178_s0 = inlined_call_operand.vmem [shape: bf16[168,576], index: 0, kind: input, shape index: {}]   ;;  %s2179_s2 = inlined_call_operand.vmem [shape: f32[1,128], index: 2, kind: input, shape index: {}]   ;;  %s2180_s3 = inlined_call_operand.vmem [shape: bf16[168,128], index: 3, kind: output, shape index: {}]  }
   0x1   :  { %v1618_v0 = vld [vmem:[%s2177_s1 + $0x40] sm:$0xff]   ;;  %v1620_v2 = vld [vmem:[%s2177_s1 + $0x48] sm:$0xff]   ;;  %v1622_v4 = vld [vmem:[%s2177_s1 + $0x50] sm:$0xff]  }
   0x2   :  { %v1619_v1 = vld [vmem:[%s2177_s1] sm:$0xff]   ;;  %1369 = vmatprep.subr.bf16.mxu0 %v1618_v0  ;;  %1600 = vmatprep.subr.bf16.mxu1 %v1618_v0  ;;  %v1621_v3 = vld [vmem:[%s2177_s1 + $0x8] sm:$0xff]   ;;  %v1623_v5 = vld [vmem:[%s2177_s1 + $0x10] sm:$0xff]  }
   0x3   :  { %1370 = vmatpush3.bf16.msra.mxu0 %v1619_v1  ;;  %1608 = vmatpush3.bf16.msra.mxu1 %v1619_v1  ;;  %v1624_v6 = vld [vmem:[%s2177_s1 + $0x58] sm:$0xff]   ;;  %v1626_v8 = vld [vmem:[%s2177_s1 + $0x60] sm:$0xff]   ;;  %v1628_v10 = vld [vmem:[%s2177_s1 + $0x68] sm:$0xff]  }
   0x4   :  { %1371 = vmatprep.subr.bf16.mxu0 %v1620_v2  ;;  %1601 = vmatprep.subr.bf16.mxu1 %v1620_v2  ;;  %v1625_v7 = vld [vmem:[%s2177_s1 + $0x18] sm:$0xff]   ;;  %v1627_v9 = vld [vmem:[%s2177_s1 + $0x20] sm:$0xff]   ;;  %v1639_v12 = vld [vmem:[%s2178_s0 + $0xf4] ss:$20 sps:$4 sm:$0xff]  }
   0x5   :  { %v1636_v11 = vld [vmem:[%s2178_s0 + $0x4] ss:$20 sps:$4 sm:$0xff]   ;;  %v1629_v13 = vld [vmem:[%s2177_s1 + $0x28] sm:$0xff]   ;;  %v1630_v14 = vld [vmem:[%s2177_s1 + $0x70] sm:$0xff]   ;;  %754 = vmatprep.mubr.bf16.mxu1 %v1639_v12 }
   0x6   :  { %706 = vmatprep.mubr.bf16.mxu0 %v1636_v11  ;;  %v1631_v15 = vld [vmem:[%s2177_s1 + $0x30] sm:$0xff]   ;;  %v1632_v16 = vld [vmem:[%s2177_s1 + $0x78] sm:$0xff]   ;;  %v1641_v18 = vld [vmem:[%s2177_s1 + $0xc0] sm:$0xff]  }
   0x7   :  { %1372 = vmatpush3.bf16.msra.mxu0 %v1621_v3  ;;  %1609 = vmatpush3.bf16.msra.mxu1 %v1621_v3  ;;  %v1633_v17 = vld [vmem:[%s2177_s1 + $0x38] sm:$0xff]   ;;  %v1634_v19 = vld [vmem:[%s2178_s0] ss:$20 sps:$4 sm:$0xff]   ;;  %v1637_v20 = vld [vmem:[%s2178_s0 + $0xf0] ss:$20 sps:$4 sm:$0xff]  }
   0x8   :  { %1373 = vmatprep.subr.bf16.mxu0 %v1622_v4  ;;  %1602 = vmatprep.subr.bf16.mxu1 %v1622_v4  ;;  %v1640_v21 = vld [vmem:[%s2177_s1 + $0x100] sm:$0xff]   ;;  %v1645_v25 = vld [vmem:[%s2178_s0 + $0x11c] ss:$20 sps:$4 sm:$0xff]   ;;  %v1649_v26 = vld [vmem:[%s2177_s1 + $0xc8] sm:$0xff]  }
   0x9   :  { %v1642_v22 = vld [vmem:[%s2177_s1 + $0x80] sm:$0xff]   ;;  %v1650_v27 = vld [vmem:[%s2177_s1 + $0x88] sm:$0xff]   ;;  %v1651_v30 = vld [vmem:[%s2177_s1 + $0xd0] sm:$0xff]  }
   0xa   :  { %v1643_v23 = vld [vmem:[%s2178_s0 + $0x2c] ss:$20 sps:$4 sm:$0xff]   ;;  %v1647_v29 = vld [vmem:[%s2178_s0 + $0x28] ss:$20 sps:$4 sm:$0xff]   ;;  %v1653_v32 = vld [vmem:[%s2177_s1 + $0x90] sm:$0xff]  }
   0xb   :  { %1374 = vmatpush3.bf16.msra.mxu0 %v1623_v5  ;;  %1610 = vmatpush3.bf16.msra.mxu1 %v1623_v5  ;;  %v1652_v28 = vld [vmem:[%s2177_s1 + $0x108] sm:$0xff]   ;;  %v1656_v34 = vld [vmem:[%s2178_s0 + $0x144] ss:$20 sps:$4 sm:$0xff]   ;;  %v1670_v36 = vld [vmem:[%s2177_s1 + $0x110] sm:$0xff]  }
   0xc   :  { %1375 = vmatprep.subr.bf16.mxu0 %v1624_v6  ;;  %1603 = vmatprep.subr.bf16.mxu1 %v1624_v6  ;;  %v1648_v31 = vld [vmem:[%s2178_s0 + $0x118] ss:$20 sps:$4 sm:$0xff]   ;;  %v1654_v33 = vld [vmem:[%s2178_s0 + $0x54] ss:$20 sps:$4 sm:$0xff]   ;;  %v1658_v38 = vld [vmem:[%s2178_s0 + $0x50] ss:$20 sps:$4 sm:$0xff]  }
   0xd   :  { %v1660_v35 = vld [vmem:[%s2177_s1 + $0xd8] sm:$0xff]   ;;  %v1659_v39 = vld [vmem:[%s2178_s0 + $0x140] ss:$20 sps:$4 sm:$0xff]   ;;  %v1671_v45 = vld [vmem:[%s2177_s1 + $0xe8] sm:$0xff]  }
   0xe   :  { %v1661_v37 = vld [vmem:[%s2177_s1 + $0x98] sm:$0xff]   ;;  %v1666_v40 = vld [vmem:[%s2177_s1 + $0xe0] sm:$0xff]   ;;  %v1672_v46 = vld [vmem:[%s2177_s1 + $0xa8] sm:$0xff]  }
   0xf   :  { %1376 = vmatpush3.bf16.msra.mxu0 %v1625_v7  ;;  %1611 = vmatpush3.bf16.msra.mxu1 %v1625_v7  ;;  %v1662_v41 = vld [vmem:[%s2178_s0 + $0x7c] ss:$20 sps:$4 sm:$0xff]   ;;  %v1664_v42 = vld [vmem:[%s2178_s0 + $0x16c] ss:$20 sps:$4 sm:$0xff]   ;;  %v1673_v51 = vld [vmem:[%s2178_s0 + $0xa4] ss:$20 sps:$4 sm:$0xff]  }
  0x10   :  { %1377 = vmatprep.subr.bf16.mxu0 %v1626_v8  ;;  %1604 = vmatprep.subr.bf16.mxu1 %v1626_v8  ;;  %v1669_v43 = vld [vmem:[%s2177_s1 + $0xa0] sm:$0xff]   ;;  %v1682_v44 = vld [vmem:[%s2177_s1 + $0x118] sm:$0xff]   ;;  %v75_v47 = vld [vmem:[%s2178_s0 + $0x190] sm:$0xff] }
  0x11   :  { %v1678_v48 = vld [vmem:[%s2177_s1 + $0xf0] sm:$0xff]   ;;  %v1667_v49 = vld [vmem:[%s2178_s0 + $0x78] ss:$20 sps:$4 sm:$0xff]   ;;  %v1668_v50 = vld [vmem:[%s2178_s0 + $0x168] ss:$20 sps:$4 sm:$0xff]   ;;  %v1217_v52 = vcombine.high %v75_v47, %v75_v47  ;;  %v1216_v57 = vcombine.low %v75_v47, %v75_v47 }
  0x12   :  { %v1679_v53 = vld [vmem:[%s2177_s1 + $0xb0] sm:$0xff]   ;;  %v1680_v54 = vld [vmem:[%s2177_s1 + $0xf8] sm:$0xff]   ;;  %v1683_v58 = vld [vmem:[%s2178_s0 + $0xcc] ss:$20 sps:$4 sm:$0xff]  }
  0x13   :  { %1378 = vmatpush3.bf16.msra.mxu0 %v1627_v9  ;;  %1612 = vmatpush3.bf16.msra.mxu1 %v1627_v9  ;;  %v1681_v55 = vld [vmem:[%s2177_s1 + $0xb8] sm:$0xff]   ;;  %v1676_v56 = vld [vmem:[%s2178_s0 + $0xa0] ss:$20 sps:$4 sm:$0xff]   ;;  %v1691_v63 = vld [vmem:[%s2178_s0 + $0x30] ss:$20 sps:$4 sm:$0xff]  }
  0x14   :  { %1379 = vmatprep.subr.bf16.mxu0 %v1628_v10  ;;  %1605 = vmatprep.subr.bf16.mxu1 %v1628_v10  ;;  %v1687_v59 = vld [vmem:[%s2178_s0 + $0xc] ss:$20 sps:$4 sm:$0xff]   ;;  %v1685_v60 = vld [vmem:[%s2178_s0 + $0x8] ss:$20 sps:$4 sm:$0xff]   ;;  %v1692_v0 = vld [vmem:[%s2178_s0 + $0x10] ss:$20 sps:$4 sm:$0xff]  }
  0x15   :  { %v1688_v61 = vld [vmem:[%s2178_s0 + $0xc8] ss:$20 sps:$4 sm:$0xff]   ;;  %v1695_v2 = vld [vmem:[%s2178_s0 + $0x58] ss:$20 sps:$4 sm:$0xff]   ;;  %v1699_v5 = vld [vmem:[%s2178_s0 + $0x80] ss:$20 sps:$4 sm:$0xff]  }
  0x16   :  { %v1689_v62 = vld [vmem:[%s2178_s0 + $0x34] ss:$20 sps:$4 sm:$0xff]   ;;  %v1693_v1 = vld [vmem:[%s2178_s0 + $0x5c] ss:$20 sps:$4 sm:$0xff]   ;;  %v1696_v3 = vld [vmem:[%s2178_s0 + $0x38] ss:$20 sps:$4 sm:$0xff]  }
  0x17   :  { %1380 = vmatpush3.bf16.msra.mxu0 %v1629_v13  ;;  %1613 = vmatpush3.bf16.msra.mxu1 %v1629_v13  ;;  %v1697_v4 = vld [vmem:[%s2178_s0 + $0x84] ss:$20 sps:$4 sm:$0xff]   ;;  %v1700_v6 = vld [vmem:[%s2178_s0 + $0x60] ss:$20 sps:$4 sm:$0xff]   ;;  %v1703_v8 = vld [vmem:[%s2178_s0 + $0xa8] ss:$20 sps:$4 sm:$0xff]  }
  0x18   :  { %1381 = vmatprep.subr.bf16.mxu0 %v1630_v14  ;;  %1606 = vmatprep.subr.bf16.mxu1 %v1630_v14  ;;  %v1701_v7 = vld [vmem:[%s2178_s0 + $0xac] ss:$20 sps:$4 sm:$0xff]   ;;  %v1704_v9 = vld [vmem:[%s2178_s0 + $0x88] ss:$20 sps:$4 sm:$0xff]   ;;  %v1707_v11 = vld [vmem:[%s2178_s0 + $0xd0] ss:$20 sps:$4 sm:$0xff]  }
  0x19   :  { %v1705_v10 = vld [vmem:[%s2178_s0 + $0xd4] ss:$20 sps:$4 sm:$0xff]   ;;  %v1708_v12 = vld [vmem:[%s2178_s0 + $0xb0] ss:$20 sps:$4 sm:$0xff]   ;;  %v1711_v14 = vld [vmem:[%s2178_s0 + $0xf8] ss:$20 sps:$4 sm:$0xff]  }
  0x1a   :  { %v1709_v13 = vld [vmem:[%s2178_s0 + $0xfc] ss:$20 sps:$4 sm:$0xff]  }
  0x1b   :  { %1382 = vmatpush3.bf16.msra.mxu0 %v1631_v15  ;;  %1614 = vmatpush3.bf16.msra.mxu1 %v1631_v15  ;;  %v1712_v15 = vld [vmem:[%s2178_s0 + $0xd8] ss:$20 sps:$4 sm:$0xff]  }
  0x1c   :  { %1383 = vmatprep.subr.bf16.mxu0 %v1632_v16  ;;  %1607 = vmatprep.subr.bf16.mxu1 %v1632_v16  ;;  %v1713_v16 = vld [vmem:[%s2178_s0 + $0x124] ss:$20 sps:$4 sm:$0xff]  }
  0x1f   :  { %1384 = vmatpush3.bf16.msra.mxu0 %v1633_v17  ;;  %1615 = vmatpush3.bf16.msra.mxu1 %v1633_v17  ;;  %v1715_v17 = vld [vmem:[%s2178_s0 + $0x120] ss:$20 sps:$4 sm:$0xff]  }
  0x20   :  { %1548 = vmatprep.subr.bf16.mxu0 %v1729_v24  ;;  %1451 = vmatprep.subr.bf16.mxu1 %v1641_v18  ;;  %v1716_v18 = vld [vmem:[%s2178_s0 + $0x100] ss:$20 sps:$4 sm:$0xff]  }
  0x22   :  { %707 = vmatmul.mubr.bf16.vlgmr.msra.gmra.mrb[0].mxu0 %v1634_v19  ;;  %755 = vmatmul.mubr.bf16.vlgmr.msra.gmra.mrb[0].mxu1 %v1637_v20  ;;  %v1717_v19 = vld [vmem:[%s2178_s0 + $0x14c] ss:$20 sps:$4 sm:$0xff]   ;;  %v1719_v20 = vld [vmem:[%s2178_s0 + $0x148] ss:$20 sps:$4 sm:$0xff]  }
  0x23   :  { %1549 = vmatpush3.bf16.msra.mxu0 %v1640_v21  ;;  %1452 = vmatpush3.bf16.msra.mxu1 %v1642_v22  ;;  %v1720_v21 = vld [vmem:[%s2178_s0 + $0x128] ss:$20 sps:$4 sm:$0xff]  }
  0x24   :  { %714 = vmatprep.mubr.bf16.mxu0 %v1643_v23  ;;  %762 = vmatprep.mubr.bf16.mxu1 %v1645_v25  ;;  %v1721_v22 = vld [vmem:[%s2178_s0 + $0x174] ss:$20 sps:$4 sm:$0xff]   ;;  %v76_v23 = vld [vmem:[%s2178_s0 + $0x198] sm:$0xff]  ;;  %v1723_v25 = vld [vmem:[%s2178_s0 + $0x170] ss:$20 sps:$4 sm:$0xff]  }
  0x25   :  { %1453 = vmatprep.subr.bf16.mxu1 %v1649_v26  ;;  %1550 = vmatprep.subr.bf16.mxu0 %v1729_v24  ;;  %v1724_v26 = vld [vmem:[%s2178_s0 + $0x150] ss:$20 sps:$4 sm:$0xff]  }
  0x27   :  { %1454 = vmatpush3.bf16.msra.mxu1 %v1650_v27  ;;  %1551 = vmatpush3.bf16.msra.mxu0 %v1652_v28  ;;  %v1219_v27 = vcombine.high %v76_v23, %v76_v23  ;;  %v1218_v28 = vcombine.low %v76_v23, %v76_v23 }
  0x28   :  { %1455 = vmatprep.subr.bf16.mxu1 %v1651_v30  ;;  %1552 = vmatprep.subr.bf16.mxu0 %v1729_v24  ;;  %v1728_v30 = vld [vmem:[%s2178_s0 + $0x1a0] ss:$0 sps:$4 sm:$0xff]  }
  0x2a   :  { %715 = vmatmul.mubr.bf16.gmra.mrb[4].mxu0 %v1647_v29  ;;  %763 = vmatmul.mubr.bf16.gmra.mrb[4].mxu1 %v1648_v31  ;;  %v1727_v29 = vld [vmem:[%s2178_s0 + $0x178] ss:$20 sps:$4 sm:$0xff]  }
  0x2b   :  { %1456 = vmatpush3.bf16.msra.mxu1 %v1653_v32  ;;  %722 = vmatprep.mubr.bf16.mxu0 %v1654_v33 }
  0x2c   :  { %770 = vmatprep.mubr.bf16.mxu1 %v1656_v34  ;;  %1457 = vmatprep.subr.bf16.mxu1 %v1660_v35 }
  0x2d   :  { %1553 = vmatpush3.bf16.msra.mxu0 %v1670_v36 }
  0x2e   :  { %1554 = vmatprep.subr.bf16.mxu0 %v1729_v24 }
  0x2f   :  { %1458 = vmatpush3.bf16.msra.mxu1 %v1661_v37 }
  0x30   :  { %1459 = vmatprep.subr.bf16.mxu1 %v1666_v40 }
  0x31   :  { %1555 = vmatpush3.bf16.msra.mxu0 %v1682_v44 }
  0x32   :  { %723 = vmatmul.mubr.bf16.gmra.mrb[8].mxu0 %v1658_v38  ;;  %771 = vmatmul.mubr.bf16.gmra.mrb[8].mxu1 %v1659_v39 }
  0x33   :  { %730 = vmatprep.mubr.bf16.mxu0 %v1662_v41  ;;  %778 = vmatprep.mubr.bf16.mxu1 %v1664_v42 }
  0x34   :  { %1460 = vmatpush3.bf16.msra.mxu1 %v1669_v43 }
  0x35   :  { %1461 = vmatprep.subr.bf16.mxu1 %v1671_v45 }
  0x38   :  { %1462 = vmatpush3.bf16.msra.mxu1 %v1672_v46 }
  0x39   :  { %1463 = vmatprep.subr.bf16.mxu1 %v1678_v48 }
  0x3a   :  { %731 = vmatmul.mubr.bf16.gmra.mrb[12].mxu0 %v1667_v49  ;;  %779 = vmatmul.mubr.bf16.gmra.mrb[12].mxu1 %v1668_v50 }
  0x3b   :  { %738 = vmatprep.mubr.bf16.mxu0 %v1673_v51  ;;  %786 = vmatprep.mubr.bf16.mxu1 %v1217_v52 }
  0x3c   :  { %1464 = vmatpush3.bf16.msra.mxu1 %v1679_v53 }
  0x3d   :  { %1465 = vmatprep.subr.bf16.mxu1 %v1680_v54 }
  0x40   :  { %1466 = vmatpush3.bf16.msra.mxu1 %v1681_v55 }
  0x42   :  { %739 = vmatmul.mubr.bf16.gmra.mrb[16].mxu0 %v1676_v56  ;;  %787 = vmatmul.mubr.bf16.gmra.mrb[16].mxu1 %v1216_v57 }
  0x43   :  { %746 = vmatprep.mubr.bf16.mxu0 %v1683_v58  ;;  %826 = vmatprep.mubr.bf16.mxu1 %v1687_v59 }
  0x4a   :  { %747 = vmatmul.mubr.bf16.gmra.mrb[20].mxu0 %v1688_v61  ;;  %827 = vmatmul.mubr.bf16.vlgmr.msra.gmra.mrb[20].mxu1 %v1685_v60 }
  0x4b   :  { %834 = vmatprep.mubr.bf16.mxu1 %v1689_v62  ;;  %1556 = vmatprep.mubr.msk.bf16.mxu0 %vm1730_vm0, %v1729_v24  ;;  %v2076_v62 = vld [vmem:[%s2179_s2] ss:$0 sm:$0xff] }
  0x52   :  { %835 = vmatmul.mubr.bf16.gmra.mrb[24].mxu1 %v1691_v63  ;;  %1557 = vmatmul.mubr.msk.bf16.vlgmr.msra.gmra.mrb[24].mxu0 %vm640_vm1, %v1692_v0 }
  0x53   :  { %842 = vmatprep.mubr.bf16.mxu1 %v1693_v1  ;;  %1560 = vmatprep.mubr.msk.bf16.mxu0 %vm1730_vm0, %v1729_v24 }
  0x5a   :  { %843 = vmatmul.mubr.bf16.gmra.mrb[28].mxu1 %v1695_v2  ;;  %1561 = vmatmul.mubr.msk.bf16.gmra.mrb[28].mxu0 %vm640_vm1, %v1696_v3 }
  0x5b   :  { %850 = vmatprep.mubr.bf16.mxu1 %v1697_v4  ;;  %1564 = vmatprep.mubr.msk.bf16.mxu0 %vm1730_vm0, %v1729_v24 }
  0x62   :  { %851 = vmatmul.mubr.bf16.gmra.mrb[32].mxu1 %v1699_v5  ;;  %1565 = vmatmul.mubr.msk.bf16.gmra.mrb[32].mxu0 %vm640_vm1, %v1700_v6 }
  0x63   :  { %858 = vmatprep.mubr.bf16.mxu1 %v1701_v7  ;;  %1568 = vmatprep.mubr.msk.bf16.mxu0 %vm1730_vm0, %v1729_v24 }
  0x6a   :  { %859 = vmatmul.mubr.bf16.gmra.mrb[36].mxu1 %v1703_v8  ;;  %1569 = vmatmul.mubr.msk.bf16.gmra.mrb[36].mxu0 %vm640_vm1, %v1704_v9 }
  0x6b   :  { %866 = vmatprep.mubr.bf16.mxu1 %v1705_v10  ;;  %1572 = vmatprep.mubr.msk.bf16.mxu0 %vm1730_vm0, %v1729_v24 }
  0x72   :  { %867 = vmatmul.mubr.bf16.gmra.mrb[40].mxu1 %v1707_v11  ;;  %1573 = vmatmul.mubr.msk.bf16.gmra.mrb[40].mxu0 %vm640_vm1, %v1708_v12 }
  0x73   :  { %874 = vmatprep.mubr.bf16.mxu1 %v1709_v13  ;;  %1576 = vmatprep.mubr.msk.bf16.mxu0 %vm1730_vm0, %v1729_v24 }
  0x7a   :  { %875 = vmatmul.mubr.bf16.gmra.mrb[44].mxu1 %v1711_v14  ;;  %1577 = vmatmul.mubr.msk.bf16.gmra.mrb[44].mxu0 %vm640_vm1, %v1712_v15 }
  0x7b   :  { %882 = vmatprep.mubr.bf16.mxu1 %v1713_v16  ;;  %1580 = vmatprep.mubr.msk.bf16.mxu0 %vm1730_vm0, %v1729_v24 }
  0x82   :  { %883 = vmatmul.mubr.bf16.gmra.mrb[48].mxu1 %v1715_v17  ;;  %1581 = vmatmul.mubr.msk.bf16.gmra.mrb[48].mxu0 %vm640_vm1, %v1716_v18 }
  0x83   :  { %890 = vmatprep.mubr.bf16.mxu1 %v1717_v19  ;;  %1584 = vmatprep.mubr.msk.bf16.mxu0 %vm1730_vm0, %v1729_v24 }
  0x8a   :  { %891 = vmatmul.mubr.bf16.gmra.mrb[52].mxu1 %v1719_v20  ;;  %1585 = vmatmul.mubr.msk.bf16.gmra.mrb[52].mxu0 %vm640_vm1, %v1720_v21 }
  0x8b   :  { %898 = vmatprep.mubr.bf16.mxu1 %v1721_v22  ;;  %1588 = vmatprep.mubr.msk.bf16.mxu0 %vm1730_vm0, %v1729_v24 }
  0x92   :  { %899 = vmatmul.mubr.bf16.gmra.mrb[56].mxu1 %v1723_v25  ;;  %1589 = vmatmul.mubr.msk.bf16.gmra.mrb[56].mxu0 %vm640_vm1, %v1724_v26 }
  0x93   :  { %906 = vmatprep.mubr.bf16.mxu1 %v1219_v27  ;;  %1592 = vmatprep.mubr.msk.bf16.mxu0 %vm1730_vm0, %v1729_v24 }
  0x9a   :  { %907 = vmatmul.mubr.bf16.gmra.mrb[60].mxu1 %v1218_v28  ;;  %1593 = vmatmul.mubr.msk.bf16.gmra.mrb[60].mxu0 %vm640_vm1, %v1727_v29 }
  0x9b   :  { %1596 = vmatprep.mubr.msk.bf16.mxu0 %vm1730_vm0, %v1729_v24 }
  0xa2   :  { %1597 = vmatmul.mubr.msk.bf16.gmra.mrb[64].mxu0 %vm640_vm1, %v1728_v30 }
  0xf5   :  { %v1385_v31 = vpop.f32.mrb[0].mxu0  ;;  %v1421_v32 = vpop.f32.mrb[0].mxu1 }
  0xf6   :  { %v1386_v33 = vpop.f32.mrb[1].mxu0  ;;  %v1422_v34 = vpop.f32.mrb[1].mxu1 }
  0xf7   :  { %v2055_v35 = vadd.f32 %v1386_v33, %v1385_v31  ;;  %v1388_v36 = vpop.f32.mrb[2].mxu0  ;;  %v2057_v37 = vadd.f32 %v1422_v34, %v1421_v32  ;;  %v1424_v38 = vpop.f32.mrb[2].mxu1 }
  0xf8   :  { %v1389_v39 = vpop.f32.mrb[3].mxu0  ;;  %v1425_v40 = vpop.f32.mrb[3].mxu1 }
  0xf9   :  { %v2059_v41 = vadd.f32 %v1389_v39, %v1388_v36  ;;  %v2061_v24 = vadd.f32 %v1425_v40, %v1424_v38  ;;  %v709_v38 = vadd.f32 %v2055_v35, %v2076_v62 }
  0xfd   :  { %v1391_v42 = vpop.f32.mrb[4].mxu0  ;;  %v1427_v43 = vpop.f32.mrb[4].mxu1 }
  0xfe   :  { %v1392_v44 = vpop.f32.mrb[5].mxu0  ;;  %v1428_v45 = vpop.f32.mrb[5].mxu1 }
  0xff   :  { %v2063_v46 = vadd.f32 %v1392_v44, %v1391_v42  ;;  %v1394_v47 = vpop.f32.mrb[6].mxu0  ;;  %v2065_v48 = vadd.f32 %v1428_v45, %v1427_v43  ;;  %v1430_v49 = vpop.f32.mrb[6].mxu1 }
 0x100   :  { %v1395_v50 = vpop.f32.mrb[7].mxu0  ;;  %v1431_v51 = vpop.f32.mrb[7].mxu1 }
 0x101   :  { %v2067_v52 = vadd.f32 %v1395_v50, %v1394_v47  ;;  %v2069_v53 = vadd.f32 %v1431_v51, %v1430_v49  ;;  %v712_v47 = vadd.f32 %v2059_v41, %v2076_v62 }
 0x103   :  { %v720_v41 = vadd.f32 %v2067_v52, %v2076_v62 }
 0x105   :  { %v1397_v54 = vpop.f32.mrb[8].mxu0  ;;  %v1433_v55 = vpop.f32.mrb[8].mxu1 }
 0x106   :  { %v1398_v56 = vpop.f32.mrb[9].mxu0  ;;  %v1434_v57 = vpop.f32.mrb[9].mxu1 }
 0x107   :  { %v2071_v58 = vadd.f32 %v1398_v56, %v1397_v54  ;;  %v1400_v59 = vpop.f32.mrb[10].mxu0  ;;  %v1435_v60 = vadd.f32 %v1434_v57, %v1433_v55  ;;  %v1436_v61 = vpop.f32.mrb[10].mxu1 }
 0x108   :  { %v1401_v63 = vpop.f32.mrb[11].mxu0  ;;  %v1437_v0 = vpop.f32.mrb[11].mxu1 }
 0x109   :  { %v2079_v1 = vadd.f32 %v1435_v60, %v2076_v62  ;;  %v2081_v2 = vadd.f32 %v1401_v63, %v1400_v59  ;;  %v1438_v3 = vadd.f32 %v1437_v0, %v1436_v61  ;;  %v717_v60 = vadd.f32 %v2063_v46, %v2076_v62 }
 0x10b   :  { %v2084_v4 = vadd.f32 %v1438_v3, %v2076_v62 }
 0x10d   :  { %v1403_v5 = vpop.f32.mrb[12].mxu0  ;;  %v1439_v6 = vpop.f32.mrb[12].mxu1 }
 0x10e   :  { %v1404_v7 = vpop.f32.mrb[13].mxu0  ;;  %v1440_v8 = vpop.f32.mrb[13].mxu1 }
 0x10f   :  { %v2086_v9 = vadd.f32 %v1404_v7, %v1403_v5  ;;  %v1406_v10 = vpop.f32.mrb[14].mxu0  ;;  %v1441_v11 = vadd.f32 %v1440_v8, %v1439_v6  ;;  %v1442_v12 = vpop.f32.mrb[14].mxu1 }
 0x110   :  { %v1407_v13 = vpop.f32.mrb[15].mxu0  ;;  %v1443_v14 = vpop.f32.mrb[15].mxu1 }
 0x111   :  { %v2089_v15 = vadd.f32 %v1441_v11, %v2076_v62  ;;  %v2091_v16 = vadd.f32 %v1407_v13, %v1406_v10  ;;  %v1444_v17 = vadd.f32 %v1443_v14, %v1442_v12 }
 0x113   :  { %v2094_v18 = vadd.f32 %v1444_v17, %v2076_v62 }
 0x115   :  { %v1409_v19 = vpop.f32.mrb[16].mxu0  ;;  %v1445_v20 = vpop.f32.mrb[16].mxu1 }
 0x116   :  { %v1410_v21 = vpop.f32.mrb[17].mxu0  ;;  %v1446_v22 = vpop.f32.mrb[17].mxu1 }
 0x117   :  { %v2096_v23 = vadd.f32 %v1410_v21, %v1409_v19  ;;  %v1412_v25 = vpop.f32.mrb[18].mxu0  ;;  %v1447_v26 = vadd.f32 %v1446_v22, %v1445_v20  ;;  %v1448_v27 = vpop.f32.mrb[18].mxu1  ;;  %v725_v21 = vadd.f32 %v2071_v58, %v2076_v62 }
 0x118   :  { %v1413_v28 = vpop.f32.mrb[19].mxu0  ;;  %v1449_v29 = vpop.f32.mrb[19].mxu1 }
 0x119   :  { %v2099_v30 = vadd.f32 %v1447_v26, %v2076_v62  ;;  %v2101_v31 = vadd.f32 %v1413_v28, %v1412_v25  ;;  %v728_v29 = vadd.f32 %v2081_v2, %v2076_v62 }
 0x11d   :  { %v1415_v32 = vpop.f32.mrb[20].mxu0  ;;  %v1467_v33 = vpop.f32.mrb[20].mxu1 }
 0x11e   :  { %v1416_v34 = vpop.f32.mrb[21].mxu0  ;;  %v1468_v36 = vpop.f32.mrb[21].mxu1 }
 0x11f   :  { %v2105_v39 = vadd.f32 %v1416_v34, %v1415_v32  ;;  %v1469_v40 = vadd.f32 %v1468_v36, %v1467_v33  ;;  %v1418_v42 = vpop.f32.mrb[22].mxu0  ;;  %v1470_v43 = vpop.f32.mrb[22].mxu1 }
 0x120   :  { %v1419_v44 = vpop.f32.mrb[23].mxu0  ;;  %v1471_v45 = vpop.f32.mrb[23].mxu1 }
 0x121   :  { %v2109_v49 = vadd.f32 %v1419_v44, %v1418_v42  ;;  %v1472_v50 = vadd.f32 %v1471_v45, %v1470_v43  ;;  %v829_v51 = vadd.f32 %v1469_v40, %v709_v38 }
 0x123   :  { %v832_v54 = vadd.f32 %v1472_v50, %v712_v47  ;;  %v733_v47 = vadd.f32 %v2086_v9, %v2076_v62 }
 0x125   :  { %v1473_v55 = vpop.f32.mrb[24].mxu1  ;;  %v948_v56 = vpop.f32.mrb[24].mxu0 }
 0x126   :  { %v949_v57 = vadd.f32 %v948_v56, %v829_v51  ;;  %v1474_v59 = vpop.f32.mrb[25].mxu1  ;;  %v1558_v35 = vpop.f32.mrb[25].mxu0 }
 0x127   :  { %v1475_v61 = vadd.f32 %v1474_v59, %v1473_v55  ;;  %v1476_v63 = vpop.f32.mrb[26].mxu1  ;;  %v951_v0 = vpop.f32.mrb[26].mxu0 }
 0x128   :  { %v952_v3 = vadd.f32 %v951_v0, %v832_v54  ;;  %v1477_v5 = vpop.f32.mrb[27].mxu1  ;;  %v1559_v6 = vpop.f32.mrb[27].mxu0  ;;  %v1034_v10 = vmax.f32 %v949_v57, 0.0  ;;  %v736_v57 = vadd.f32 %v2091_v16, %v2076_v62 }
 0x129   :  { %v1478_v7 = vadd.f32 %v1477_v5, %v1476_v63  ;;  %v837_v8 = vadd.f32 %v1475_v61, %v717_v60 }
 0x12a   :  { %v1035_v11 = vmax.f32 %v952_v3, 0.0 }
 0x12b   :  { %v840_v12 = vadd.f32 %v1478_v7, %v720_v41  ;;  %v741_v7 = vadd.f32 %v2096_v23, %v2076_v62 }
 0x12c   :  { %v1313_v13 = vpack.c.bf16 %v1035_v11, %v1034_v10 }
 0x12d   :  { %v1479_v14 = vpop.f32.mrb[28].mxu1  ;;  %v956_v17 = vpop.f32.mrb[28].mxu0 }
 0x12e   :  { %1314 = vst [vmem:[%s2180_s3] sm:$0xff] %v1313_v13   ;;  %v957_v46 = vadd.f32 %v956_v17, %v837_v8  ;;  %v1480_v19 = vpop.f32.mrb[29].mxu1  ;;  %v1562_v20 = vpop.f32.mrb[29].mxu0 }
 0x12f   :  { %v1481_v22 = vadd.f32 %v1480_v19, %v1479_v14  ;;  %v1482_v52 = vpop.f32.mrb[30].mxu1  ;;  %v959_v25 = vpop.f32.mrb[30].mxu0  ;;  %v744_v14 = vadd.f32 %v2101_v31, %v2076_v62 }
 0x130   :  { %v960_v26 = vadd.f32 %v959_v25, %v840_v12  ;;  %v1483_v27 = vpop.f32.mrb[31].mxu1  ;;  %v1563_v28 = vpop.f32.mrb[31].mxu0  ;;  %v1036_v34 = vmax.f32 %v957_v46, 0.0 }
 0x131   :  { %v1484_v32 = vadd.f32 %v1483_v27, %v1482_v52  ;;  %v845_v33 = vadd.f32 %v1481_v22, %v725_v21  ;;  %v749_v28 = vadd.f32 %v2105_v39, %v2076_v62 }
 0x132   :  { %v1037_v36 = vmax.f32 %v960_v26, 0.0 }
 0x133   :  { %v848_v38 = vadd.f32 %v1484_v32, %v728_v29 }
 0x134   :  { %v1318_v40 = vpack.c.bf16 %v1037_v36, %v1036_v34 }
 0x135   :  { %v1485_v42 = vpop.f32.mrb[32].mxu1  ;;  %v964_v43 = vpop.f32.mrb[32].mxu0 }
 0x136   :  { %1360 = vst [vmem:[%s2180_s3 + $0x8] sm:$0xff] %v1318_v40   ;;  %v965_v58 = vadd.f32 %v964_v43, %v845_v33  ;;  %v1486_v44 = vpop.f32.mrb[33].mxu1  ;;  %v1566_v45 = vpop.f32.mrb[33].mxu0 }
 0x137   :  { %v1487_v50 = vadd.f32 %v1486_v44, %v1485_v42  ;;  %v1488_v2 = vpop.f32.mrb[34].mxu1  ;;  %v967_v51 = vpop.f32.mrb[34].mxu0 }
 0x138   :  { %v968_v54 = vadd.f32 %v967_v51, %v848_v38  ;;  %v1489_v55 = vpop.f32.mrb[35].mxu1  ;;  %v1567_v56 = vpop.f32.mrb[35].mxu0  ;;  %v1038_v60 = vmax.f32 %v965_v58, 0.0  ;;  %v752_v38 = vadd.f32 %v2109_v49, %v2076_v62 }
 0x139   :  { %v1490_v59 = vadd.f32 %v1489_v55, %v1488_v2  ;;  %v853_v35 = vadd.f32 %v1487_v50, %v733_v47 }
 0x13a   :  { %v1039_v61 = vmax.f32 %v968_v54, 0.0  ;;  %v757_v54 = vadd.f32 %v2057_v37, %v2076_v62 }
 0x13b   :  { %v856_v63 = vadd.f32 %v1490_v59, %v736_v57 }
 0x13c   :  { %v1323_v0 = vpack.c.bf16 %v1039_v61, %v1038_v60  ;;  %v760_v60 = vadd.f32 %v2061_v24, %v2076_v62 }
 0x13d   :  { %v1491_v3 = vpop.f32.mrb[36].mxu1  ;;  %v972_v5 = vpop.f32.mrb[36].mxu0 }
 0x13e   :  { %1361 = vst [vmem:[%s2180_s3 + $0x10] sm:$0xff] %v1323_v0   ;;  %v973_v9 = vadd.f32 %v972_v5, %v853_v35  ;;  %v1492_v6 = vpop.f32.mrb[37].mxu1  ;;  %v1570_v41 = vpop.f32.mrb[37].mxu0 }
 0x13f   :  { %v1493_v8 = vadd.f32 %v1492_v6, %v1491_v3  ;;  %v1494_v16 = vpop.f32.mrb[38].mxu1  ;;  %v975_v10 = vpop.f32.mrb[38].mxu0 }
 0x140   :  { %v976_v11 = vadd.f32 %v975_v10, %v856_v63  ;;  %v1495_v12 = vpop.f32.mrb[39].mxu1  ;;  %v1571_v13 = vpop.f32.mrb[39].mxu0  ;;  %v1040_v19 = vmax.f32 %v973_v9, 0.0 }
 0x141   :  { %v1496_v17 = vadd.f32 %v1495_v12, %v1494_v16  ;;  %v861_v46 = vadd.f32 %v1493_v8, %v741_v7  ;;  %v765_v16 = vadd.f32 %v2065_v48, %v2076_v62 }
 0x142   :  { %v1041_v20 = vmax.f32 %v976_v11, 0.0 }
 0x143   :  { %v864_v21 = vadd.f32 %v1496_v17, %v744_v14  ;;  %v768_v17 = vadd.f32 %v2069_v53, %v2076_v62 }
 0x144   :  { %v1328_v22 = vpack.c.bf16 %v1041_v20, %v1040_v19 }
 0x145   :  { %v1497_v52 = vpop.f32.mrb[40].mxu1  ;;  %v980_v25 = vpop.f32.mrb[40].mxu0 }
 0x146   :  { %1362 = vst [vmem:[%s2180_s3 + $0x18] sm:$0xff] %v1328_v22   ;;  %v981_v23 = vadd.f32 %v980_v25, %v861_v46  ;;  %v1498_v26 = vpop.f32.mrb[41].mxu1  ;;  %v1574_v27 = vpop.f32.mrb[41].mxu0 }
 0x147   :  { %v1499_v29 = vadd.f32 %v1498_v26, %v1497_v52  ;;  %v1500_v31 = vpop.f32.mrb[42].mxu1  ;;  %v983_v32 = vpop.f32.mrb[42].mxu0 }
 0x148   :  { %v984_v33 = vadd.f32 %v983_v32, %v864_v21  ;;  %v1501_v34 = vpop.f32.mrb[43].mxu1  ;;  %v1575_v36 = vpop.f32.mrb[43].mxu0  ;;  %v1042_v43 = vmax.f32 %v981_v23, 0.0 }
 0x149   :  { %v1502_v40 = vadd.f32 %v1501_v34, %v1500_v31  ;;  %v869_v42 = vadd.f32 %v1499_v29, %v749_v28 }
 0x14a   :  { %v1043_v58 = vmax.f32 %v984_v33, 0.0 }
 0x14b   :  { %v872_v44 = vadd.f32 %v1502_v40, %v752_v38 }
 0x14c   :  { %v1333_v45 = vpack.c.bf16 %v1043_v58, %v1042_v43 }
 0x14d   :  { %v1503_v47 = vpop.f32.mrb[44].mxu1  ;;  %v988_v50 = vpop.f32.mrb[44].mxu0 }
 0x14e   :  { %1363 = vst [vmem:[%s2180_s3 + $0x20] sm:$0xff] %v1333_v45   ;;  %v989_v39 = vadd.f32 %v988_v50, %v869_v42  ;;  %v1504_v2 = vpop.f32.mrb[45].mxu1  ;;  %v1578_v51 = vpop.f32.mrb[45].mxu0 }
 0x14f   :  { %v1505_v55 = vadd.f32 %v1504_v2, %v1503_v47  ;;  %v1506_v49 = vpop.f32.mrb[46].mxu1  ;;  %v991_v56 = vpop.f32.mrb[46].mxu0 }
 0x150   :  { %v992_v57 = vadd.f32 %v991_v56, %v872_v44  ;;  %v1507_v59 = vpop.f32.mrb[47].mxu1  ;;  %v1579_v35 = vpop.f32.mrb[47].mxu0  ;;  %v1044_v0 = vmax.f32 %v989_v39, 0.0 }
 0x151   :  { %v1508_v61 = vadd.f32 %v1507_v59, %v1506_v49  ;;  %v877_v63 = vadd.f32 %v1505_v55, %v757_v54 }
 0x152   :  { %v1045_v3 = vmax.f32 %v992_v57, 0.0 }
 0x153   :  { %v880_v5 = vadd.f32 %v1508_v61, %v760_v60 }
 0x154   :  { %v1338_v9 = vpack.c.bf16 %v1045_v3, %v1044_v0 }
 0x155   :  { %v1509_v6 = vpop.f32.mrb[48].mxu1  ;;  %v996_v41 = vpop.f32.mrb[48].mxu0 }
 0x156   :  { %1364 = vst [vmem:[%s2180_s3 + $0x28] sm:$0xff] %v1338_v9   ;;  %v997_v37 = vadd.f32 %v996_v41, %v877_v63  ;;  %v1510_v7 = vpop.f32.mrb[49].mxu1  ;;  %v1582_v8 = vpop.f32.mrb[49].mxu0 }
 0x157   :  { %v1511_v10 = vadd.f32 %v1510_v7, %v1509_v6  ;;  %v1512_v24 = vpop.f32.mrb[50].mxu1  ;;  %v999_v11 = vpop.f32.mrb[50].mxu0 }
 0x158   :  { %v1000_v12 = vadd.f32 %v999_v11, %v880_v5  ;;  %v1513_v13 = vpop.f32.mrb[51].mxu1  ;;  %v1583_v14 = vpop.f32.mrb[51].mxu0  ;;  %v1046_v20 = vmax.f32 %v997_v37, 0.0 }
 0x159   :  { %v1514_v46 = vadd.f32 %v1513_v13, %v1512_v24  ;;  %v885_v19 = vadd.f32 %v1511_v10, %v765_v16 }
 0x15a   :  { %v1047_v21 = vmax.f32 %v1000_v12, 0.0 }
 0x15b   :  { %v888_v22 = vadd.f32 %v1514_v46, %v768_v17 }
 0x15c   :  { %v1343_v52 = vpack.c.bf16 %v1047_v21, %v1046_v20 }
 0x15d   :  { %v1515_v25 = vpop.f32.mrb[52].mxu1  ;;  %v1004_v23 = vpop.f32.mrb[52].mxu0 }
 0x15e   :  { %1365 = vst [vmem:[%s2180_s3 + $0x30] sm:$0xff] %v1343_v52   ;;  %v1005_v48 = vadd.f32 %v1004_v23, %v885_v19  ;;  %v1516_v26 = vpop.f32.mrb[53].mxu1  ;;  %v1586_v27 = vpop.f32.mrb[53].mxu0 }
 0x15f   :  { %v1517_v28 = vadd.f32 %v1516_v26, %v1515_v25  ;;  %v1518_v29 = vpop.f32.mrb[54].mxu1  ;;  %v1007_v31 = vpop.f32.mrb[54].mxu0 }
 0x160   :  { %v1008_v32 = vadd.f32 %v1007_v31, %v888_v22  ;;  %v1519_v53 = vpop.f32.mrb[55].mxu1  ;;  %v1587_v62 = vpop.f32.mrb[55].mxu0  ;;  %v1048_v36 = vmax.f32 %v1005_v48, 0.0 }
 0x161   :  { %v1520_v33 = vadd.f32 %v1519_v53, %v1518_v29  ;;  %v893_v34 = vadd.f32 %v1517_v28, %v2079_v1 }
 0x162   :  { %v1049_v38 = vmax.f32 %v1008_v32, 0.0 }
 0x163   :  { %v896_v40 = vadd.f32 %v1520_v33, %v2084_v4 }
 0x164   :  { %v1348_v42 = vpack.c.bf16 %v1049_v38, %v1048_v36 }
 0x165   :  { %v1521_v43 = vpop.f32.mrb[56].mxu1  ;;  %v1012_v58 = vpop.f32.mrb[56].mxu0 }
 0x166   :  { %1366 = vst [vmem:[%s2180_s3 + $0x38] sm:$0xff] %v1348_v42   ;;  %v1013_v44 = vadd.f32 %v1012_v58, %v893_v34  ;;  %v1522_v45 = vpop.f32.mrb[57].mxu1  ;;  %v1590_v47 = vpop.f32.mrb[57].mxu0 }
 0x167   :  { %v1523_v50 = vadd.f32 %v1522_v45, %v1521_v43  ;;  %v1524_v39 = vpop.f32.mrb[58].mxu1  ;;  %v1015_v2 = vpop.f32.mrb[58].mxu0 }
 0x168   :  { %v1016_v51 = vadd.f32 %v1015_v2, %v896_v40  ;;  %v1525_v54 = vpop.f32.mrb[59].mxu1  ;;  %v1591_v1 = vpop.f32.mrb[59].mxu0  ;;  %v1050_v4 = vmax.f32 %v1013_v44, 0.0 }
 0x169   :  { %v1526_v55 = vadd.f32 %v1525_v54, %v1524_v39  ;;  %v901_v49 = vadd.f32 %v1523_v50, %v2089_v15 }
 0x16a   :  { %v1051_v56 = vmax.f32 %v1016_v51, 0.0 }
 0x16b   :  { %v904_v57 = vadd.f32 %v1526_v55, %v2094_v18 }
 0x16c   :  { %v1353_v59 = vpack.c.bf16 %v1051_v56, %v1050_v4 }
 0x16d   :  { %v1527_v35 = vpop.f32.mrb[60].mxu1  ;;  %v1020_v60 = vpop.f32.mrb[60].mxu0 }
 0x16e   :  { %1367 = vst [vmem:[%s2180_s3 + $0x40] sm:$0xff] %v1353_v59   ;;  %v1021_v61 = vadd.f32 %v1020_v60, %v901_v49  ;;  %v1528_v63 = vpop.f32.mrb[61].mxu1  ;;  %v1594_v0 = vpop.f32.mrb[61].mxu0 }
 0x16f   :  { %v1529_v3 = vadd.f32 %v1528_v63, %v1527_v35  ;;  %v1023_v5 = vpop.f32.mrb[62].mxu0  ;;  %v1530_v9 = vpop.f32.mrb[62].mxu1 }
 0x170   :  { %v1024_v6 = vadd.f32 %v1023_v5, %v904_v57  ;;  %v1595_v41 = vpop.f32.mrb[63].mxu0  ;;  %v1531_v15 = vpop.f32.mrb[63].mxu1  ;;  %v1052_v7 = vmax.f32 %v1021_v61, 0.0 }
 0x171   :  { %v909_v37 = vadd.f32 %v1529_v3, %v2099_v30 }
 0x172   :  { %v1053_v18 = vmax.f32 %v1024_v6, 0.0 }
 0x174   :  { %v1358_v8 = vpack.c.bf16 %v1053_v18, %v1052_v7 }
 0x175   :  { %v1028_v16 = vpop.f32.mrb[64].mxu0 }
 0x176   :  { %1368 = vst [vmem:[%s2180_s3 + $0x48] sm:$0xff] %v1358_v8   ;;  %v1029_v10 = vadd.f32 %v1028_v16, %v909_v37  ;;  %v1598_v24 = vpop.f32.mrb[65].mxu0 }
 0x177   :  { %v1031_v11 = vpop.f32.mrb[66].mxu0 }
 0x178   :  { %v1054_v12 = vmax.f32 %v1029_v10, 0.0  ;;  %v1599_v13 = vpop.f32.mrb[67].mxu0 }
 0x17a   :  { %v1309_v14 = vpack.c.bf16 %v1054_v12, %v1054_v12 }
 0x17c   :  { %1160 = vst [vmem:[%s2180_s3 + $0x50] sm:$0xf] %v1309_v14 }

// kernel: state_encoder_forward.7
= control target key start
LH: loop header
LB: loop body
LE: loop exit
PB: predicated region body
PF: predicated region fallthrough
CT: control target
= control target key end

     0   :  { %vm9603_vm0 = vmmov 0   ;;  %vm25_vm1 = vcmask 261120   ;;  %s11764_s1 = inlined_call_operand.vmem [shape: bf16[10368,32], index: 1, kind: input, shape index: {}]   ;;  %s11765_s0 = inlined_call_operand.vmem [shape: bf16[8,10368], index: 0, kind: input, shape index: {}]   ;;  %s11766_s2 = inlined_call_operand.vmem [shape: f32[1,32], index: 2, kind: input, shape index: {}]   ;;  %s11767_s3 = inlined_call_operand.vmem [shape: f32[1,32], index: 3, kind: input, shape index: {}]   ;;  %s11768_s4 = inlined_call_operand.vmem [shape: f32[1,32], index: 4, kind: input, shape index: {}]   ;;  %s11769_s5 = inlined_call_operand.vmem [shape: f32[8,32], index: 5, kind: output, shape index: {}]  }
   0x1   :  { %v8871_v0 = vld [vmem:[%s11764_s1 + $0x40] sm:$0xff]   ;;  %v8875_v4 = vld [vmem:[%s11764_s1 + $0x48] sm:$0xff]   ;;  %v8879_v8 = vld [vmem:[%s11764_s1 + $0x50] sm:$0xff]  }
   0x2   :  { %v8872_v1 = vld [vmem:[%s11764_s1 + $0xc0] sm:$0xff]   ;;  %7960 = vmatprep.subr.bf16.mxu0 %v8871_v0  ;;  %v8876_v5 = vld [vmem:[%s11764_s1 + $0xc8] sm:$0xff]   ;;  %v8880_v9 = vld [vmem:[%s11764_s1 + $0xd0] sm:$0xff]  }
   0x3   :  { %v8873_v2 = vld [vmem:[%s11764_s1] sm:$0xff]   ;;  %7982 = vmatprep.subr.bf16.mxu1 %v8872_v1  ;;  %v8877_v6 = vld [vmem:[%s11764_s1 + $0x8] sm:$0xff]   ;;  %v8881_v10 = vld [vmem:[%s11764_s1 + $0x10] sm:$0xff]  }
   0x4   :  { %v8874_v3 = vld [vmem:[%s11764_s1 + $0x80] sm:$0xff]   ;;  %7961 = vmatpush3.bf16.msra.mxu0 %v8873_v2  ;;  %v8878_v7 = vld [vmem:[%s11764_s1 + $0x88] sm:$0xff]   ;;  %v8882_v11 = vld [vmem:[%s11764_s1 + $0x90] sm:$0xff]  }
   0x5   :  { %7983 = vmatpush3.bf16.msra.mxu1 %v8874_v3  ;;  %7962 = vmatprep.subr.bf16.mxu0 %v8875_v4  ;;  %v8883_v12 = vld [vmem:[%s11764_s1 + $0x58] sm:$0xff]   ;;  %v8887_v16 = vld [vmem:[%s11764_s1 + $0x60] sm:$0xff]   ;;  %v8891_v20 = vld [vmem:[%s11764_s1 + $0x68] sm:$0xff]  }
   0x6   :  { %7984 = vmatprep.subr.bf16.mxu1 %v8876_v5  ;;  %v8884_v13 = vld [vmem:[%s11764_s1 + $0xd8] sm:$0xff]   ;;  %v8888_v17 = vld [vmem:[%s11764_s1 + $0xe0] sm:$0xff]   ;;  %v8892_v21 = vld [vmem:[%s11764_s1 + $0xe8] sm:$0xff]  }
   0x7   :  { %v8885_v14 = vld [vmem:[%s11764_s1 + $0x18] sm:$0xff]   ;;  %v8889_v18 = vld [vmem:[%s11764_s1 + $0x20] sm:$0xff]   ;;  %v8893_v22 = vld [vmem:[%s11764_s1 + $0x28] sm:$0xff]  }
   0x8   :  { %7963 = vmatpush3.bf16.msra.mxu0 %v8877_v6  ;;  %v8886_v15 = vld [vmem:[%s11764_s1 + $0x98] sm:$0xff]   ;;  %v8890_v19 = vld [vmem:[%s11764_s1 + $0xa0] sm:$0xff]   ;;  %v8894_v23 = vld [vmem:[%s11764_s1 + $0xa8] sm:$0xff]  }
   0x9   :  { %7985 = vmatpush3.bf16.msra.mxu1 %v8878_v7  ;;  %7964 = vmatprep.subr.bf16.mxu0 %v8879_v8  ;;  %v8895_v24 = vld [vmem:[%s11764_s1 + $0x70] sm:$0xff]   ;;  %v8899_v28 = vld [vmem:[%s11764_s1 + $0x78] sm:$0xff]   ;;  %v28_v32 = vld [vmem:[%s11765_s0] sm:$0xff] }
   0xa   :  { %7986 = vmatprep.subr.bf16.mxu1 %v8880_v9  ;;  %v8896_v25 = vld [vmem:[%s11764_s1 + $0xf0] sm:$0xff]   ;;  %v8900_v29 = vld [vmem:[%s11764_s1 + $0xf8] sm:$0xff]   ;;  %v29_v33 = vld [vmem:[%s11765_s0 + $0x8] sm:$0xff]  ;;  %v7228_v34 = vcombine.low %v28_v32, %v28_v32  ;;  %v7229_v35 = vcombine.high %v28_v32, %v28_v32 }
   0xb   :  { %v8897_v26 = vld [vmem:[%s11764_s1 + $0x30] sm:$0xff]   ;;  %v8901_v30 = vld [vmem:[%s11764_s1 + $0x38] sm:$0xff]   ;;  %v7230_v36 = vcombine.low %v29_v33, %v29_v33  ;;  %v7231_v37 = vcombine.high %v29_v33, %v29_v33  ;;  %v8907_v38 = vld [vmem:[%s11764_s1 + $0x140] sm:$0xff]  }
   0xc   :  { %7965 = vmatpush3.bf16.msra.mxu0 %v8881_v10  ;;  %v8898_v27 = vld [vmem:[%s11764_s1 + $0xb0] sm:$0xff]   ;;  %v8902_v31 = vld [vmem:[%s11764_s1 + $0xb8] sm:$0xff]   ;;  %v8908_v39 = vld [vmem:[%s11764_s1 + $0x100] sm:$0xff]   ;;  %5569 = vmatprep.mubr.bf16.mxu0 %v7229_v35 }
   0xd   :  { %7987 = vmatpush3.bf16.msra.mxu1 %v8882_v11  ;;  %7966 = vmatprep.subr.bf16.mxu0 %v8883_v12  ;;  %v8909_v40 = vld [vmem:[%s11764_s1 + $0x1c0] sm:$0xff]   ;;  %v8911_v42 = vld [vmem:[%s11764_s1 + $0x148] sm:$0xff]   ;;  %v8915_v46 = vld [vmem:[%s11764_s1 + $0x150] sm:$0xff]  }
   0xe   :  { %7988 = vmatprep.subr.bf16.mxu1 %v8884_v13  ;;  %5609 = vmatprep.mubr.bf16.mxu1 %v7231_v37  ;;  %v8910_v41 = vld [vmem:[%s11764_s1 + $0x180] sm:$0xff]   ;;  %v8912_v43 = vld [vmem:[%s11764_s1 + $0x108] sm:$0xff]   ;;  %v8916_v47 = vld [vmem:[%s11764_s1 + $0x110] sm:$0xff]  }
   0xf   :  { %v8913_v44 = vld [vmem:[%s11764_s1 + $0x1c8] sm:$0xff]   ;;  %v8917_v48 = vld [vmem:[%s11764_s1 + $0x1d0] sm:$0xff]   ;;  %v8919_v50 = vld [vmem:[%s11764_s1 + $0x158] sm:$0xff]  }
  0x10   :  { %7967 = vmatpush3.bf16.msra.mxu0 %v8885_v14  ;;  %v8914_v45 = vld [vmem:[%s11764_s1 + $0x188] sm:$0xff]   ;;  %v8918_v49 = vld [vmem:[%s11764_s1 + $0x190] sm:$0xff]   ;;  %v8920_v51 = vld [vmem:[%s11764_s1 + $0x118] sm:$0xff]  }
  0x11   :  { %7989 = vmatpush3.bf16.msra.mxu1 %v8886_v15  ;;  %7968 = vmatprep.subr.bf16.mxu0 %v8887_v16  ;;  %v8921_v52 = vld [vmem:[%s11764_s1 + $0x1d8] sm:$0xff]   ;;  %v8923_v54 = vld [vmem:[%s11764_s1 + $0x160] sm:$0xff]   ;;  %v8927_v58 = vld [vmem:[%s11764_s1 + $0x168] sm:$0xff]  }
  0x12   :  { %7990 = vmatprep.subr.bf16.mxu1 %v8888_v17  ;;  %v8922_v53 = vld [vmem:[%s11764_s1 + $0x198] sm:$0xff]   ;;  %v8924_v55 = vld [vmem:[%s11764_s1 + $0x120] sm:$0xff]   ;;  %v8928_v59 = vld [vmem:[%s11764_s1 + $0x128] sm:$0xff]  }
  0x13   :  { %v8925_v56 = vld [vmem:[%s11764_s1 + $0x1e0] sm:$0xff]   ;;  %v8929_v60 = vld [vmem:[%s11764_s1 + $0x1e8] sm:$0xff]   ;;  %v8931_v62 = vld [vmem:[%s11764_s1 + $0x170] sm:$0xff]  }
  0x14   :  { %7969 = vmatpush3.bf16.msra.mxu0 %v8889_v18  ;;  %v8926_v57 = vld [vmem:[%s11764_s1 + $0x1a0] sm:$0xff]   ;;  %v8930_v61 = vld [vmem:[%s11764_s1 + $0x1a8] sm:$0xff]   ;;  %v8932_v63 = vld [vmem:[%s11764_s1 + $0x130] sm:$0xff]  }
  0x15   :  { %7991 = vmatpush3.bf16.msra.mxu1 %v8890_v19  ;;  %7970 = vmatprep.subr.bf16.mxu0 %v8891_v20  ;;  %v8933_v0 = vld [vmem:[%s11764_s1 + $0x1f0] sm:$0xff]   ;;  %v8935_v2 = vld [vmem:[%s11764_s1 + $0x178] sm:$0xff]   ;;  %v8941_v9 = vld [vmem:[%s11764_s1 + $0x240] sm:$0xff]  }
  0x16   :  { %7992 = vmatprep.subr.bf16.mxu1 %v8892_v21  ;;  %v8934_v1 = vld [vmem:[%s11764_s1 + $0x1b0] sm:$0xff]   ;;  %v8936_v3 = vld [vmem:[%s11764_s1 + $0x138] sm:$0xff]   ;;  %v8944_v13 = vld [vmem:[%s11764_s1 + $0x200] sm:$0xff]  }
  0x17   :  { %v8937_v4 = vld [vmem:[%s11764_s1 + $0x1f8] sm:$0xff]   ;;  %v30_v5 = vld [vmem:[%s11765_s0 + $0x10] sm:$0xff]  ;;  %v8945_v14 = vld [vmem:[%s11764_s1 + $0x2c0] sm:$0xff]  }
  0x18   :  { %7971 = vmatpush3.bf16.msra.mxu0 %v8893_v22  ;;  %v7233_v6 = vcombine.high %v30_v5, %v30_v5  ;;  %v8940_v7 = vld [vmem:[%s11764_s1 + $0x1b8] sm:$0xff]   ;;  %v7232_v8 = vcombine.low %v30_v5, %v30_v5  ;;  %v8946_v15 = vld [vmem:[%s11764_s1 + $0x280] sm:$0xff]   ;;  %v8947_v16 = vld [vmem:[%s11764_s1 + $0x248] sm:$0xff]  }
  0x19   :  { %7993 = vmatpush3.bf16.msra.mxu1 %v8894_v23  ;;  %7972 = vmatprep.subr.bf16.mxu0 %v8895_v24  ;;  %v31_v10 = vld [vmem:[%s11765_s0 + $0x18] sm:$0xff]  ;;  %v8948_v17 = vld [vmem:[%s11764_s1 + $0x208] sm:$0xff]   ;;  %v8951_v20 = vld [vmem:[%s11764_s1 + $0x250] sm:$0xff]  }
  0x1a   :  { %7994 = vmatprep.subr.bf16.mxu1 %v8896_v25  ;;  %v7234_v11 = vcombine.low %v31_v10, %v31_v10  ;;  %v7235_v12 = vcombine.high %v31_v10, %v31_v10  ;;  %v8949_v18 = vld [vmem:[%s11764_s1 + $0x2c8] sm:$0xff]   ;;  %v8952_v21 = vld [vmem:[%s11764_s1 + $0x210] sm:$0xff]   ;;  %v8955_v24 = vld [vmem:[%s11764_s1 + $0x258] sm:$0xff]  }
  0x1b   :  { %v8950_v19 = vld [vmem:[%s11764_s1 + $0x288] sm:$0xff]   ;;  %v8953_v22 = vld [vmem:[%s11764_s1 + $0x2d0] sm:$0xff]   ;;  %v8956_v25 = vld [vmem:[%s11764_s1 + $0x218] sm:$0xff]  }
  0x1c   :  { %7973 = vmatpush3.bf16.msra.mxu0 %v8897_v26  ;;  %v8954_v23 = vld [vmem:[%s11764_s1 + $0x290] sm:$0xff]   ;;  %v8957_v26 = vld [vmem:[%s11764_s1 + $0x2d8] sm:$0xff]   ;;  %v8963_v32 = vld [vmem:[%s11764_s1 + $0x268] sm:$0xff]  }
  0x1d   :  { %7995 = vmatpush3.bf16.msra.mxu1 %v8898_v27  ;;  %7974 = vmatprep.subr.bf16.mxu0 %v8899_v28  ;;  %v8958_v27 = vld [vmem:[%s11764_s1 + $0x298] sm:$0xff]   ;;  %v8959_v28 = vld [vmem:[%s11764_s1 + $0x260] sm:$0xff]   ;;  %v8964_v33 = vld [vmem:[%s11764_s1 + $0x228] sm:$0xff]  }
  0x1e   :  { %7996 = vmatprep.subr.bf16.mxu1 %v8900_v29  ;;  %v8960_v29 = vld [vmem:[%s11764_s1 + $0x220] sm:$0xff]   ;;  %v8966_v35 = vld [vmem:[%s11764_s1 + $0x2a8] sm:$0xff]   ;;  %v8968_v37 = vld [vmem:[%s11764_s1 + $0x230] sm:$0xff]  }
  0x1f   :  { %v8998_v5 = vld [vmem:[%s11764_s1 + $0x3a0] sm:$0xff]   ;;  %v9003_v10 = vld [vmem:[%s11764_s1 + $0x370] sm:$0xff]  }
  0x20   :  { %7975 = vmatpush3.bf16.msra.mxu0 %v8901_v30  ;;  %v8961_v30 = vld [vmem:[%s11764_s1 + $0x2e0] sm:$0xff]  }
  0x21   :  { %7997 = vmatpush3.bf16.msra.mxu1 %v8902_v31  ;;  %8004 = vmatprep.subr.bf16.mxu0 %v8907_v38  ;;  %v8962_v31 = vld [vmem:[%s11764_s1 + $0x2a0] sm:$0xff]   ;;  %v8969_v38 = vld [vmem:[%s11764_s1 + $0x2f0] sm:$0xff]  }
  0x22   :  { %8026 = vmatprep.subr.bf16.mxu1 %v8909_v40  ;;  %v8971_v40 = vld [vmem:[%s11764_s1 + $0x278] sm:$0xff]  }
  0x23   :  { %5570 = vmatmul.mubr.bf16.vlgmr.msra.gmra.mrb[0].mxu0 %v7228_v34  ;;  %v8965_v34 = vld [vmem:[%s11764_s1 + $0x2e8] sm:$0xff]  }
  0x24   :  { %5610 = vmatmul.mubr.bf16.vlgmr.msra.gmra.mrb[0].mxu1 %v7230_v36  ;;  %8005 = vmatpush3.bf16.msra.mxu0 %v8908_v39  ;;  %v8967_v36 = vld [vmem:[%s11764_s1 + $0x270] sm:$0xff]  }
  0x25   :  { %8027 = vmatpush3.bf16.msra.mxu1 %v8910_v41  ;;  %8006 = vmatprep.subr.bf16.mxu0 %v8911_v42  ;;  %v8970_v39 = vld [vmem:[%s11764_s1 + $0x2b0] sm:$0xff]   ;;  %v8972_v41 = vld [vmem:[%s11764_s1 + $0x238] sm:$0xff]  }
  0x26   :  { %8028 = vmatprep.subr.bf16.mxu1 %v8913_v44  ;;  %5649 = vmatprep.mubr.bf16.mxu0 %v7233_v6  ;;  %v8973_v42 = vld [vmem:[%s11764_s1 + $0x2f8] sm:$0xff]   ;;  %v8999_v6 = vld [vmem:[%s11764_s1 + $0x368] sm:$0xff]  }
  0x27   :  { %5689 = vmatprep.mubr.bf16.mxu1 %v7235_v12  ;;  %v9005_v12 = vld [vmem:[%s11764_s1 + $0x3f0] sm:$0xff]  }
  0x28   :  { %8007 = vmatpush3.bf16.msra.mxu0 %v8912_v43  ;;  %v32_v43 = vld [vmem:[%s11765_s0 + $0x20] sm:$0xff] }
  0x29   :  { %8029 = vmatpush3.bf16.msra.mxu1 %v8914_v45  ;;  %8008 = vmatprep.subr.bf16.mxu0 %v8915_v46  ;;  %v7236_v44 = vcombine.low %v32_v43, %v32_v43  ;;  %v7237_v45 = vcombine.high %v32_v43, %v32_v43  ;;  %v8976_v46 = vld [vmem:[%s11764_s1 + $0x2b8] sm:$0xff]   ;;  %v9034_v43 = vld [vmem:[%s11764_s1 + $0x4a0] sm:$0xff]  }
  0x2a   :  { %8030 = vmatprep.subr.bf16.mxu1 %v8917_v48  ;;  %v33_v48 = vld [vmem:[%s11765_s0 + $0x28] sm:$0xff] }
  0x2c   :  { %8009 = vmatpush3.bf16.msra.mxu0 %v8916_v47  ;;  %v8977_v47 = vld [vmem:[%s11764_s1 + $0x340] sm:$0xff]  }
  0x2d   :  { %8031 = vmatpush3.bf16.msra.mxu1 %v8918_v49  ;;  %8010 = vmatprep.subr.bf16.mxu0 %v8919_v50  ;;  %v7238_v49 = vcombine.low %v33_v48, %v33_v48  ;;  %v7239_v50 = vcombine.high %v33_v48, %v33_v48  ;;  %v9039_v48 = vld [vmem:[%s11764_s1 + $0x470] sm:$0xff]  }
  0x2e   :  { %8032 = vmatprep.subr.bf16.mxu1 %v8921_v52  ;;  %v8981_v52 = vld [vmem:[%s11764_s1 + $0x3c0] sm:$0xff]  }
  0x30   :  { %8011 = vmatpush3.bf16.msra.mxu0 %v8920_v51  ;;  %v8980_v51 = vld [vmem:[%s11764_s1 + $0x300] sm:$0xff]  }
  0x31   :  { %8033 = vmatpush3.bf16.msra.mxu1 %v8922_v53  ;;  %8012 = vmatprep.subr.bf16.mxu0 %v8923_v54  ;;  %v8982_v53 = vld [vmem:[%s11764_s1 + $0x380] sm:$0xff]   ;;  %v8983_v54 = vld [vmem:[%s11764_s1 + $0x348] sm:$0xff]  }
  0x32   :  { %8034 = vmatprep.subr.bf16.mxu1 %v8925_v56  ;;  %v8985_v56 = vld [vmem:[%s11764_s1 + $0x3c8] sm:$0xff]  }
  0x34   :  { %8013 = vmatpush3.bf16.msra.mxu0 %v8924_v55  ;;  %v8984_v55 = vld [vmem:[%s11764_s1 + $0x308] sm:$0xff]  }
  0x35   :  { %8035 = vmatpush3.bf16.msra.mxu1 %v8926_v57  ;;  %8014 = vmatprep.subr.bf16.mxu0 %v8927_v58  ;;  %v8986_v57 = vld [vmem:[%s11764_s1 + $0x388] sm:$0xff]   ;;  %v8987_v58 = vld [vmem:[%s11764_s1 + $0x350] sm:$0xff]  }
  0x36   :  { %8036 = vmatprep.subr.bf16.mxu1 %v8929_v60  ;;  %v8989_v60 = vld [vmem:[%s11764_s1 + $0x3d0] sm:$0xff]  }
  0x38   :  { %8015 = vmatpush3.bf16.msra.mxu0 %v8928_v59  ;;  %v8988_v59 = vld [vmem:[%s11764_s1 + $0x310] sm:$0xff]  }
  0x39   :  { %8037 = vmatpush3.bf16.msra.mxu1 %v8930_v61  ;;  %8016 = vmatprep.subr.bf16.mxu0 %v8931_v62  ;;  %v8990_v61 = vld [vmem:[%s11764_s1 + $0x390] sm:$0xff]   ;;  %v8991_v62 = vld [vmem:[%s11764_s1 + $0x358] sm:$0xff]  }
  0x3a   :  { %8038 = vmatprep.subr.bf16.mxu1 %v8933_v0  ;;  %v8993_v0 = vld [vmem:[%s11764_s1 + $0x3d8] sm:$0xff]  }
  0x3c   :  { %8017 = vmatpush3.bf16.msra.mxu0 %v8932_v63  ;;  %v8992_v63 = vld [vmem:[%s11764_s1 + $0x318] sm:$0xff]  }
  0x3d   :  { %8039 = vmatpush3.bf16.msra.mxu1 %v8934_v1  ;;  %8018 = vmatprep.subr.bf16.mxu0 %v8935_v2  ;;  %v8994_v1 = vld [vmem:[%s11764_s1 + $0x398] sm:$0xff]   ;;  %v8995_v2 = vld [vmem:[%s11764_s1 + $0x360] sm:$0xff]  }
  0x3e   :  { %8040 = vmatprep.subr.bf16.mxu1 %v8937_v4  ;;  %v8997_v4 = vld [vmem:[%s11764_s1 + $0x3e0] sm:$0xff]  }
  0x40   :  { %8019 = vmatpush3.bf16.msra.mxu0 %v8936_v3  ;;  %v8996_v3 = vld [vmem:[%s11764_s1 + $0x320] sm:$0xff]  }
  0x41   :  { %8041 = vmatpush3.bf16.msra.mxu1 %v8940_v7  ;;  %8048 = vmatprep.subr.bf16.mxu0 %v8941_v9  ;;  %v9000_v7 = vld [vmem:[%s11764_s1 + $0x328] sm:$0xff]  }
  0x42   :  { %8070 = vmatprep.subr.bf16.mxu1 %v8945_v14  ;;  %v9002_v9 = vld [vmem:[%s11764_s1 + $0x3a8] sm:$0xff]   ;;  %v9007_v14 = vld [vmem:[%s11764_s1 + $0x378] sm:$0xff]  }
  0x43   :  { %5650 = vmatmul.mubr.bf16.vlgmr.msra.gmra.mrb[4].mxu0 %v7232_v8  ;;  %v9001_v8 = vld [vmem:[%s11764_s1 + $0x3e8] sm:$0xff]  }
  0x44   :  { %8049 = vmatpush3.bf16.msra.mxu0 %v8944_v13  ;;  %5690 = vmatmul.mubr.bf16.vlgmr.msra.gmra.mrb[4].mxu1 %v7234_v11  ;;  %v9004_v11 = vld [vmem:[%s11764_s1 + $0x330] sm:$0xff]  }
  0x45   :  { %8071 = vmatpush3.bf16.msra.mxu1 %v8946_v15  ;;  %8050 = vmatprep.subr.bf16.mxu0 %v8947_v16  ;;  %v9006_v13 = vld [vmem:[%s11764_s1 + $0x3b0] sm:$0xff]   ;;  %v9008_v15 = vld [vmem:[%s11764_s1 + $0x338] sm:$0xff]  }
  0x46   :  { %8072 = vmatprep.subr.bf16.mxu1 %v8949_v18  ;;  %5729 = vmatprep.mubr.bf16.mxu0 %v7237_v45  ;;  %v9009_v16 = vld [vmem:[%s11764_s1 + $0x3f8] sm:$0xff]   ;;  %v9036_v45 = vld [vmem:[%s11764_s1 + $0x428] sm:$0xff]  }
  0x47   :  { %5769 = vmatprep.mubr.bf16.mxu1 %v7239_v50  ;;  %v9041_v50 = vld [vmem:[%s11764_s1 + $0x4f0] sm:$0xff]  }
  0x48   :  { %8051 = vmatpush3.bf16.msra.mxu0 %v8948_v17  ;;  %v34_v17 = vld [vmem:[%s11765_s0 + $0x30] sm:$0xff] }
  0x49   :  { %8073 = vmatpush3.bf16.msra.mxu1 %v8950_v19  ;;  %8052 = vmatprep.subr.bf16.mxu0 %v8951_v20  ;;  %v7240_v18 = vcombine.low %v34_v17, %v34_v17  ;;  %v7241_v19 = vcombine.high %v34_v17, %v34_v17  ;;  %v9012_v20 = vld [vmem:[%s11764_s1 + $0x3b8] sm:$0xff]   ;;  %v9070_v17 = vld [vmem:[%s11764_s1 + $0x5a0] sm:$0xff]  }
  0x4a   :  { %8074 = vmatprep.subr.bf16.mxu1 %v8953_v22  ;;  %v35_v22 = vld [vmem:[%s11765_s0 + $0x38] sm:$0xff] }
  0x4c   :  { %8053 = vmatpush3.bf16.msra.mxu0 %v8952_v21  ;;  %v9013_v21 = vld [vmem:[%s11764_s1 + $0x440] sm:$0xff]  }
  0x4d   :  { %8075 = vmatpush3.bf16.msra.mxu1 %v8954_v23  ;;  %8054 = vmatprep.subr.bf16.mxu0 %v8955_v24  ;;  %v7242_v23 = vcombine.low %v35_v22, %v35_v22  ;;  %v7243_v24 = vcombine.high %v35_v22, %v35_v22  ;;  %v9075_v22 = vld [vmem:[%s11764_s1 + $0x570] sm:$0xff]  }
  0x4e   :  { %8076 = vmatprep.subr.bf16.mxu1 %v8957_v26  ;;  %v9017_v26 = vld [vmem:[%s11764_s1 + $0x4c0] sm:$0xff]  }
  0x50   :  { %8055 = vmatpush3.bf16.msra.mxu0 %v8956_v25  ;;  %v9016_v25 = vld [vmem:[%s11764_s1 + $0x400] sm:$0xff]  }
  0x51   :  { %8077 = vmatpush3.bf16.msra.mxu1 %v8958_v27  ;;  %8056 = vmatprep.subr.bf16.mxu0 %v8959_v28  ;;  %v9018_v27 = vld [vmem:[%s11764_s1 + $0x480] sm:$0xff]   ;;  %v9019_v28 = vld [vmem:[%s11764_s1 + $0x448] sm:$0xff]  }
  0x52   :  { %8078 = vmatprep.subr.bf16.mxu1 %v8961_v30  ;;  %v9021_v30 = vld [vmem:[%s11764_s1 + $0x4c8] sm:$0xff]  }
  0x54   :  { %8057 = vmatpush3.bf16.msra.mxu0 %v8960_v29  ;;  %v9020_v29 = vld [vmem:[%s11764_s1 + $0x408] sm:$0xff]  }
  0x55   :  { %8079 = vmatpush3.bf16.msra.mxu1 %v8962_v31  ;;  %8058 = vmatprep.subr.bf16.mxu0 %v8963_v32  ;;  %v9022_v31 = vld [vmem:[%s11764_s1 + $0x488] sm:$0xff]   ;;  %v9023_v32 = vld [vmem:[%s11764_s1 + $0x450] sm:$0xff]  }
  0x56   :  { %8080 = vmatprep.subr.bf16.mxu1 %v8965_v34  ;;  %v9025_v34 = vld [vmem:[%s11764_s1 + $0x4d0] sm:$0xff]  }
  0x58   :  { %8059 = vmatpush3.bf16.msra.mxu0 %v8964_v33  ;;  %v9024_v33 = vld [vmem:[%s11764_s1 + $0x410] sm:$0xff]  }
  0x59   :  { %8081 = vmatpush3.bf16.msra.mxu1 %v8966_v35  ;;  %8060 = vmatprep.subr.bf16.mxu0 %v8967_v36  ;;  %v9026_v35 = vld [vmem:[%s11764_s1 + $0x490] sm:$0xff]   ;;  %v9027_v36 = vld [vmem:[%s11764_s1 + $0x458] sm:$0xff]  }
  0x5a   :  { %8082 = vmatprep.subr.bf16.mxu1 %v8969_v38  ;;  %v9029_v38 = vld [vmem:[%s11764_s1 + $0x4d8] sm:$0xff]  }
  0x5c   :  { %8061 = vmatpush3.bf16.msra.mxu0 %v8968_v37  ;;  %v9028_v37 = vld [vmem:[%s11764_s1 + $0x418] sm:$0xff]  }
  0x5d   :  { %8083 = vmatpush3.bf16.msra.mxu1 %v8970_v39  ;;  %8062 = vmatprep.subr.bf16.mxu0 %v8971_v40  ;;  %v9030_v39 = vld [vmem:[%s11764_s1 + $0x498] sm:$0xff]   ;;  %v9031_v40 = vld [vmem:[%s11764_s1 + $0x460] sm:$0xff]  }
  0x5e   :  { %8084 = vmatprep.subr.bf16.mxu1 %v8973_v42  ;;  %v9033_v42 = vld [vmem:[%s11764_s1 + $0x4e0] sm:$0xff]  }
  0x60   :  { %8063 = vmatpush3.bf16.msra.mxu0 %v8972_v41  ;;  %v9032_v41 = vld [vmem:[%s11764_s1 + $0x420] sm:$0xff]  }
  0x61   :  { %8085 = vmatpush3.bf16.msra.mxu1 %v8976_v46  ;;  %8092 = vmatprep.subr.bf16.mxu0 %v8977_v47  ;;  %v9037_v46 = vld [vmem:[%s11764_s1 + $0x4e8] sm:$0xff]  }
  0x62   :  { %8114 = vmatprep.subr.bf16.mxu1 %v8981_v52  ;;  %v9038_v47 = vld [vmem:[%s11764_s1 + $0x4a8] sm:$0xff]   ;;  %v9043_v52 = vld [vmem:[%s11764_s1 + $0x478] sm:$0xff]  }
  0x63   :  { %5730 = vmatmul.mubr.bf16.vlgmr.msra.gmra.mrb[8].mxu0 %v7236_v44  ;;  %v9035_v44 = vld [vmem:[%s11764_s1 + $0x468] sm:$0xff]  }
  0x64   :  { %8093 = vmatpush3.bf16.msra.mxu0 %v8980_v51  ;;  %5770 = vmatmul.mubr.bf16.vlgmr.msra.gmra.mrb[8].mxu1 %v7238_v49  ;;  %v9040_v49 = vld [vmem:[%s11764_s1 + $0x430] sm:$0xff]  }
  0x65   :  { %8115 = vmatpush3.bf16.msra.mxu1 %v8982_v53  ;;  %8094 = vmatprep.subr.bf16.mxu0 %v8983_v54  ;;  %v9042_v51 = vld [vmem:[%s11764_s1 + $0x4b0] sm:$0xff]   ;;  %v9044_v53 = vld [vmem:[%s11764_s1 + $0x438] sm:$0xff]  }
  0x66   :  { %8116 = vmatprep.subr.bf16.mxu1 %v8985_v56  ;;  %5809 = vmatprep.mubr.bf16.mxu0 %v7241_v19  ;;  %v9045_v54 = vld [vmem:[%s11764_s1 + $0x4f8] sm:$0xff]   ;;  %v9072_v19 = vld [vmem:[%s11764_s1 + $0x528] sm:$0xff]  }
  0x67   :  { %5849 = vmatprep.mubr.bf16.mxu1 %v7243_v24  ;;  %v9077_v24 = vld [vmem:[%s11764_s1 + $0x5f0] sm:$0xff]  }
  0x68   :  { %8095 = vmatpush3.bf16.msra.mxu0 %v8984_v55  ;;  %v36_v55 = vld [vmem:[%s11765_s0 + $0x40] sm:$0xff] }
  0x69   :  { %8117 = vmatpush3.bf16.msra.mxu1 %v8986_v57  ;;  %8096 = vmatprep.subr.bf16.mxu0 %v8987_v58  ;;  %v7244_v56 = vcombine.low %v36_v55, %v36_v55  ;;  %v7245_v57 = vcombine.high %v36_v55, %v36_v55  ;;  %v9048_v58 = vld [vmem:[%s11764_s1 + $0x4b8] sm:$0xff]   ;;  %v9106_v55 = vld [vmem:[%s11764_s1 + $0x6a0] sm:$0xff]  }
  0x6a   :  { %8118 = vmatprep.subr.bf16.mxu1 %v8989_v60  ;;  %v37_v60 = vld [vmem:[%s11765_s0 + $0x48] sm:$0xff] }
  0x6c   :  { %8097 = vmatpush3.bf16.msra.mxu0 %v8988_v59  ;;  %v9049_v59 = vld [vmem:[%s11764_s1 + $0x540] sm:$0xff]  }
  0x6d   :  { %8119 = vmatpush3.bf16.msra.mxu1 %v8990_v61  ;;  %8098 = vmatprep.subr.bf16.mxu0 %v8991_v62  ;;  %v7246_v61 = vcombine.low %v37_v60, %v37_v60  ;;  %v7247_v62 = vcombine.high %v37_v60, %v37_v60  ;;  %v9111_v60 = vld [vmem:[%s11764_s1 + $0x670] sm:$0xff]  }
  0x6e   :  { %8120 = vmatprep.subr.bf16.mxu1 %v8993_v0  ;;  %v9053_v0 = vld [vmem:[%s11764_s1 + $0x5c0] sm:$0xff]  }
  0x70   :  { %8099 = vmatpush3.bf16.msra.mxu0 %v8992_v63  ;;  %v9052_v63 = vld [vmem:[%s11764_s1 + $0x500] sm:$0xff]  }
  0x71   :  { %8121 = vmatpush3.bf16.msra.mxu1 %v8994_v1  ;;  %8100 = vmatprep.subr.bf16.mxu0 %v8995_v2  ;;  %v9054_v1 = vld [vmem:[%s11764_s1 + $0x580] sm:$0xff]   ;;  %v9055_v2 = vld [vmem:[%s11764_s1 + $0x548] sm:$0xff]  }
  0x72   :  { %8122 = vmatprep.subr.bf16.mxu1 %v8997_v4  ;;  %v9057_v4 = vld [vmem:[%s11764_s1 + $0x5c8] sm:$0xff]  }
  0x74   :  { %8101 = vmatpush3.bf16.msra.mxu0 %v8996_v3  ;;  %v9056_v3 = vld [vmem:[%s11764_s1 + $0x508] sm:$0xff]  }
  0x75   :  { %8123 = vmatpush3.bf16.msra.mxu1 %v8998_v5  ;;  %8102 = vmatprep.subr.bf16.mxu0 %v8999_v6  ;;  %v9058_v5 = vld [vmem:[%s11764_s1 + $0x588] sm:$0xff]   ;;  %v9059_v6 = vld [vmem:[%s11764_s1 + $0x550] sm:$0xff]  }
  0x76   :  { %8124 = vmatprep.subr.bf16.mxu1 %v9001_v8  ;;  %v9061_v8 = vld [vmem:[%s11764_s1 + $0x5d0] sm:$0xff]  }
  0x78   :  { %8103 = vmatpush3.bf16.msra.mxu0 %v9000_v7  ;;  %v9060_v7 = vld [vmem:[%s11764_s1 + $0x510] sm:$0xff]  }
  0x79   :  { %8125 = vmatpush3.bf16.msra.mxu1 %v9002_v9  ;;  %8104 = vmatprep.subr.bf16.mxu0 %v9003_v10  ;;  %v9062_v9 = vld [vmem:[%s11764_s1 + $0x590] sm:$0xff]   ;;  %v9063_v10 = vld [vmem:[%s11764_s1 + $0x558] sm:$0xff]  }
  0x7a   :  { %8126 = vmatprep.subr.bf16.mxu1 %v9005_v12  ;;  %v9065_v12 = vld [vmem:[%s11764_s1 + $0x5d8] sm:$0xff]  }
  0x7c   :  { %8105 = vmatpush3.bf16.msra.mxu0 %v9004_v11  ;;  %v9064_v11 = vld [vmem:[%s11764_s1 + $0x518] sm:$0xff]  }
  0x7d   :  { %8127 = vmatpush3.bf16.msra.mxu1 %v9006_v13  ;;  %8106 = vmatprep.subr.bf16.mxu0 %v9007_v14  ;;  %v9066_v13 = vld [vmem:[%s11764_s1 + $0x598] sm:$0xff]   ;;  %v9067_v14 = vld [vmem:[%s11764_s1 + $0x560] sm:$0xff]  }
  0x7e   :  { %8128 = vmatprep.subr.bf16.mxu1 %v9009_v16  ;;  %v9069_v16 = vld [vmem:[%s11764_s1 + $0x5e0] sm:$0xff]  }
  0x80   :  { %8107 = vmatpush3.bf16.msra.mxu0 %v9008_v15  ;;  %v9068_v15 = vld [vmem:[%s11764_s1 + $0x520] sm:$0xff]  }
  0x81   :  { %8129 = vmatpush3.bf16.msra.mxu1 %v9012_v20  ;;  %8136 = vmatprep.subr.bf16.mxu0 %v9013_v21  ;;  %v9073_v20 = vld [vmem:[%s11764_s1 + $0x5e8] sm:$0xff]  }
  0x82   :  { %8158 = vmatprep.subr.bf16.mxu1 %v9017_v26  ;;  %v9074_v21 = vld [vmem:[%s11764_s1 + $0x5a8] sm:$0xff]   ;;  %v9079_v26 = vld [vmem:[%s11764_s1 + $0x578] sm:$0xff]  }
  0x83   :  { %5810 = vmatmul.mubr.bf16.vlgmr.msra.gmra.mrb[12].mxu0 %v7240_v18  ;;  %v9071_v18 = vld [vmem:[%s11764_s1 + $0x568] sm:$0xff]  }
  0x84   :  { %8137 = vmatpush3.bf16.msra.mxu0 %v9016_v25  ;;  %5850 = vmatmul.mubr.bf16.vlgmr.msra.gmra.mrb[12].mxu1 %v7242_v23  ;;  %v9076_v23 = vld [vmem:[%s11764_s1 + $0x530] sm:$0xff]  }
  0x85   :  { %8159 = vmatpush3.bf16.msra.mxu1 %v9018_v27  ;;  %8138 = vmatprep.subr.bf16.mxu0 %v9019_v28  ;;  %v9078_v25 = vld [vmem:[%s11764_s1 + $0x5b0] sm:$0xff]   ;;  %v9080_v27 = vld [vmem:[%s11764_s1 + $0x538] sm:$0xff]  }
  0x86   :  { %8160 = vmatprep.subr.bf16.mxu1 %v9021_v30  ;;  %5889 = vmatprep.mubr.bf16.mxu0 %v7245_v57  ;;  %v9081_v28 = vld [vmem:[%s11764_s1 + $0x5f8] sm:$0xff]   ;;  %v9108_v57 = vld [vmem:[%s11764_s1 + $0x628] sm:$0xff]  }
  0x87   :  { %5929 = vmatprep.mubr.bf16.mxu1 %v7247_v62  ;;  %v9113_v62 = vld [vmem:[%s11764_s1 + $0x6f0] sm:$0xff]  }
  0x88   :  { %8139 = vmatpush3.bf16.msra.mxu0 %v9020_v29  ;;  %v38_v29 = vld [vmem:[%s11765_s0 + $0x50] sm:$0xff] }
  0x89   :  { %8161 = vmatpush3.bf16.msra.mxu1 %v9022_v31  ;;  %8140 = vmatprep.subr.bf16.mxu0 %v9023_v32  ;;  %v7248_v30 = vcombine.low %v38_v29, %v38_v29  ;;  %v7249_v31 = vcombine.high %v38_v29, %v38_v29  ;;  %v9084_v32 = vld [vmem:[%s11764_s1 + $0x5b8] sm:$0xff]  }
  0x8a   :  { %8162 = vmatprep.subr.bf16.mxu1 %v9025_v34  ;;  %v39_v34 = vld [vmem:[%s11765_s0 + $0x58] sm:$0xff] }
  0x8c   :  { %8141 = vmatpush3.bf16.msra.mxu0 %v9024_v33  ;;  %v9085_v33 = vld [vmem:[%s11764_s1 + $0x640] sm:$0xff]  }
  0x8d   :  { %8163 = vmatpush3.bf16.msra.mxu1 %v9026_v35  ;;  %8142 = vmatprep.subr.bf16.mxu0 %v9027_v36  ;;  %v7250_v35 = vcombine.low %v39_v34, %v39_v34  ;;  %v7251_v36 = vcombine.high %v39_v34, %v39_v34 }
  0x8e   :  { %8164 = vmatprep.subr.bf16.mxu1 %v9029_v38  ;;  %v9089_v38 = vld [vmem:[%s11764_s1 + $0x6c0] sm:$0xff]  }
  0x90   :  { %8143 = vmatpush3.bf16.msra.mxu0 %v9028_v37  ;;  %v9088_v37 = vld [vmem:[%s11764_s1 + $0x600] sm:$0xff]  }
  0x91   :  { %8165 = vmatpush3.bf16.msra.mxu1 %v9030_v39  ;;  %8144 = vmatprep.subr.bf16.mxu0 %v9031_v40  ;;  %v9090_v39 = vld [vmem:[%s11764_s1 + $0x680] sm:$0xff]   ;;  %v9091_v40 = vld [vmem:[%s11764_s1 + $0x648] sm:$0xff]  }
  0x92   :  { %8166 = vmatprep.subr.bf16.mxu1 %v9033_v42  ;;  %v9093_v42 = vld [vmem:[%s11764_s1 + $0x6c8] sm:$0xff]  }
  0x94   :  { %8145 = vmatpush3.bf16.msra.mxu0 %v9032_v41  ;;  %v9092_v41 = vld [vmem:[%s11764_s1 + $0x608] sm:$0xff]  }
  0x95   :  { %8167 = vmatpush3.bf16.msra.mxu1 %v9034_v43  ;;  %8146 = vmatprep.subr.bf16.mxu0 %v9035_v44  ;;  %v9094_v43 = vld [vmem:[%s11764_s1 + $0x688] sm:$0xff]   ;;  %v9095_v44 = vld [vmem:[%s11764_s1 + $0x650] sm:$0xff]  }
  0x96   :  { %8168 = vmatprep.subr.bf16.mxu1 %v9037_v46  ;;  %v9097_v46 = vld [vmem:[%s11764_s1 + $0x6d0] sm:$0xff]  }
  0x98   :  { %8147 = vmatpush3.bf16.msra.mxu0 %v9036_v45  ;;  %v9096_v45 = vld [vmem:[%s11764_s1 + $0x610] sm:$0xff]  }
  0x99   :  { %8169 = vmatpush3.bf16.msra.mxu1 %v9038_v47  ;;  %8148 = vmatprep.subr.bf16.mxu0 %v9039_v48  ;;  %v9098_v47 = vld [vmem:[%s11764_s1 + $0x690] sm:$0xff]   ;;  %v9099_v48 = vld [vmem:[%s11764_s1 + $0x658] sm:$0xff]  }
  0x9a   :  { %8170 = vmatprep.subr.bf16.mxu1 %v9041_v50  ;;  %v9101_v50 = vld [vmem:[%s11764_s1 + $0x6d8] sm:$0xff]  }
  0x9c   :  { %8149 = vmatpush3.bf16.msra.mxu0 %v9040_v49  ;;  %v9100_v49 = vld [vmem:[%s11764_s1 + $0x618] sm:$0xff]  }
  0x9d   :  { %8171 = vmatpush3.bf16.msra.mxu1 %v9042_v51  ;;  %8150 = vmatprep.subr.bf16.mxu0 %v9043_v52  ;;  %v9102_v51 = vld [vmem:[%s11764_s1 + $0x698] sm:$0xff]   ;;  %v9103_v52 = vld [vmem:[%s11764_s1 + $0x660] sm:$0xff]  }
  0x9e   :  { %8172 = vmatprep.subr.bf16.mxu1 %v9045_v54  ;;  %v9105_v54 = vld [vmem:[%s11764_s1 + $0x6e0] sm:$0xff]  }
  0xa0   :  { %8151 = vmatpush3.bf16.msra.mxu0 %v9044_v53  ;;  %v9104_v53 = vld [vmem:[%s11764_s1 + $0x620] sm:$0xff]  }
  0xa1   :  { %8173 = vmatpush3.bf16.msra.mxu1 %v9048_v58  ;;  %8180 = vmatprep.subr.bf16.mxu0 %v9049_v59  ;;  %v9109_v58 = vld [vmem:[%s11764_s1 + $0x6e8] sm:$0xff]  }
  0xa2   :  { %8202 = vmatprep.subr.bf16.mxu1 %v9053_v0  ;;  %v9110_v59 = vld [vmem:[%s11764_s1 + $0x6a8] sm:$0xff]   ;;  %v9115_v0 = vld [vmem:[%s11764_s1 + $0x678] sm:$0xff]  }
  0xa3   :  { %5890 = vmatmul.mubr.bf16.vlgmr.msra.gmra.mrb[16].mxu0 %v7244_v56  ;;  %v9107_v56 = vld [vmem:[%s11764_s1 + $0x668] sm:$0xff]  }
  0xa4   :  { %8181 = vmatpush3.bf16.msra.mxu0 %v9052_v63  ;;  %5930 = vmatmul.mubr.bf16.vlgmr.msra.gmra.mrb[16].mxu1 %v7246_v61  ;;  %v9112_v61 = vld [vmem:[%s11764_s1 + $0x630] sm:$0xff]  }
  0xa5   :  { %8203 = vmatpush3.bf16.msra.mxu1 %v9054_v1  ;;  %8182 = vmatprep.subr.bf16.mxu0 %v9055_v2  ;;  %v9114_v63 = vld [vmem:[%s11764_s1 + $0x6b0] sm:$0xff]   ;;  %v9116_v1 = vld [vmem:[%s11764_s1 + $0x638] sm:$0xff]  }
  0xa6   :  { %8204 = vmatprep.subr.bf16.mxu1 %v9057_v4  ;;  %5969 = vmatprep.mubr.bf16.mxu0 %v7249_v31  ;;  %v9117_v2 = vld [vmem:[%s11764_s1 + $0x6f8] sm:$0xff]   ;;  %v9142_v31 = vld [vmem:[%s11764_s1 + $0x7a0] sm:$0xff]  }
  0xa7   :  { %6009 = vmatprep.mubr.bf16.mxu1 %v7251_v36  ;;  %v9143_v36 = vld [vmem:[%s11764_s1 + $0x768] sm:$0xff]  }
  0xa8   :  { %8183 = vmatpush3.bf16.msra.mxu0 %v9056_v3  ;;  %v40_v3 = vld [vmem:[%s11765_s0 + $0x60] sm:$0xff] }
  0xa9   :  { %8205 = vmatpush3.bf16.msra.mxu1 %v9058_v5  ;;  %8184 = vmatprep.subr.bf16.mxu0 %v9059_v6  ;;  %v7252_v4 = vcombine.low %v40_v3, %v40_v3  ;;  %v7253_v5 = vcombine.high %v40_v3, %v40_v3  ;;  %v9120_v6 = vld [vmem:[%s11764_s1 + $0x6b8] sm:$0xff]   ;;  %v9167_v3 = vld [vmem:[%s11764_s1 + $0x850] sm:$0xff]  }
  0xaa   :  { %8206 = vmatprep.subr.bf16.mxu1 %v9061_v8  ;;  %v41_v8 = vld [vmem:[%s11765_s0 + $0x68] sm:$0xff] }
  0xac   :  { %8185 = vmatpush3.bf16.msra.mxu0 %v9060_v7  ;;  %v9121_v7 = vld [vmem:[%s11764_s1 + $0x740] sm:$0xff]  }
  0xad   :  { %8207 = vmatpush3.bf16.msra.mxu1 %v9062_v9  ;;  %8186 = vmatprep.subr.bf16.mxu0 %v9063_v10  ;;  %v7254_v9 = vcombine.low %v41_v8, %v41_v8  ;;  %v7255_v10 = vcombine.high %v41_v8, %v41_v8  ;;  %v9172_v8 = vld [vmem:[%s11764_s1 + $0x818] sm:$0xff]  }
  0xae   :  { %8208 = vmatprep.subr.bf16.mxu1 %v9065_v12  ;;  %v9125_v12 = vld [vmem:[%s11764_s1 + $0x7c0] sm:$0xff]  }
  0xb0   :  { %8187 = vmatpush3.bf16.msra.mxu0 %v9064_v11  ;;  %v9124_v11 = vld [vmem:[%s11764_s1 + $0x700] sm:$0xff]  }
  0xb1   :  { %8209 = vmatpush3.bf16.msra.mxu1 %v9066_v13  ;;  %8188 = vmatprep.subr.bf16.mxu0 %v9067_v14  ;;  %v9126_v13 = vld [vmem:[%s11764_s1 + $0x780] sm:$0xff]   ;;  %v9127_v14 = vld [vmem:[%s11764_s1 + $0x748] sm:$0xff]  }
  0xb2   :  { %8210 = vmatprep.subr.bf16.mxu1 %v9069_v16  ;;  %v9129_v16 = vld [vmem:[%s11764_s1 + $0x7c8] sm:$0xff]  }
  0xb4   :  { %8189 = vmatpush3.bf16.msra.mxu0 %v9068_v15  ;;  %v9128_v15 = vld [vmem:[%s11764_s1 + $0x708] sm:$0xff]  }
  0xb5   :  { %8211 = vmatpush3.bf16.msra.mxu1 %v9070_v17  ;;  %8190 = vmatprep.subr.bf16.mxu0 %v9071_v18  ;;  %v9130_v17 = vld [vmem:[%s11764_s1 + $0x788] sm:$0xff]   ;;  %v9131_v18 = vld [vmem:[%s11764_s1 + $0x750] sm:$0xff]  }
  0xb6   :  { %8212 = vmatprep.subr.bf16.mxu1 %v9073_v20  ;;  %v9133_v20 = vld [vmem:[%s11764_s1 + $0x7d0] sm:$0xff]  }
  0xb8   :  { %8191 = vmatpush3.bf16.msra.mxu0 %v9072_v19  ;;  %v9132_v19 = vld [vmem:[%s11764_s1 + $0x710] sm:$0xff]  }
  0xb9   :  { %8213 = vmatpush3.bf16.msra.mxu1 %v9074_v21  ;;  %8192 = vmatprep.subr.bf16.mxu0 %v9075_v22  ;;  %v9134_v21 = vld [vmem:[%s11764_s1 + $0x790] sm:$0xff]   ;;  %v9135_v22 = vld [vmem:[%s11764_s1 + $0x758] sm:$0xff]  }
  0xba   :  { %8214 = vmatprep.subr.bf16.mxu1 %v9077_v24  ;;  %v9137_v24 = vld [vmem:[%s11764_s1 + $0x7d8] sm:$0xff]  }
  0xbc   :  { %8193 = vmatpush3.bf16.msra.mxu0 %v9076_v23  ;;  %v9136_v23 = vld [vmem:[%s11764_s1 + $0x718] sm:$0xff]  }
  0xbd   :  { %8215 = vmatpush3.bf16.msra.mxu1 %v9078_v25  ;;  %8194 = vmatprep.subr.bf16.mxu0 %v9079_v26  ;;  %v9138_v25 = vld [vmem:[%s11764_s1 + $0x798] sm:$0xff]   ;;  %v9139_v26 = vld [vmem:[%s11764_s1 + $0x760] sm:$0xff]  }
  0xbe   :  { %8216 = vmatprep.subr.bf16.mxu1 %v9081_v28  ;;  %v9141_v28 = vld [vmem:[%s11764_s1 + $0x7e0] sm:$0xff]  }
  0xc0   :  { %8195 = vmatpush3.bf16.msra.mxu0 %v9080_v27  ;;  %v9140_v27 = vld [vmem:[%s11764_s1 + $0x720] sm:$0xff]  }
  0xc1   :  { %8217 = vmatpush3.bf16.msra.mxu1 %v9084_v32  ;;  %8224 = vmatprep.subr.bf16.mxu0 %v9085_v33 }
  0xc2   :  { %8246 = vmatprep.subr.bf16.mxu1 %v9089_v38  ;;  %v9144_v38 = vld [vmem:[%s11764_s1 + $0x728] sm:$0xff]  }
  0xc3   :  { %5970 = vmatmul.mubr.bf16.vlgmr.msra.gmra.mrb[20].mxu0 %v7248_v30 }
  0xc4   :  { %8225 = vmatpush3.bf16.msra.mxu0 %v9088_v37  ;;  %6010 = vmatmul.mubr.bf16.vlgmr.msra.gmra.mrb[20].mxu1 %v7250_v35 }
  0xc5   :  { %8247 = vmatpush3.bf16.msra.mxu1 %v9090_v39  ;;  %8226 = vmatprep.subr.bf16.mxu0 %v9091_v40 }
  0xc6   :  { %8248 = vmatprep.subr.bf16.mxu1 %v9093_v42  ;;  %6049 = vmatprep.mubr.bf16.mxu0 %v7253_v5  ;;  %v9169_v5 = vld [vmem:[%s11764_s1 + $0x8d0] sm:$0xff]  }
  0xc7   :  { %6089 = vmatprep.mubr.bf16.mxu1 %v7255_v10  ;;  %v9174_v10 = vld [vmem:[%s11764_s1 + $0x898] sm:$0xff]  }
  0xc8   :  { %8227 = vmatpush3.bf16.msra.mxu0 %v9092_v41  ;;  %v9145_v41 = vld [vmem:[%s11764_s1 + $0x7e8] sm:$0xff]  }
  0xc9   :  { %8249 = vmatpush3.bf16.msra.mxu1 %v9094_v43  ;;  %8228 = vmatprep.subr.bf16.mxu0 %v9095_v44  ;;  %v9146_v43 = vld [vmem:[%s11764_s1 + $0x7a8] sm:$0xff]  }
  0xca   :  { %8250 = vmatprep.subr.bf16.mxu1 %v9097_v46  ;;  %v9148_v46 = vld [vmem:[%s11764_s1 + $0x730] sm:$0xff]  }
  0xcc   :  { %8229 = vmatpush3.bf16.msra.mxu0 %v9096_v45  ;;  %v9147_v45 = vld [vmem:[%s11764_s1 + $0x770] sm:$0xff]  }
  0xcd   :  { %8251 = vmatpush3.bf16.msra.mxu1 %v9098_v47  ;;  %8230 = vmatprep.subr.bf16.mxu0 %v9099_v48  ;;  %v9149_v47 = vld [vmem:[%s11764_s1 + $0x7f0] sm:$0xff]  }
  0xce   :  { %8252 = vmatprep.subr.bf16.mxu1 %v9101_v50  ;;  %v9150_v48 = vld [vmem:[%s11764_s1 + $0x7b0] sm:$0xff]   ;;  %v9152_v50 = vld [vmem:[%s11764_s1 + $0x738] sm:$0xff]  }
  0xd0   :  { %8231 = vmatpush3.bf16.msra.mxu0 %v9100_v49  ;;  %v9151_v49 = vld [vmem:[%s11764_s1 + $0x778] sm:$0xff]  }
  0xd1   :  { %8253 = vmatpush3.bf16.msra.mxu1 %v9102_v51  ;;  %8232 = vmatprep.subr.bf16.mxu0 %v9103_v52  ;;  %v9153_v51 = vld [vmem:[%s11764_s1 + $0x7f8] sm:$0xff]   ;;  %v42_v52 = vld [vmem:[%s11765_s0 + $0x70] sm:$0xff] }
  0xd2   :  { %8254 = vmatprep.subr.bf16.mxu1 %v9105_v54  ;;  %v7257_v54 = vcombine.high %v42_v52, %v42_v52 }
  0xd4   :  { %8233 = vmatpush3.bf16.msra.mxu0 %v9104_v53  ;;  %v7256_v53 = vcombine.low %v42_v52, %v42_v52  ;;  %v9202_v52 = vld [vmem:[%s11764_s1 + $0x988] sm:$0xff]  }
  0xd5   :  { %8255 = vmatpush3.bf16.msra.mxu1 %v9106_v55  ;;  %8234 = vmatprep.subr.bf16.mxu0 %v9107_v56  ;;  %v9156_v55 = vld [vmem:[%s11764_s1 + $0x7b8] sm:$0xff]   ;;  %v9157_v56 = vld [vmem:[%s11764_s1 + $0x840] sm:$0xff]  }
  0xd6   :  { %8256 = vmatprep.subr.bf16.mxu1 %v9109_v58 }
  0xd8   :  { %8235 = vmatpush3.bf16.msra.mxu0 %v9108_v57  ;;  %v43_v57 = vld [vmem:[%s11765_s0 + $0x78] sm:$0xff] }
  0xd9   :  { %8257 = vmatpush3.bf16.msra.mxu1 %v9110_v59  ;;  %8236 = vmatprep.subr.bf16.mxu0 %v9111_v60  ;;  %v7258_v58 = vcombine.low %v43_v57, %v43_v57  ;;  %v7259_v59 = vcombine.high %v43_v57, %v43_v57  ;;  %v9160_v60 = vld [vmem:[%s11764_s1 + $0x800] sm:$0xff]   ;;  %v9207_v57 = vld [vmem:[%s11764_s1 + $0x958] sm:$0xff]  }
  0xda   :  { %8258 = vmatprep.subr.bf16.mxu1 %v9113_v62  ;;  %v9162_v62 = vld [vmem:[%s11764_s1 + $0x880] sm:$0xff]  }
  0xdc   :  { %8237 = vmatpush3.bf16.msra.mxu0 %v9112_v61  ;;  %v9161_v61 = vld [vmem:[%s11764_s1 + $0x8c0] sm:$0xff]  }
  0xdd   :  { %8259 = vmatpush3.bf16.msra.mxu1 %v9114_v63  ;;  %8238 = vmatprep.subr.bf16.mxu0 %v9115_v0  ;;  %v9163_v63 = vld [vmem:[%s11764_s1 + $0x848] sm:$0xff]  }
  0xde   :  { %8260 = vmatprep.subr.bf16.mxu1 %v9117_v2  ;;  %v9164_v0 = vld [vmem:[%s11764_s1 + $0x808] sm:$0xff]  }
  0xdf   :  { %v9166_v2 = vld [vmem:[%s11764_s1 + $0x888] sm:$0xff]  }
  0xe0   :  { %8239 = vmatpush3.bf16.msra.mxu0 %v9116_v1  ;;  %v9165_v1 = vld [vmem:[%s11764_s1 + $0x8c8] sm:$0xff]  }
  0xe1   :  { %8261 = vmatpush3.bf16.msra.mxu1 %v9120_v6  ;;  %8268 = vmatprep.subr.bf16.mxu0 %v9121_v7  ;;  %v9170_v6 = vld [vmem:[%s11764_s1 + $0x890] sm:$0xff]   ;;  %v9171_v7 = vld [vmem:[%s11764_s1 + $0x858] sm:$0xff]  }
  0xe2   :  { %8290 = vmatprep.subr.bf16.mxu1 %v9125_v12  ;;  %v9176_v12 = vld [vmem:[%s11764_s1 + $0x820] sm:$0xff]  }
  0xe3   :  { %6050 = vmatmul.mubr.bf16.vlgmr.msra.gmra.mrb[24].mxu0 %v7252_v4  ;;  %v9168_v4 = vld [vmem:[%s11764_s1 + $0x810] sm:$0xff]  }
  0xe4   :  { %8269 = vmatpush3.bf16.msra.mxu0 %v9124_v11  ;;  %6090 = vmatmul.mubr.bf16.vlgmr.msra.gmra.mrb[24].mxu1 %v7254_v9  ;;  %v9173_v9 = vld [vmem:[%s11764_s1 + $0x8d8] sm:$0xff]   ;;  %v9175_v11 = vld [vmem:[%s11764_s1 + $0x860] sm:$0xff]  }
  0xe5   :  { %8291 = vmatpush3.bf16.msra.mxu1 %v9126_v13  ;;  %8270 = vmatprep.subr.bf16.mxu0 %v9127_v14  ;;  %v9177_v13 = vld [vmem:[%s11764_s1 + $0x8e0] sm:$0xff]  }
  0xe6   :  { %8292 = vmatprep.subr.bf16.mxu1 %v9129_v16  ;;  %6129 = vmatprep.mubr.bf16.mxu0 %v7257_v54  ;;  %v9204_v54 = vld [vmem:[%s11764_s1 + $0x910] sm:$0xff]  }
  0xe7   :  { %6169 = vmatprep.mubr.bf16.mxu1 %v7259_v59  ;;  %v9209_v59 = vld [vmem:[%s11764_s1 + $0x9d8] sm:$0xff]  }
  0xe8   :  { %8271 = vmatpush3.bf16.msra.mxu0 %v9128_v15  ;;  %v9178_v15 = vld [vmem:[%s11764_s1 + $0x8a0] sm:$0xff]  }
  0xe9   :  { %8293 = vmatpush3.bf16.msra.mxu1 %v9130_v17  ;;  %8272 = vmatprep.subr.bf16.mxu0 %v9131_v18  ;;  %v9179_v18 = vld [vmem:[%s11764_s1 + $0x868] sm:$0xff]  }
  0xea   :  { %8294 = vmatprep.subr.bf16.mxu1 %v9133_v20 }
  0xec   :  { %8273 = vmatpush3.bf16.msra.mxu0 %v9132_v19 }
  0xed   :  { %8295 = vmatpush3.bf16.msra.mxu1 %v9134_v21  ;;  %8274 = vmatprep.subr.bf16.mxu0 %v9135_v22  ;;  %v9180_v21 = vld [vmem:[%s11764_s1 + $0x828] sm:$0xff]  }
  0xee   :  { %8296 = vmatprep.subr.bf16.mxu1 %v9137_v24 }
  0xf0   :  { %8275 = vmatpush3.bf16.msra.mxu0 %v9136_v23 }
  0xf1   :  { %8297 = vmatpush3.bf16.msra.mxu1 %v9138_v25  ;;  %8276 = vmatprep.subr.bf16.mxu0 %v9139_v26  ;;  %v9181_v26 = vld [vmem:[%s11764_s1 + $0x8e8] sm:$0xff]  }
  0xf2   :  { %8298 = vmatprep.subr.bf16.mxu1 %v9141_v28  ;;  %v9182_v28 = vld [vmem:[%s11764_s1 + $0x8a8] sm:$0xff]  }
  0xf4   :  { %8277 = vmatpush3.bf16.msra.mxu0 %v9140_v27 }
  0xf5   :  { %8299 = vmatpush3.bf16.msra.mxu1 %v9142_v31  ;;  %8278 = vmatprep.subr.bf16.mxu0 %v9143_v36  ;;  %v9183_v31 = vld [vmem:[%s11764_s1 + $0x870] sm:$0xff]   ;;  %v9188_v36 = vld [vmem:[%s11764_s1 + $0x838] sm:$0xff]  }
  0xf6   :  { %v7976_v29 = vpop.f32.mrb[0].mxu0  ;;  %8300 = vmatprep.subr.bf16.mxu1 %v9145_v41  ;;  %v9192_v41 = vld [vmem:[%s11764_s1 + $0x8b8] sm:$0xff]  }
  0xf7   :  { %v7998_v30 = vpop.f32.mrb[0].mxu1  ;;  %v7977_v32 = vpop.f32.mrb[1].mxu0 }
  0xf8   :  { %v7999_v33 = vpop.f32.mrb[1].mxu1  ;;  %v7978_v34 = vadd.f32 %v7977_v32, %v7976_v29  ;;  %v7979_v37 = vpop.f32.mrb[2].mxu0  ;;  %8279 = vmatpush3.bf16.msra.mxu0 %v9144_v38  ;;  %v9184_v32 = vld [vmem:[%s11764_s1 + $0x830] sm:$0xff]   ;;  %v44_v38 = vld [vmem:[%s11765_s0 + $0x80] sm:$0xff] }
  0xf9   :  { %v8000_v35 = vadd.f32 %v7999_v33, %v7998_v30  ;;  %v7980_v39 = vpop.f32.mrb[3].mxu0  ;;  %v8001_v42 = vpop.f32.mrb[2].mxu1  ;;  %8301 = vmatpush3.bf16.msra.mxu1 %v9146_v43  ;;  %8280 = vmatprep.subr.bf16.mxu0 %v9147_v45  ;;  %v9185_v33 = vld [vmem:[%s11764_s1 + $0x8f0] sm:$0xff]   ;;  %v9189_v37 = vld [vmem:[%s11764_s1 + $0x8f8] sm:$0xff]   ;;  %v45_v43 = vld [vmem:[%s11765_s0 + $0x88] sm:$0xff] }
  0xfa   :  { %v8002_v44 = vpop.f32.mrb[3].mxu1  ;;  %8302 = vmatprep.subr.bf16.mxu1 %v9149_v47  ;;  %v7260_v39 = vcombine.low %v44_v38, %v44_v38  ;;  %v9193_v42 = vld [vmem:[%s11764_s1 + $0x940] sm:$0xff]   ;;  %v7263_v45 = vcombine.high %v45_v43, %v45_v43 }
  0xfb   :  { %v10414_v40 = vadd.f32 %v8000_v35, %v7978_v34  ;;  %v9186_v34 = vld [vmem:[%s11764_s1 + $0x8b0] sm:$0xff]   ;;  %v9187_v35 = vld [vmem:[%s11764_s1 + $0x878] sm:$0xff]   ;;  %v7262_v44 = vcombine.low %v45_v43, %v45_v43  ;;  %v9197_v47 = vld [vmem:[%s11764_s1 + $0x9c0] sm:$0xff]  }
  0xfc   :  { %8281 = vmatpush3.bf16.msra.mxu0 %v9148_v46  ;;  %v9196_v46 = vld [vmem:[%s11764_s1 + $0x900] sm:$0xff]   ;;  %v9243_v43 = vld [vmem:[%s11764_s1 + $0xa58] sm:$0xff]  }
  0xfd   :  { %8303 = vmatpush3.bf16.msra.mxu1 %v9150_v48  ;;  %8282 = vmatprep.subr.bf16.mxu0 %v9151_v49  ;;  %v9198_v48 = vld [vmem:[%s11764_s1 + $0x980] sm:$0xff]   ;;  %v9199_v49 = vld [vmem:[%s11764_s1 + $0x948] sm:$0xff]  }
  0xfe   :  { %8304 = vmatprep.subr.bf16.mxu1 %v9153_v51  ;;  %v9201_v51 = vld [vmem:[%s11764_s1 + $0x9c8] sm:$0xff]  }
 0x100   :  { %8283 = vmatpush3.bf16.msra.mxu0 %v9152_v50  ;;  %v9200_v50 = vld [vmem:[%s11764_s1 + $0x908] sm:$0xff]  }
 0x101   :  { %8305 = vmatpush3.bf16.msra.mxu1 %v9156_v55  ;;  %8312 = vmatprep.subr.bf16.mxu0 %v9157_v56  ;;  %v9205_v55 = vld [vmem:[%s11764_s1 + $0x9d0] sm:$0xff]  }
 0x102   :  { %8334 = vmatprep.subr.bf16.mxu1 %v9161_v61  ;;  %v9206_v56 = vld [vmem:[%s11764_s1 + $0x990] sm:$0xff]   ;;  %v9211_v61 = vld [vmem:[%s11764_s1 + $0x960] sm:$0xff]  }
 0x103   :  { %6130 = vmatmul.mubr.bf16.vlgmr.msra.gmra.mrb[28].mxu0 %v7256_v53  ;;  %v9203_v53 = vld [vmem:[%s11764_s1 + $0x950] sm:$0xff]  }
 0x104   :  { %8313 = vmatpush3.bf16.msra.mxu0 %v9160_v60  ;;  %6170 = vmatmul.mubr.bf16.vlgmr.msra.gmra.mrb[28].mxu1 %v7258_v58  ;;  %v9208_v58 = vld [vmem:[%s11764_s1 + $0x918] sm:$0xff]  }
 0x105   :  { %8335 = vmatpush3.bf16.msra.mxu1 %v9162_v62  ;;  %8314 = vmatprep.subr.bf16.mxu0 %v9163_v63  ;;  %v9210_v60 = vld [vmem:[%s11764_s1 + $0x998] sm:$0xff]   ;;  %v9212_v62 = vld [vmem:[%s11764_s1 + $0x920] sm:$0xff]  }
 0x106   :  { %8336 = vmatprep.subr.bf16.mxu1 %v9165_v1  ;;  %6249 = vmatprep.mubr.bf16.mxu1 %v7263_v45  ;;  %v9245_v45 = vld [vmem:[%s11764_s1 + $0xad8] sm:$0xff]  }
 0x108   :  { %8315 = vmatpush3.bf16.msra.mxu0 %v9164_v0  ;;  %v9213_v0 = vld [vmem:[%s11764_s1 + $0x9e0] sm:$0xff]  }
 0x109   :  { %8337 = vmatpush3.bf16.msra.mxu1 %v9166_v2  ;;  %8316 = vmatprep.subr.bf16.mxu0 %v9167_v3  ;;  %v9214_v2 = vld [vmem:[%s11764_s1 + $0x9a0] sm:$0xff]  }
 0x10a   :  { %8338 = vmatprep.subr.bf16.mxu1 %v9169_v5  ;;  %v9215_v5 = vld [vmem:[%s11764_s1 + $0x968] sm:$0xff]  }
 0x10c   :  { %8317 = vmatpush3.bf16.msra.mxu0 %v9168_v4 }
 0x10d   :  { %8339 = vmatpush3.bf16.msra.mxu1 %v9170_v6  ;;  %8318 = vmatprep.subr.bf16.mxu0 %v9171_v7 }
 0x10e   :  { %8340 = vmatprep.subr.bf16.mxu1 %v9173_v9 }
 0x110   :  { %8319 = vmatpush3.bf16.msra.mxu0 %v9172_v8  ;;  %v9216_v8 = vld [vmem:[%s11764_s1 + $0x928] sm:$0xff]  }
 0x111   :  { %8341 = vmatpush3.bf16.msra.mxu1 %v9174_v10  ;;  %8320 = vmatprep.subr.bf16.mxu0 %v9175_v11  ;;  %v9217_v11 = vld [vmem:[%s11764_s1 + $0x9e8] sm:$0xff]  }
 0x112   :  { %8342 = vmatprep.subr.bf16.mxu1 %v9177_v13  ;;  %v9218_v13 = vld [vmem:[%s11764_s1 + $0x9a8] sm:$0xff]  }
 0x114   :  { %8321 = vmatpush3.bf16.msra.mxu0 %v9176_v12 }
 0x115   :  { %8343 = vmatpush3.bf16.msra.mxu1 %v9178_v15  ;;  %8322 = vmatprep.subr.bf16.mxu0 %v9179_v18  ;;  %v9220_v18 = vld [vmem:[%s11764_s1 + $0x930] sm:$0xff]  }
 0x116   :  { %v8020_v14 = vpop.f32.mrb[4].mxu0  ;;  %8344 = vmatprep.subr.bf16.mxu1 %v9181_v26 }
 0x117   :  { %v8021_v16 = vpop.f32.mrb[5].mxu0  ;;  %v8042_v20 = vpop.f32.mrb[4].mxu1 }
 0x118   :  { %v8022_v17 = vadd.f32 %v8021_v16, %v8020_v14  ;;  %v8023_v19 = vpop.f32.mrb[6].mxu0  ;;  %v8043_v23 = vpop.f32.mrb[5].mxu1  ;;  %8323 = vmatpush3.bf16.msra.mxu0 %v9180_v21  ;;  %v9219_v16 = vld [vmem:[%s11764_s1 + $0x970] sm:$0xff]   ;;  %v9223_v21 = vld [vmem:[%s11764_s1 + $0x978] sm:$0xff]  }
 0x119   :  { %v8024_v22 = vpop.f32.mrb[7].mxu0  ;;  %v8044_v25 = vadd.f32 %v8043_v23, %v8042_v20  ;;  %v8045_v27 = vpop.f32.mrb[6].mxu1  ;;  %8345 = vmatpush3.bf16.msra.mxu1 %v9182_v28  ;;  %8324 = vmatprep.subr.bf16.mxu0 %v9183_v31  ;;  %v9221_v19 = vld [vmem:[%s11764_s1 + $0x9f0] sm:$0xff]   ;;  %v9225_v23 = vld [vmem:[%s11764_s1 + $0x9f8] sm:$0xff]   ;;  %v9229_v28 = vld [vmem:[%s11764_s1 + $0xa40] sm:$0xff]  }
 0x11a   :  { %v5652_v24 = vadd.f32 %v8022_v17, %v10414_v40  ;;  %v8046_v29 = vpop.f32.mrb[7].mxu1  ;;  %8346 = vmatprep.subr.bf16.mxu1 %v9185_v33  ;;  %v7261_v40 = vcombine.high %v44_v38, %v44_v38  ;;  %v9222_v20 = vld [vmem:[%s11764_s1 + $0x9b0] sm:$0xff]   ;;  %v9224_v22 = vld [vmem:[%s11764_s1 + $0x938] sm:$0xff]   ;;  %v9233_v33 = vld [vmem:[%s11764_s1 + $0xac0] sm:$0xff]  }
 0x11b   :  { %v9228_v27 = vld [vmem:[%s11764_s1 + $0x9b8] sm:$0xff]   ;;  %v9238_v38 = vld [vmem:[%s11764_s1 + $0xa88] sm:$0xff]  }
 0x11c   :  { %v10525_v30 = vadd.f32 %v8044_v25, %v5652_v24  ;;  %8325 = vmatpush3.bf16.msra.mxu0 %v9184_v32  ;;  %6209 = vmatprep.mubr.bf16.mxu0 %v7261_v40  ;;  %v46_v24 = vld [vmem:[%s11765_s0 + $0x90] sm:$0xff]  ;;  %v47_v29 = vld [vmem:[%s11765_s0 + $0x98] sm:$0xff]  ;;  %v9232_v32 = vld [vmem:[%s11764_s1 + $0xa00] sm:$0xff]  }
 0x11d   :  { %8347 = vmatpush3.bf16.msra.mxu1 %v9186_v34  ;;  %8326 = vmatprep.subr.bf16.mxu0 %v9187_v35  ;;  %v7264_v25 = vcombine.low %v46_v24, %v46_v24  ;;  %v7265_v26 = vcombine.high %v46_v24, %v46_v24  ;;  %v7267_v31 = vcombine.high %v47_v29, %v47_v29  ;;  %v9234_v34 = vld [vmem:[%s11764_s1 + $0xa80] sm:$0xff]   ;;  %v9235_v35 = vld [vmem:[%s11764_s1 + $0xa48] sm:$0xff]   ;;  %v9240_v40 = vld [vmem:[%s11764_s1 + $0xa10] sm:$0xff]  }
 0x11e   :  { %8348 = vmatprep.subr.bf16.mxu1 %v9189_v37  ;;  %v9237_v37 = vld [vmem:[%s11764_s1 + $0xac8] sm:$0xff]  }
 0x11f   :  { %v9274_v24 = vld [vmem:[%s11764_s1 + $0xb88] sm:$0xff]  }
 0x120   :  { %8327 = vmatpush3.bf16.msra.mxu0 %v9188_v36  ;;  %v9236_v36 = vld [vmem:[%s11764_s1 + $0xa08] sm:$0xff]  }
 0x121   :  { %8349 = vmatpush3.bf16.msra.mxu1 %v9192_v41  ;;  %8356 = vmatprep.subr.bf16.mxu0 %v9193_v42  ;;  %v9241_v41 = vld [vmem:[%s11764_s1 + $0xad0] sm:$0xff]  }
 0x122   :  { %8378 = vmatprep.subr.bf16.mxu1 %v9197_v47  ;;  %v9242_v42 = vld [vmem:[%s11764_s1 + $0xa90] sm:$0xff]   ;;  %v9247_v47 = vld [vmem:[%s11764_s1 + $0xa60] sm:$0xff]  }
 0x123   :  { %6210 = vmatmul.mubr.bf16.vlgmr.msra.gmra.mrb[32].mxu0 %v7260_v39  ;;  %v9239_v39 = vld [vmem:[%s11764_s1 + $0xa50] sm:$0xff]  }
 0x124   :  { %8357 = vmatpush3.bf16.msra.mxu0 %v9196_v46  ;;  %6250 = vmatmul.mubr.bf16.vlgmr.msra.gmra.mrb[32].mxu1 %v7262_v44  ;;  %v9244_v44 = vld [vmem:[%s11764_s1 + $0xa18] sm:$0xff]  }
 0x125   :  { %8379 = vmatpush3.bf16.msra.mxu1 %v9198_v48  ;;  %8358 = vmatprep.subr.bf16.mxu0 %v9199_v49  ;;  %v9246_v46 = vld [vmem:[%s11764_s1 + $0xa98] sm:$0xff]   ;;  %v9248_v49 = vld [vmem:[%s11764_s1 + $0xa20] sm:$0xff]  }
 0x126   :  { %8380 = vmatprep.subr.bf16.mxu1 %v9201_v51  ;;  %6289 = vmatprep.mubr.bf16.mxu0 %v7265_v26  ;;  %v9249_v51 = vld [vmem:[%s11764_s1 + $0xae0] sm:$0xff]   ;;  %v9276_v26 = vld [vmem:[%s11764_s1 + $0xb10] sm:$0xff]  }
 0x127   :  { %6329 = vmatprep.mubr.bf16.mxu1 %v7267_v31  ;;  %v9281_v31 = vld [vmem:[%s11764_s1 + $0xbd8] sm:$0xff]  }
 0x128   :  { %8359 = vmatpush3.bf16.msra.mxu0 %v9200_v50 }
 0x129   :  { %8381 = vmatpush3.bf16.msra.mxu1 %v9202_v52  ;;  %8360 = vmatprep.subr.bf16.mxu0 %v9203_v53 }
 0x12a   :  { %8382 = vmatprep.subr.bf16.mxu1 %v9205_v55 }
 0x12c   :  { %8361 = vmatpush3.bf16.msra.mxu0 %v9204_v54  ;;  %v9250_v54 = vld [vmem:[%s11764_s1 + $0xaa0] sm:$0xff]  }
 0x12d   :  { %8383 = vmatpush3.bf16.msra.mxu1 %v9206_v56  ;;  %8362 = vmatprep.subr.bf16.mxu0 %v9207_v57  ;;  %v9251_v57 = vld [vmem:[%s11764_s1 + $0xa68] sm:$0xff]  }
 0x12e   :  { %8384 = vmatprep.subr.bf16.mxu1 %v9209_v59  ;;  %v9252_v59 = vld [vmem:[%s11764_s1 + $0xa28] sm:$0xff]  }
 0x130   :  { %8363 = vmatpush3.bf16.msra.mxu0 %v9208_v58 }
 0x131   :  { %8385 = vmatpush3.bf16.msra.mxu1 %v9210_v60  ;;  %8364 = vmatprep.subr.bf16.mxu0 %v9211_v61 }
 0x132   :  { %8386 = vmatprep.subr.bf16.mxu1 %v9213_v0  ;;  %v9254_v0 = vld [vmem:[%s11764_s1 + $0xaa8] sm:$0xff]  }
 0x134   :  { %8365 = vmatpush3.bf16.msra.mxu0 %v9212_v62  ;;  %v9253_v62 = vld [vmem:[%s11764_s1 + $0xae8] sm:$0xff]  }
 0x135   :  { %8387 = vmatpush3.bf16.msra.mxu1 %v9214_v2  ;;  %8366 = vmatprep.subr.bf16.mxu0 %v9215_v5  ;;  %v9257_v5 = vld [vmem:[%s11764_s1 + $0xaf0] sm:$0xff]  }
 0x136   :  { %v8064_v63 = vpop.f32.mrb[8].mxu0  ;;  %8388 = vmatprep.subr.bf16.mxu1 %v9217_v11 }
 0x137   :  { %v8065_v1 = vpop.f32.mrb[9].mxu0  ;;  %v8086_v6 = vpop.f32.mrb[8].mxu1 }
 0x138   :  { %v8066_v3 = vadd.f32 %v8065_v1, %v8064_v63  ;;  %v8067_v4 = vpop.f32.mrb[10].mxu0  ;;  %v8087_v10 = vpop.f32.mrb[9].mxu1  ;;  %8367 = vmatpush3.bf16.msra.mxu0 %v9216_v8  ;;  %v9260_v8 = vld [vmem:[%s11764_s1 + $0xa38] sm:$0xff]  }
 0x139   :  { %v8068_v9 = vpop.f32.mrb[11].mxu0  ;;  %v8088_v12 = vadd.f32 %v8087_v10, %v8086_v6  ;;  %v8089_v14 = vpop.f32.mrb[10].mxu1  ;;  %8389 = vmatpush3.bf16.msra.mxu1 %v9218_v13  ;;  %8368 = vmatprep.subr.bf16.mxu0 %v9219_v16  ;;  %v9256_v4 = vld [vmem:[%s11764_s1 + $0xa30] sm:$0xff]   ;;  %v48_v10 = vld [vmem:[%s11765_s0 + $0xa0] sm:$0xff]  ;;  %v9264_v13 = vld [vmem:[%s11764_s1 + $0xab8] sm:$0xff]  }
 0x13a   :  { %v5732_v7 = vadd.f32 %v8066_v3, %v10525_v30  ;;  %v8090_v17 = vpop.f32.mrb[11].mxu1  ;;  %8390 = vmatprep.subr.bf16.mxu1 %v9221_v19  ;;  %v7266_v30 = vcombine.low %v47_v29, %v47_v29  ;;  %v9255_v3 = vld [vmem:[%s11764_s1 + $0xa70] sm:$0xff]   ;;  %v9261_v9 = vld [vmem:[%s11764_s1 + $0xaf8] sm:$0xff]   ;;  %v7268_v11 = vcombine.low %v48_v10, %v48_v10  ;;  %v9265_v14 = vld [vmem:[%s11764_s1 + $0xb40] sm:$0xff]  }
 0x13b   :  { %v9258_v6 = vld [vmem:[%s11764_s1 + $0xab0] sm:$0xff]   ;;  %v9269_v19 = vld [vmem:[%s11764_s1 + $0xbc0] sm:$0xff]   ;;  %v9279_v29 = vld [vmem:[%s11764_s1 + $0xb58] sm:$0xff]  }
 0x13c   :  { %v10630_v15 = vadd.f32 %v8088_v12, %v5732_v7  ;;  %8369 = vmatpush3.bf16.msra.mxu0 %v9220_v18  ;;  %v9259_v7 = vld [vmem:[%s11764_s1 + $0xa78] sm:$0xff]   ;;  %v7269_v12 = vcombine.high %v48_v10, %v48_v10  ;;  %v9268_v18 = vld [vmem:[%s11764_s1 + $0xb00] sm:$0xff]   ;;  %v9310_v10 = vld [vmem:[%s11764_s1 + $0xc88] sm:$0xff]  }
 0x13d   :  { %8391 = vmatpush3.bf16.msra.mxu1 %v9222_v20  ;;  %8370 = vmatprep.subr.bf16.mxu0 %v9223_v21  ;;  %v9270_v20 = vld [vmem:[%s11764_s1 + $0xb80] sm:$0xff]   ;;  %v9271_v21 = vld [vmem:[%s11764_s1 + $0xb48] sm:$0xff]  }
 0x13e   :  { %8392 = vmatprep.subr.bf16.mxu1 %v9225_v23  ;;  %v9273_v23 = vld [vmem:[%s11764_s1 + $0xbc8] sm:$0xff]  }
 0x140   :  { %8371 = vmatpush3.bf16.msra.mxu0 %v9224_v22  ;;  %v9272_v22 = vld [vmem:[%s11764_s1 + $0xb08] sm:$0xff]  }
 0x141   :  { %8393 = vmatpush3.bf16.msra.mxu1 %v9228_v27  ;;  %8400 = vmatprep.subr.bf16.mxu0 %v9229_v28  ;;  %v9277_v27 = vld [vmem:[%s11764_s1 + $0xbd0] sm:$0xff]  }
 0x142   :  { %8422 = vmatprep.subr.bf16.mxu1 %v9233_v33  ;;  %v9278_v28 = vld [vmem:[%s11764_s1 + $0xb90] sm:$0xff]   ;;  %v9283_v33 = vld [vmem:[%s11764_s1 + $0xb60] sm:$0xff]  }
 0x143   :  { %6290 = vmatmul.mubr.bf16.vlgmr.msra.gmra.mrb[36].mxu0 %v7264_v25  ;;  %v9275_v25 = vld [vmem:[%s11764_s1 + $0xb50] sm:$0xff]  }
 0x144   :  { %8401 = vmatpush3.bf16.msra.mxu0 %v9232_v32  ;;  %6330 = vmatmul.mubr.bf16.vlgmr.msra.gmra.mrb[36].mxu1 %v7266_v30  ;;  %v9280_v30 = vld [vmem:[%s11764_s1 + $0xb18] sm:$0xff]  }
 0x145   :  { %8423 = vmatpush3.bf16.msra.mxu1 %v9234_v34  ;;  %8402 = vmatprep.subr.bf16.mxu0 %v9235_v35  ;;  %v9282_v32 = vld [vmem:[%s11764_s1 + $0xb98] sm:$0xff]   ;;  %v9284_v35 = vld [vmem:[%s11764_s1 + $0xb20] sm:$0xff]  }
 0x146   :  { %8424 = vmatprep.subr.bf16.mxu1 %v9237_v37  ;;  %6369 = vmatprep.mubr.bf16.mxu0 %v7269_v12  ;;  %v9285_v37 = vld [vmem:[%s11764_s1 + $0xbe0] sm:$0xff]   ;;  %v9312_v12 = vld [vmem:[%s11764_s1 + $0xc10] sm:$0xff]  }
 0x148   :  { %8403 = vmatpush3.bf16.msra.mxu0 %v9236_v36 }
 0x149   :  { %8425 = vmatpush3.bf16.msra.mxu1 %v9238_v38  ;;  %8404 = vmatprep.subr.bf16.mxu0 %v9239_v39 }
 0x14a   :  { %8426 = vmatprep.subr.bf16.mxu1 %v9241_v41 }
 0x14c   :  { %8405 = vmatpush3.bf16.msra.mxu0 %v9240_v40  ;;  %v9286_v40 = vld [vmem:[%s11764_s1 + $0xba0] sm:$0xff]  }
 0x14d   :  { %8427 = vmatpush3.bf16.msra.mxu1 %v9242_v42  ;;  %8406 = vmatprep.subr.bf16.mxu0 %v9243_v43  ;;  %v9287_v43 = vld [vmem:[%s11764_s1 + $0xb68] sm:$0xff]  }
 0x14e   :  { %8428 = vmatprep.subr.bf16.mxu1 %v9245_v45  ;;  %v9288_v45 = vld [vmem:[%s11764_s1 + $0xb28] sm:$0xff]  }
 0x150   :  { %8407 = vmatpush3.bf16.msra.mxu0 %v9244_v44 }
 0x151   :  { %8429 = vmatpush3.bf16.msra.mxu1 %v9246_v46  ;;  %8408 = vmatprep.subr.bf16.mxu0 %v9247_v47 }
 0x152   :  { %8430 = vmatprep.subr.bf16.mxu1 %v9249_v51 }
 0x154   :  { %8409 = vmatpush3.bf16.msra.mxu0 %v9248_v49 }
 0x155   :  { %8431 = vmatpush3.bf16.msra.mxu1 %v9250_v54  ;;  %8410 = vmatprep.subr.bf16.mxu0 %v9251_v57  ;;  %v9292_v54 = vld [vmem:[%s11764_s1 + $0xb30] sm:$0xff]   ;;  %v9295_v57 = vld [vmem:[%s11764_s1 + $0xb78] sm:$0xff]  }
 0x156   :  { %v8108_v48 = vpop.f32.mrb[12].mxu0  ;;  %8432 = vmatprep.subr.bf16.mxu1 %v9253_v62 }
 0x157   :  { %v8109_v50 = vpop.f32.mrb[13].mxu0  ;;  %v8130_v55 = vpop.f32.mrb[12].mxu1 }
 0x158   :  { %v8110_v52 = vadd.f32 %v8109_v50, %v8108_v48  ;;  %v8111_v53 = vpop.f32.mrb[14].mxu0  ;;  %v8131_v60 = vpop.f32.mrb[13].mxu1  ;;  %8411 = vmatpush3.bf16.msra.mxu0 %v9252_v59  ;;  %v9289_v48 = vld [vmem:[%s11764_s1 + $0xbe8] sm:$0xff]   ;;  %v9297_v59 = vld [vmem:[%s11764_s1 + $0xbf8] sm:$0xff]  }
 0x159   :  { %v8112_v58 = vpop.f32.mrb[15].mxu0  ;;  %v8132_v61 = vadd.f32 %v8131_v60, %v8130_v55  ;;  %v8133_v63 = vpop.f32.mrb[14].mxu1  ;;  %8433 = vmatpush3.bf16.msra.mxu1 %v9254_v0  ;;  %8412 = vmatprep.subr.bf16.mxu0 %v9255_v3  ;;  %v9290_v50 = vld [vmem:[%s11764_s1 + $0xba8] sm:$0xff]   ;;  %v9291_v53 = vld [vmem:[%s11764_s1 + $0xb70] sm:$0xff]   ;;  %v9301_v0 = vld [vmem:[%s11764_s1 + $0xc40] sm:$0xff]  }
 0x15a   :  { %v5812_v56 = vadd.f32 %v8110_v52, %v10630_v15  ;;  %v8134_v1 = vpop.f32.mrb[15].mxu1  ;;  %8434 = vmatprep.subr.bf16.mxu1 %v9257_v5  ;;  %v49_v15 = vld [vmem:[%s11765_s0 + $0xa8] sm:$0xff]  ;;  %v9293_v55 = vld [vmem:[%s11764_s1 + $0xbf0] sm:$0xff]   ;;  %v9296_v58 = vld [vmem:[%s11764_s1 + $0xb38] sm:$0xff]  }
 0x15b   :  { %v7270_v16 = vcombine.low %v49_v15, %v49_v15  ;;  %v7271_v17 = vcombine.high %v49_v15, %v49_v15  ;;  %v50_v60 = vld [vmem:[%s11765_s0 + $0xb0] sm:$0xff]  ;;  %v9300_v63 = vld [vmem:[%s11764_s1 + $0xbb8] sm:$0xff]   ;;  %v9305_v5 = vld [vmem:[%s11764_s1 + $0xcc0] sm:$0xff]  }
 0x15c   :  { %v10735_v2 = vadd.f32 %v8132_v61, %v5812_v56  ;;  %8413 = vmatpush3.bf16.msra.mxu0 %v9256_v4  ;;  %v9294_v56 = vld [vmem:[%s11764_s1 + $0xbb0] sm:$0xff]   ;;  %v7272_v61 = vcombine.low %v50_v60, %v50_v60  ;;  %v7273_v62 = vcombine.high %v50_v60, %v50_v60  ;;  %v51_v1 = vld [vmem:[%s11765_s0 + $0xb8] sm:$0xff]  ;;  %v9304_v4 = vld [vmem:[%s11764_s1 + $0xc00] sm:$0xff]  }
 0x15d   :  { %8435 = vmatpush3.bf16.msra.mxu1 %v9258_v6  ;;  %8414 = vmatprep.subr.bf16.mxu0 %v9259_v7  ;;  %v7275_v3 = vcombine.high %v51_v1, %v51_v1  ;;  %v9306_v6 = vld [vmem:[%s11764_s1 + $0xc80] sm:$0xff]   ;;  %v9307_v7 = vld [vmem:[%s11764_s1 + $0xc48] sm:$0xff]   ;;  %v9315_v15 = vld [vmem:[%s11764_s1 + $0xc58] sm:$0xff]  }
 0x15e   :  { %8436 = vmatprep.subr.bf16.mxu1 %v9261_v9  ;;  %6409 = vmatprep.mubr.bf16.mxu1 %v7271_v17  ;;  %v9309_v9 = vld [vmem:[%s11764_s1 + $0xcc8] sm:$0xff]   ;;  %v9317_v17 = vld [vmem:[%s11764_s1 + $0xcd8] sm:$0xff]  }
 0x15f   :  { %v9346_v60 = vld [vmem:[%s11764_s1 + $0xd88] sm:$0xff]  }
 0x160   :  { %8415 = vmatpush3.bf16.msra.mxu0 %v9260_v8  ;;  %v9308_v8 = vld [vmem:[%s11764_s1 + $0xc08] sm:$0xff]  }
 0x161   :  { %8437 = vmatpush3.bf16.msra.mxu1 %v9264_v13  ;;  %8444 = vmatprep.subr.bf16.mxu0 %v9265_v14  ;;  %v9313_v13 = vld [vmem:[%s11764_s1 + $0xcd0] sm:$0xff]  }
 0x162   :  { %8466 = vmatprep.subr.bf16.mxu1 %v9269_v19  ;;  %v9314_v14 = vld [vmem:[%s11764_s1 + $0xc90] sm:$0xff]   ;;  %v9319_v19 = vld [vmem:[%s11764_s1 + $0xc60] sm:$0xff]  }
 0x163   :  { %6370 = vmatmul.mubr.bf16.vlgmr.msra.gmra.mrb[40].mxu0 %v7268_v11  ;;  %v9311_v11 = vld [vmem:[%s11764_s1 + $0xc50] sm:$0xff]  }
 0x164   :  { %8445 = vmatpush3.bf16.msra.mxu0 %v9268_v18  ;;  %6410 = vmatmul.mubr.bf16.vlgmr.msra.gmra.mrb[40].mxu1 %v7270_v16  ;;  %v9316_v16 = vld [vmem:[%s11764_s1 + $0xc18] sm:$0xff]  }
 0x165   :  { %8467 = vmatpush3.bf16.msra.mxu1 %v9270_v20  ;;  %8446 = vmatprep.subr.bf16.mxu0 %v9271_v21  ;;  %v9318_v18 = vld [vmem:[%s11764_s1 + $0xc98] sm:$0xff]   ;;  %v9320_v21 = vld [vmem:[%s11764_s1 + $0xc20] sm:$0xff]  }
 0x166   :  { %8468 = vmatprep.subr.bf16.mxu1 %v9273_v23  ;;  %6449 = vmatprep.mubr.bf16.mxu0 %v7273_v62  ;;  %v9321_v23 = vld [vmem:[%s11764_s1 + $0xce0] sm:$0xff]   ;;  %v9348_v62 = vld [vmem:[%s11764_s1 + $0xd10] sm:$0xff]  }
 0x167   :  { %6489 = vmatprep.mubr.bf16.mxu1 %v7275_v3  ;;  %v9353_v3 = vld [vmem:[%s11764_s1 + $0xdd8] sm:$0xff]  }
 0x168   :  { %8447 = vmatpush3.bf16.msra.mxu0 %v9272_v22 }
 0x169   :  { %8469 = vmatpush3.bf16.msra.mxu1 %v9274_v24  ;;  %8448 = vmatprep.subr.bf16.mxu0 %v9275_v25 }
 0x16a   :  { %8470 = vmatprep.subr.bf16.mxu1 %v9277_v27 }
 0x16c   :  { %8449 = vmatpush3.bf16.msra.mxu0 %v9276_v26  ;;  %v9322_v26 = vld [vmem:[%s11764_s1 + $0xca0] sm:$0xff]  }
 0x16d   :  { %8471 = vmatpush3.bf16.msra.mxu1 %v9278_v28  ;;  %8450 = vmatprep.subr.bf16.mxu0 %v9279_v29  ;;  %v9323_v29 = vld [vmem:[%s11764_s1 + $0xc68] sm:$0xff]  }
 0x16e   :  { %8472 = vmatprep.subr.bf16.mxu1 %v9281_v31  ;;  %v9324_v31 = vld [vmem:[%s11764_s1 + $0xc28] sm:$0xff]  }
 0x170   :  { %8451 = vmatpush3.bf16.msra.mxu0 %v9280_v30 }
 0x171   :  { %8473 = vmatpush3.bf16.msra.mxu1 %v9282_v32  ;;  %8452 = vmatprep.subr.bf16.mxu0 %v9283_v33 }
 0x172   :  { %8474 = vmatprep.subr.bf16.mxu1 %v9285_v37 }
 0x174   :  { %8453 = vmatpush3.bf16.msra.mxu0 %v9284_v35 }
 0x175   :  { %8475 = vmatpush3.bf16.msra.mxu1 %v9286_v40  ;;  %8454 = vmatprep.subr.bf16.mxu0 %v9287_v43  ;;  %v9328_v40 = vld [vmem:[%s11764_s1 + $0xc30] sm:$0xff]   ;;  %v9331_v43 = vld [vmem:[%s11764_s1 + $0xc78] sm:$0xff]  }
 0x176   :  { %v8152_v34 = vpop.f32.mrb[16].mxu0  ;;  %8476 = vmatprep.subr.bf16.mxu1 %v9289_v48 }
 0x177   :  { %v8153_v36 = vpop.f32.mrb[17].mxu0  ;;  %v8174_v41 = vpop.f32.mrb[16].mxu1 }
 0x178   :  { %v8154_v38 = vadd.f32 %v8153_v36, %v8152_v34  ;;  %v8155_v39 = vpop.f32.mrb[18].mxu0  ;;  %v8175_v46 = vpop.f32.mrb[17].mxu1  ;;  %8455 = vmatpush3.bf16.msra.mxu0 %v9288_v45  ;;  %v9325_v34 = vld [vmem:[%s11764_s1 + $0xce8] sm:$0xff]   ;;  %v9333_v45 = vld [vmem:[%s11764_s1 + $0xcf8] sm:$0xff]  }
 0x179   :  { %v8156_v44 = vpop.f32.mrb[19].mxu0  ;;  %v8176_v47 = vadd.f32 %v8175_v46, %v8174_v41  ;;  %v8177_v49 = vpop.f32.mrb[18].mxu1  ;;  %8477 = vmatpush3.bf16.msra.mxu1 %v9290_v50  ;;  %8456 = vmatprep.subr.bf16.mxu0 %v9291_v53  ;;  %v9326_v36 = vld [vmem:[%s11764_s1 + $0xca8] sm:$0xff]   ;;  %v9327_v39 = vld [vmem:[%s11764_s1 + $0xc70] sm:$0xff]   ;;  %v52_v46 = vld [vmem:[%s11765_s0 + $0xc0] sm:$0xff] }
 0x17a   :  { %v5892_v42 = vadd.f32 %v8154_v38, %v10735_v2  ;;  %v8178_v51 = vpop.f32.mrb[19].mxu1  ;;  %8478 = vmatprep.subr.bf16.mxu1 %v9293_v55  ;;  %v7274_v2 = vcombine.low %v51_v1, %v51_v1  ;;  %v9329_v41 = vld [vmem:[%s11764_s1 + $0xcf0] sm:$0xff]   ;;  %v9332_v44 = vld [vmem:[%s11764_s1 + $0xc38] sm:$0xff]   ;;  %v7277_v48 = vcombine.high %v52_v46, %v52_v46  ;;  %v9337_v50 = vld [vmem:[%s11764_s1 + $0xd40] sm:$0xff]  }
 0x17b   :  { %v9336_v49 = vld [vmem:[%s11764_s1 + $0xcb8] sm:$0xff]   ;;  %v53_v51 = vld [vmem:[%s11765_s0 + $0xc8] sm:$0xff]  ;;  %v9341_v55 = vld [vmem:[%s11764_s1 + $0xdc0] sm:$0xff]  }
 0x17c   :  { %v10840_v52 = vadd.f32 %v8176_v47, %v5892_v42  ;;  %8457 = vmatpush3.bf16.msra.mxu0 %v9292_v54  ;;  %v9330_v42 = vld [vmem:[%s11764_s1 + $0xcb0] sm:$0xff]   ;;  %v7276_v47 = vcombine.low %v52_v46, %v52_v46  ;;  %v7279_v53 = vcombine.high %v53_v51, %v53_v51  ;;  %v9340_v54 = vld [vmem:[%s11764_s1 + $0xd00] sm:$0xff]   ;;  %v9351_v1 = vld [vmem:[%s11764_s1 + $0xd58] sm:$0xff]  }
 0x17d   :  { %8479 = vmatpush3.bf16.msra.mxu1 %v9294_v56  ;;  %8458 = vmatprep.subr.bf16.mxu0 %v9295_v57  ;;  %v9342_v56 = vld [vmem:[%s11764_s1 + $0xd80] sm:$0xff]   ;;  %v9343_v57 = vld [vmem:[%s11764_s1 + $0xd48] sm:$0xff]  }
 0x17e   :  { %8480 = vmatprep.subr.bf16.mxu1 %v9297_v59  ;;  %v9345_v59 = vld [vmem:[%s11764_s1 + $0xdc8] sm:$0xff]  }
 0x17f   :  { %v9382_v46 = vld [vmem:[%s11764_s1 + $0xe88] sm:$0xff]  }
 0x180   :  { %8459 = vmatpush3.bf16.msra.mxu0 %v9296_v58  ;;  %v9344_v58 = vld [vmem:[%s11764_s1 + $0xd08] sm:$0xff]  }
 0x181   :  { %8481 = vmatpush3.bf16.msra.mxu1 %v9300_v63  ;;  %8488 = vmatprep.subr.bf16.mxu0 %v9301_v0  ;;  %v9349_v63 = vld [vmem:[%s11764_s1 + $0xdd0] sm:$0xff]  }
 0x182   :  { %8510 = vmatprep.subr.bf16.mxu1 %v9305_v5  ;;  %v9350_v0 = vld [vmem:[%s11764_s1 + $0xd90] sm:$0xff]   ;;  %v9355_v5 = vld [vmem:[%s11764_s1 + $0xd60] sm:$0xff]  }
 0x183   :  { %6450 = vmatmul.mubr.bf16.vlgmr.msra.gmra.mrb[44].mxu0 %v7272_v61  ;;  %v9347_v61 = vld [vmem:[%s11764_s1 + $0xd50] sm:$0xff]  }
 0x184   :  { %8489 = vmatpush3.bf16.msra.mxu0 %v9304_v4  ;;  %6490 = vmatmul.mubr.bf16.vlgmr.msra.gmra.mrb[44].mxu1 %v7274_v2  ;;  %v9352_v2 = vld [vmem:[%s11764_s1 + $0xd18] sm:$0xff]  }
 0x185   :  { %8511 = vmatpush3.bf16.msra.mxu1 %v9306_v6  ;;  %8490 = vmatprep.subr.bf16.mxu0 %v9307_v7  ;;  %v9354_v4 = vld [vmem:[%s11764_s1 + $0xd98] sm:$0xff]   ;;  %v9356_v7 = vld [vmem:[%s11764_s1 + $0xd20] sm:$0xff]  }
 0x186   :  { %8512 = vmatprep.subr.bf16.mxu1 %v9309_v9  ;;  %6529 = vmatprep.mubr.bf16.mxu0 %v7277_v48  ;;  %v9357_v9 = vld [vmem:[%s11764_s1 + $0xde0] sm:$0xff]   ;;  %v9384_v48 = vld [vmem:[%s11764_s1 + $0xe10] sm:$0xff]  }
 0x187   :  { %6569 = vmatprep.mubr.bf16.mxu1 %v7279_v53  ;;  %v9389_v53 = vld [vmem:[%s11764_s1 + $0xed8] sm:$0xff]  }
 0x188   :  { %8491 = vmatpush3.bf16.msra.mxu0 %v9308_v8 }
 0x189   :  { %8513 = vmatpush3.bf16.msra.mxu1 %v9310_v10  ;;  %8492 = vmatprep.subr.bf16.mxu0 %v9311_v11 }
 0x18a   :  { %8514 = vmatprep.subr.bf16.mxu1 %v9313_v13 }
 0x18c   :  { %8493 = vmatpush3.bf16.msra.mxu0 %v9312_v12  ;;  %v9358_v12 = vld [vmem:[%s11764_s1 + $0xda0] sm:$0xff]  }
 0x18d   :  { %8515 = vmatpush3.bf16.msra.mxu1 %v9314_v14  ;;  %8494 = vmatprep.subr.bf16.mxu0 %v9315_v15  ;;  %v9359_v15 = vld [vmem:[%s11764_s1 + $0xd68] sm:$0xff]  }
 0x18e   :  { %8516 = vmatprep.subr.bf16.mxu1 %v9317_v17  ;;  %v9360_v17 = vld [vmem:[%s11764_s1 + $0xd28] sm:$0xff]  }
 0x190   :  { %8495 = vmatpush3.bf16.msra.mxu0 %v9316_v16 }
 0x191   :  { %8517 = vmatpush3.bf16.msra.mxu1 %v9318_v18  ;;  %8496 = vmatprep.subr.bf16.mxu0 %v9319_v19 }
 0x192   :  { %8518 = vmatprep.subr.bf16.mxu1 %v9321_v23 }
 0x194   :  { %8497 = vmatpush3.bf16.msra.mxu0 %v9320_v21 }
 0x195   :  { %8519 = vmatpush3.bf16.msra.mxu1 %v9322_v26  ;;  %8498 = vmatprep.subr.bf16.mxu0 %v9323_v29  ;;  %v9364_v26 = vld [vmem:[%s11764_s1 + $0xd30] sm:$0xff]   ;;  %v9367_v29 = vld [vmem:[%s11764_s1 + $0xd78] sm:$0xff]  }
 0x196   :  { %v8196_v20 = vpop.f32.mrb[20].mxu0  ;;  %8520 = vmatprep.subr.bf16.mxu1 %v9325_v34 }
 0x197   :  { %v8197_v22 = vpop.f32.mrb[21].mxu0  ;;  %v8218_v27 = vpop.f32.mrb[20].mxu1 }
 0x198   :  { %v8198_v24 = vadd.f32 %v8197_v22, %v8196_v20  ;;  %v8199_v25 = vpop.f32.mrb[22].mxu0  ;;  %v8219_v32 = vpop.f32.mrb[21].mxu1  ;;  %8499 = vmatpush3.bf16.msra.mxu0 %v9324_v31  ;;  %v9361_v20 = vld [vmem:[%s11764_s1 + $0xde8] sm:$0xff]   ;;  %v9369_v31 = vld [vmem:[%s11764_s1 + $0xdf8] sm:$0xff]  }
 0x199   :  { %v8200_v30 = vpop.f32.mrb[23].mxu0  ;;  %v8220_v33 = vadd.f32 %v8219_v32, %v8218_v27  ;;  %v8221_v35 = vpop.f32.mrb[22].mxu1  ;;  %8521 = vmatpush3.bf16.msra.mxu1 %v9326_v36  ;;  %8500 = vmatprep.subr.bf16.mxu0 %v9327_v39  ;;  %v9362_v22 = vld [vmem:[%s11764_s1 + $0xda8] sm:$0xff]   ;;  %v9363_v25 = vld [vmem:[%s11764_s1 + $0xd70] sm:$0xff]   ;;  %v9373_v36 = vld [vmem:[%s11764_s1 + $0xe40] sm:$0xff]  }
 0x19a   :  { %v5972_v28 = vadd.f32 %v8198_v24, %v10840_v52  ;;  %v8222_v37 = vpop.f32.mrb[23].mxu1  ;;  %8522 = vmatprep.subr.bf16.mxu1 %v9329_v41  ;;  %v7278_v52 = vcombine.low %v53_v51, %v53_v51  ;;  %v9365_v27 = vld [vmem:[%s11764_s1 + $0xdf0] sm:$0xff]   ;;  %v9368_v30 = vld [vmem:[%s11764_s1 + $0xd38] sm:$0xff]   ;;  %v9377_v41 = vld [vmem:[%s11764_s1 + $0xec0] sm:$0xff]  }
 0x19b   :  { %v54_v32 = vld [vmem:[%s11765_s0 + $0xd0] sm:$0xff]  ;;  %v9372_v35 = vld [vmem:[%s11764_s1 + $0xdb8] sm:$0xff]  }
 0x19c   :  { %v10945_v38 = vadd.f32 %v8220_v33, %v5972_v28  ;;  %8501 = vmatpush3.bf16.msra.mxu0 %v9328_v40  ;;  %v9366_v28 = vld [vmem:[%s11764_s1 + $0xdb0] sm:$0xff]   ;;  %v7280_v33 = vcombine.low %v54_v32, %v54_v32  ;;  %v7281_v34 = vcombine.high %v54_v32, %v54_v32  ;;  %v55_v37 = vld [vmem:[%s11765_s0 + $0xd8] sm:$0xff]  ;;  %v9376_v40 = vld [vmem:[%s11764_s1 + $0xe00] sm:$0xff]  }
 0x19d   :  { %8523 = vmatpush3.bf16.msra.mxu1 %v9330_v42  ;;  %8502 = vmatprep.subr.bf16.mxu0 %v9331_v43  ;;  %v7283_v39 = vcombine.high %v55_v37, %v55_v37  ;;  %v9378_v42 = vld [vmem:[%s11764_s1 + $0xe80] sm:$0xff]   ;;  %v9379_v43 = vld [vmem:[%s11764_s1 + $0xe48] sm:$0xff]   ;;  %v9387_v51 = vld [vmem:[%s11764_s1 + $0xe58] sm:$0xff]  }
 0x19e   :  { %8524 = vmatprep.subr.bf16.mxu1 %v9333_v45  ;;  %v9381_v45 = vld [vmem:[%s11764_s1 + $0xec8] sm:$0xff]  }
 0x19f   :  { %v9418_v32 = vld [vmem:[%s11764_s1 + $0xf88] sm:$0xff]  }
 0x1a0   :  { %8503 = vmatpush3.bf16.msra.mxu0 %v9332_v44  ;;  %v9380_v44 = vld [vmem:[%s11764_s1 + $0xe08] sm:$0xff]  }
 0x1a1   :  { %8525 = vmatpush3.bf16.msra.mxu1 %v9336_v49  ;;  %8532 = vmatprep.subr.bf16.mxu0 %v9337_v50  ;;  %v9385_v49 = vld [vmem:[%s11764_s1 + $0xed0] sm:$0xff]  }
 0x1a2   :  { %8554 = vmatprep.subr.bf16.mxu1 %v9341_v55  ;;  %v9386_v50 = vld [vmem:[%s11764_s1 + $0xe90] sm:$0xff]   ;;  %v9391_v55 = vld [vmem:[%s11764_s1 + $0xe60] sm:$0xff]  }
 0x1a3   :  { %6530 = vmatmul.mubr.bf16.vlgmr.msra.gmra.mrb[48].mxu0 %v7276_v47  ;;  %v9383_v47 = vld [vmem:[%s11764_s1 + $0xe50] sm:$0xff]  }
 0x1a4   :  { %8533 = vmatpush3.bf16.msra.mxu0 %v9340_v54  ;;  %6570 = vmatmul.mubr.bf16.vlgmr.msra.gmra.mrb[48].mxu1 %v7278_v52  ;;  %v9388_v52 = vld [vmem:[%s11764_s1 + $0xe18] sm:$0xff]  }
 0x1a5   :  { %8555 = vmatpush3.bf16.msra.mxu1 %v9342_v56  ;;  %8534 = vmatprep.subr.bf16.mxu0 %v9343_v57  ;;  %v9390_v54 = vld [vmem:[%s11764_s1 + $0xe98] sm:$0xff]   ;;  %v9392_v56 = vld [vmem:[%s11764_s1 + $0xe20] sm:$0xff]  }
 0x1a6   :  { %8556 = vmatprep.subr.bf16.mxu1 %v9345_v59  ;;  %6609 = vmatprep.mubr.bf16.mxu0 %v7281_v34  ;;  %v9420_v34 = vld [vmem:[%s11764_s1 + $0xf10] sm:$0xff]  }
 0x1a7   :  { %6649 = vmatprep.mubr.bf16.mxu1 %v7283_v39  ;;  %v9425_v39 = vld [vmem:[%s11764_s1 + $0xfd8] sm:$0xff]  }
 0x1a8   :  { %8535 = vmatpush3.bf16.msra.mxu0 %v9344_v58  ;;  %v9393_v58 = vld [vmem:[%s11764_s1 + $0xee0] sm:$0xff]  }
 0x1a9   :  { %8557 = vmatpush3.bf16.msra.mxu1 %v9346_v60  ;;  %8536 = vmatprep.subr.bf16.mxu0 %v9347_v61  ;;  %v9394_v60 = vld [vmem:[%s11764_s1 + $0xea0] sm:$0xff]  }
 0x1aa   :  { %8558 = vmatprep.subr.bf16.mxu1 %v9349_v63  ;;  %v9395_v63 = vld [vmem:[%s11764_s1 + $0xe68] sm:$0xff]  }
 0x1ac   :  { %8537 = vmatpush3.bf16.msra.mxu0 %v9348_v62 }
 0x1ad   :  { %8559 = vmatpush3.bf16.msra.mxu1 %v9350_v0  ;;  %8538 = vmatprep.subr.bf16.mxu0 %v9351_v1 }
 0x1ae   :  { %8560 = vmatprep.subr.bf16.mxu1 %v9353_v3 }
 0x1b0   :  { %8539 = vmatpush3.bf16.msra.mxu0 %v9352_v2  ;;  %v9396_v2 = vld [vmem:[%s11764_s1 + $0xe28] sm:$0xff]  }
 0x1b1   :  { %8561 = vmatpush3.bf16.msra.mxu1 %v9354_v4  ;;  %8540 = vmatprep.subr.bf16.mxu0 %v9355_v5  ;;  %v9397_v5 = vld [vmem:[%s11764_s1 + $0xee8] sm:$0xff]  }
 0x1b2   :  { %8562 = vmatprep.subr.bf16.mxu1 %v9357_v9  ;;  %v9399_v9 = vld [vmem:[%s11764_s1 + $0xe70] sm:$0xff]  }
 0x1b4   :  { %8541 = vmatpush3.bf16.msra.mxu0 %v9356_v7  ;;  %v9398_v7 = vld [vmem:[%s11764_s1 + $0xea8] sm:$0xff]  }
 0x1b5   :  { %8563 = vmatpush3.bf16.msra.mxu1 %v9358_v12  ;;  %8542 = vmatprep.subr.bf16.mxu0 %v9359_v15  ;;  %v9400_v12 = vld [vmem:[%s11764_s1 + $0xe30] sm:$0xff]   ;;  %v9403_v15 = vld [vmem:[%s11764_s1 + $0xe78] sm:$0xff]  }
 0x1b6   :  { %v8240_v6 = vpop.f32.mrb[24].mxu0  ;;  %8564 = vmatprep.subr.bf16.mxu1 %v9361_v20 }
 0x1b7   :  { %v8241_v8 = vpop.f32.mrb[25].mxu0  ;;  %v8262_v13 = vpop.f32.mrb[24].mxu1 }
 0x1b8   :  { %v8242_v10 = vadd.f32 %v8241_v8, %v8240_v6  ;;  %v8243_v11 = vpop.f32.mrb[26].mxu0  ;;  %v8263_v18 = vpop.f32.mrb[25].mxu1  ;;  %8543 = vmatpush3.bf16.msra.mxu0 %v9360_v17  ;;  %v9405_v17 = vld [vmem:[%s11764_s1 + $0xef8] sm:$0xff]  }
 0x1b9   :  { %v8244_v16 = vpop.f32.mrb[27].mxu0  ;;  %v8264_v19 = vadd.f32 %v8263_v18, %v8262_v13  ;;  %v8265_v21 = vpop.f32.mrb[26].mxu1  ;;  %8565 = vmatpush3.bf16.msra.mxu1 %v9362_v22  ;;  %8544 = vmatprep.subr.bf16.mxu0 %v9363_v25  ;;  %v9401_v13 = vld [vmem:[%s11764_s1 + $0xef0] sm:$0xff]   ;;  %v56_v18 = vld [vmem:[%s11765_s0 + $0xe0] sm:$0xff] }
 0x1ba   :  { %v6052_v14 = vadd.f32 %v8242_v10, %v10945_v38  ;;  %v8266_v23 = vpop.f32.mrb[27].mxu1  ;;  %8566 = vmatprep.subr.bf16.mxu1 %v9365_v27  ;;  %v7282_v38 = vcombine.low %v55_v37, %v55_v37  ;;  %v9404_v16 = vld [vmem:[%s11764_s1 + $0xe38] sm:$0xff]   ;;  %v7285_v20 = vcombine.high %v56_v18, %v56_v18  ;;  %v9409_v22 = vld [vmem:[%s11764_s1 + $0xf40] sm:$0xff]  }
 0x1bb   :  { %v9408_v21 = vld [vmem:[%s11764_s1 + $0xeb8] sm:$0xff]   ;;  %v57_v23 = vld [vmem:[%s11765_s0 + $0xe8] sm:$0xff]  ;;  %v9413_v27 = vld [vmem:[%s11764_s1 + $0xfc0] sm:$0xff]  }
 0x1bc   :  { %v11050_v24 = vadd.f32 %v8264_v19, %v6052_v14  ;;  %8545 = vmatpush3.bf16.msra.mxu0 %v9364_v26  ;;  %v9402_v14 = vld [vmem:[%s11764_s1 + $0xeb0] sm:$0xff]   ;;  %v7284_v19 = vcombine.low %v56_v18, %v56_v18  ;;  %v7287_v25 = vcombine.high %v57_v23, %v57_v23  ;;  %v9412_v26 = vld [vmem:[%s11764_s1 + $0xf00] sm:$0xff]   ;;  %v9423_v37 = vld [vmem:[%s11764_s1 + $0xf58] sm:$0xff]  }
 0x1bd   :  { %8567 = vmatpush3.bf16.msra.mxu1 %v9366_v28  ;;  %8546 = vmatprep.subr.bf16.mxu0 %v9367_v29  ;;  %v9414_v28 = vld [vmem:[%s11764_s1 + $0xf80] sm:$0xff]   ;;  %v9415_v29 = vld [vmem:[%s11764_s1 + $0xf48] sm:$0xff]  }
 0x1be   :  { %8568 = vmatprep.subr.bf16.mxu1 %v9369_v31  ;;  %v9417_v31 = vld [vmem:[%s11764_s1 + $0xfc8] sm:$0xff]  }
 0x1bf   :  { %v9454_v18 = vld [vmem:[%s11764_s1 + $0x1088] sm:$0xff]  }
 0x1c0   :  { %8547 = vmatpush3.bf16.msra.mxu0 %v9368_v30  ;;  %v9416_v30 = vld [vmem:[%s11764_s1 + $0xf08] sm:$0xff]  }
 0x1c1   :  { %8569 = vmatpush3.bf16.msra.mxu1 %v9372_v35  ;;  %8576 = vmatprep.subr.bf16.mxu0 %v9373_v36  ;;  %v9421_v35 = vld [vmem:[%s11764_s1 + $0xfd0] sm:$0xff]  }
 0x1c2   :  { %8598 = vmatprep.subr.bf16.mxu1 %v9377_v41  ;;  %v9422_v36 = vld [vmem:[%s11764_s1 + $0xf90] sm:$0xff]   ;;  %v9427_v41 = vld [vmem:[%s11764_s1 + $0xf60] sm:$0xff]  }
 0x1c3   :  { %6610 = vmatmul.mubr.bf16.vlgmr.msra.gmra.mrb[52].mxu0 %v7280_v33  ;;  %v9419_v33 = vld [vmem:[%s11764_s1 + $0xf50] sm:$0xff]  }
 0x1c4   :  { %8577 = vmatpush3.bf16.msra.mxu0 %v9376_v40  ;;  %6650 = vmatmul.mubr.bf16.vlgmr.msra.gmra.mrb[52].mxu1 %v7282_v38  ;;  %v9424_v38 = vld [vmem:[%s11764_s1 + $0xf18] sm:$0xff]  }
 0x1c5   :  { %8599 = vmatpush3.bf16.msra.mxu1 %v9378_v42  ;;  %8578 = vmatprep.subr.bf16.mxu0 %v9379_v43  ;;  %v9426_v40 = vld [vmem:[%s11764_s1 + $0xf98] sm:$0xff]   ;;  %v9428_v42 = vld [vmem:[%s11764_s1 + $0xf20] sm:$0xff]  }
 0x1c6   :  { %8600 = vmatprep.subr.bf16.mxu1 %v9381_v45  ;;  %6689 = vmatprep.mubr.bf16.mxu0 %v7285_v20  ;;  %v9456_v20 = vld [vmem:[%s11764_s1 + $0x1010] sm:$0xff]  }
 0x1c7   :  { %6729 = vmatprep.mubr.bf16.mxu1 %v7287_v25  ;;  %v9461_v25 = vld [vmem:[%s11764_s1 + $0x10d8] sm:$0xff]  }
 0x1c8   :  { %8579 = vmatpush3.bf16.msra.mxu0 %v9380_v44  ;;  %v9429_v44 = vld [vmem:[%s11764_s1 + $0xfe0] sm:$0xff]  }
 0x1c9   :  { %8601 = vmatpush3.bf16.msra.mxu1 %v9382_v46  ;;  %8580 = vmatprep.subr.bf16.mxu0 %v9383_v47  ;;  %v9430_v46 = vld [vmem:[%s11764_s1 + $0xfa0] sm:$0xff]  }
 0x1ca   :  { %8602 = vmatprep.subr.bf16.mxu1 %v9385_v49  ;;  %v9431_v49 = vld [vmem:[%s11764_s1 + $0xf68] sm:$0xff]  }
 0x1cc   :  { %8581 = vmatpush3.bf16.msra.mxu0 %v9384_v48 }
 0x1cd   :  { %8603 = vmatpush3.bf16.msra.mxu1 %v9386_v50  ;;  %8582 = vmatprep.subr.bf16.mxu0 %v9387_v51 }
 0x1ce   :  { %8604 = vmatprep.subr.bf16.mxu1 %v9389_v53 }
 0x1d0   :  { %8583 = vmatpush3.bf16.msra.mxu0 %v9388_v52  ;;  %v9432_v52 = vld [vmem:[%s11764_s1 + $0xf28] sm:$0xff]  }
 0x1d1   :  { %8605 = vmatpush3.bf16.msra.mxu1 %v9390_v54  ;;  %8584 = vmatprep.subr.bf16.mxu0 %v9391_v55  ;;  %v9433_v55 = vld [vmem:[%s11764_s1 + $0xfe8] sm:$0xff]  }
 0x1d2   :  { %8606 = vmatprep.subr.bf16.mxu1 %v9393_v58 }
 0x1d4   :  { %8585 = vmatpush3.bf16.msra.mxu0 %v9392_v56 }
 0x1d5   :  { %8607 = vmatpush3.bf16.msra.mxu1 %v9394_v60  ;;  %8586 = vmatprep.subr.bf16.mxu0 %v9395_v63  ;;  %v9435_v60 = vld [vmem:[%s11764_s1 + $0xf70] sm:$0xff]  }
 0x1d6   :  { %v8284_v57 = vpop.f32.mrb[28].mxu0  ;;  %8608 = vmatprep.subr.bf16.mxu1 %v9397_v5  ;;  %v9437_v63 = vld [vmem:[%s11764_s1 + $0xff0] sm:$0xff]  }
 0x1d7   :  { %v8285_v59 = vpop.f32.mrb[29].mxu0  ;;  %v8306_v0 = vpop.f32.mrb[28].mxu1 }
 0x1d8   :  { %v8286_v61 = vadd.f32 %v8285_v59, %v8284_v57  ;;  %v8287_v62 = vpop.f32.mrb[30].mxu0  ;;  %v8307_v4 = vpop.f32.mrb[29].mxu1  ;;  %8587 = vmatpush3.bf16.msra.mxu0 %v9396_v2  ;;  %v9434_v57 = vld [vmem:[%s11764_s1 + $0xfa8] sm:$0xff]   ;;  %v9440_v2 = vld [vmem:[%s11764_s1 + $0xf38] sm:$0xff]  }
 0x1d9   :  { %v8288_v3 = vpop.f32.mrb[31].mxu0  ;;  %v8308_v6 = vadd.f32 %v8307_v4, %v8306_v0  ;;  %v8309_v8 = vpop.f32.mrb[30].mxu1  ;;  %8609 = vmatpush3.bf16.msra.mxu1 %v9398_v7  ;;  %8588 = vmatprep.subr.bf16.mxu0 %v9399_v9  ;;  %v9436_v62 = vld [vmem:[%s11764_s1 + $0xf30] sm:$0xff]   ;;  %v9444_v7 = vld [vmem:[%s11764_s1 + $0xfb8] sm:$0xff]  }
 0x1da   :  { %v6132_v1 = vadd.f32 %v8286_v61, %v11050_v24  ;;  %v8310_v10 = vpop.f32.mrb[31].mxu1  ;;  %8610 = vmatprep.subr.bf16.mxu1 %v9401_v13  ;;  %v7286_v24 = vcombine.low %v57_v23, %v57_v23  ;;  %v9438_v0 = vld [vmem:[%s11764_s1 + $0xfb0] sm:$0xff]   ;;  %v9441_v3 = vld [vmem:[%s11764_s1 + $0xff8] sm:$0xff]   ;;  %v9445_v8 = vld [vmem:[%s11764_s1 + $0x1040] sm:$0xff]  }
 0x1db   :  { %v58_v4 = vld [vmem:[%s11765_s0 + $0xf0] sm:$0xff]  ;;  %v59_v9 = vld [vmem:[%s11765_s0 + $0xf8] sm:$0xff]  ;;  %v9449_v13 = vld [vmem:[%s11764_s1 + $0x10c0] sm:$0xff]  }
 0x1dc   :  { %v11158_v11 = vadd.f32 %v8308_v6, %v6132_v1  ;;  %8589 = vmatpush3.bf16.msra.mxu0 %v9400_v12  ;;  %v9439_v1 = vld [vmem:[%s11764_s1 + $0xf78] sm:$0xff]   ;;  %v7288_v5 = vcombine.low %v58_v4, %v58_v4  ;;  %v7289_v6 = vcombine.high %v58_v4, %v58_v4  ;;  %v7290_v10 = vcombine.low %v59_v9, %v59_v9  ;;  %v9448_v12 = vld [vmem:[%s11764_s1 + $0x1000] sm:$0xff]   ;;  %v9490_v4 = vld [vmem:[%s11764_s1 + $0x1188] sm:$0xff]  }
 0x1dd   :  { %8611 = vmatpush3.bf16.msra.mxu1 %v9402_v14  ;;  %8590 = vmatprep.subr.bf16.mxu0 %v9403_v15  ;;  %v9450_v14 = vld [vmem:[%s11764_s1 + $0x1080] sm:$0xff]   ;;  %v9451_v15 = vld [vmem:[%s11764_s1 + $0x1048] sm:$0xff]   ;;  %v9459_v23 = vld [vmem:[%s11764_s1 + $0x1058] sm:$0xff]  }
 0x1de   :  { %8612 = vmatprep.subr.bf16.mxu1 %v9405_v17  ;;  %v9453_v17 = vld [vmem:[%s11764_s1 + $0x10c8] sm:$0xff]  }
 0x1e0   :  { %8591 = vmatpush3.bf16.msra.mxu0 %v9404_v16  ;;  %v9452_v16 = vld [vmem:[%s11764_s1 + $0x1008] sm:$0xff]  }
 0x1e1   :  { %8613 = vmatpush3.bf16.msra.mxu1 %v9408_v21  ;;  %8620 = vmatprep.subr.bf16.mxu0 %v9409_v22  ;;  %v9457_v21 = vld [vmem:[%s11764_s1 + $0x10d0] sm:$0xff]  }
 0x1e2   :  { %8642 = vmatprep.subr.bf16.mxu1 %v9413_v27  ;;  %v9458_v22 = vld [vmem:[%s11764_s1 + $0x1090] sm:$0xff]   ;;  %v9463_v27 = vld [vmem:[%s11764_s1 + $0x1060] sm:$0xff]  }
 0x1e3   :  { %6690 = vmatmul.mubr.bf16.vlgmr.msra.gmra.mrb[56].mxu0 %v7284_v19  ;;  %v9455_v19 = vld [vmem:[%s11764_s1 + $0x1050] sm:$0xff]  }
 0x1e4   :  { %8621 = vmatpush3.bf16.msra.mxu0 %v9412_v26  ;;  %6730 = vmatmul.mubr.bf16.vlgmr.msra.gmra.mrb[56].mxu1 %v7286_v24  ;;  %v9460_v24 = vld [vmem:[%s11764_s1 + $0x1018] sm:$0xff]  }
 0x1e5   :  { %8643 = vmatpush3.bf16.msra.mxu1 %v9414_v28  ;;  %8622 = vmatprep.subr.bf16.mxu0 %v9415_v29  ;;  %v9462_v26 = vld [vmem:[%s11764_s1 + $0x1098] sm:$0xff]   ;;  %v9464_v29 = vld [vmem:[%s11764_s1 + $0x1020] sm:$0xff]  }
 0x1e6   :  { %8644 = vmatprep.subr.bf16.mxu1 %v9417_v31  ;;  %6769 = vmatprep.mubr.bf16.mxu0 %v7289_v6  ;;  %v9465_v31 = vld [vmem:[%s11764_s1 + $0x10e0] sm:$0xff]   ;;  %v9492_v6 = vld [vmem:[%s11764_s1 + $0x1110] sm:$0xff]  }
 0x1e8   :  { %8623 = vmatpush3.bf16.msra.mxu0 %v9416_v30 }
 0x1e9   :  { %8645 = vmatpush3.bf16.msra.mxu1 %v9418_v32  ;;  %8624 = vmatprep.subr.bf16.mxu0 %v9419_v33 }
 0x1ea   :  { %8646 = vmatprep.subr.bf16.mxu1 %v9421_v35 }
 0x1ec   :  { %8625 = vmatpush3.bf16.msra.mxu0 %v9420_v34  ;;  %v9466_v34 = vld [vmem:[%s11764_s1 + $0x10a0] sm:$0xff]  }
 0x1ed   :  { %8647 = vmatpush3.bf16.msra.mxu1 %v9422_v36  ;;  %8626 = vmatprep.subr.bf16.mxu0 %v9423_v37  ;;  %v9467_v37 = vld [vmem:[%s11764_s1 + $0x1068] sm:$0xff]  }
 0x1ee   :  { %8648 = vmatprep.subr.bf16.mxu1 %v9425_v39  ;;  %v9468_v39 = vld [vmem:[%s11764_s1 + $0x1028] sm:$0xff]  }
 0x1f0   :  { %8627 = vmatpush3.bf16.msra.mxu0 %v9424_v38 }
 0x1f1   :  { %8649 = vmatpush3.bf16.msra.mxu1 %v9426_v40  ;;  %8628 = vmatprep.subr.bf16.mxu0 %v9427_v41 }
 0x1f2   :  { %8650 = vmatprep.subr.bf16.mxu1 %v9429_v44  ;;  %v9470_v44 = vld [vmem:[%s11764_s1 + $0x10a8] sm:$0xff]  }
 0x1f4   :  { %8629 = vmatpush3.bf16.msra.mxu0 %v9428_v42  ;;  %v9469_v42 = vld [vmem:[%s11764_s1 + $0x10e8] sm:$0xff]  }
 0x1f5   :  { %8651 = vmatpush3.bf16.msra.mxu1 %v9430_v46  ;;  %8630 = vmatprep.subr.bf16.mxu0 %v9431_v49  ;;  %v9473_v49 = vld [vmem:[%s11764_s1 + $0x10f0] sm:$0xff]  }
 0x1f6   :  { %v8328_v43 = vpop.f32.mrb[32].mxu0  ;;  %8652 = vmatprep.subr.bf16.mxu1 %v9433_v55 }
 0x1f7   :  { %v8329_v45 = vpop.f32.mrb[33].mxu0  ;;  %v8350_v50 = vpop.f32.mrb[32].mxu1 }
 0x1f8   :  { %v8330_v47 = vadd.f32 %v8329_v45, %v8328_v43  ;;  %v8331_v48 = vpop.f32.mrb[34].mxu0  ;;  %v8351_v54 = vpop.f32.mrb[33].mxu1  ;;  %8631 = vmatpush3.bf16.msra.mxu0 %v9432_v52  ;;  %v9476_v52 = vld [vmem:[%s11764_s1 + $0x1038] sm:$0xff]  }
 0x1f9   :  { %v8332_v53 = vpop.f32.mrb[35].mxu0  ;;  %v8352_v56 = vadd.f32 %v8351_v54, %v8350_v50  ;;  %v8353_v58 = vpop.f32.mrb[34].mxu1  ;;  %8653 = vmatpush3.bf16.msra.mxu1 %v9434_v57  ;;  %8632 = vmatprep.subr.bf16.mxu0 %v9435_v60  ;;  %v9472_v48 = vld [vmem:[%s11764_s1 + $0x1030] sm:$0xff]   ;;  %v60_v54 = vld [vmem:[%s11765_s0 + $0x100] sm:$0xff]  ;;  %v9480_v57 = vld [vmem:[%s11764_s1 + $0x10b8] sm:$0xff]  }
 0x1fa   :  { %v6212_v51 = vadd.f32 %v8330_v47, %v11158_v11  ;;  %v8354_v61 = vpop.f32.mrb[35].mxu1  ;;  %8654 = vmatprep.subr.bf16.mxu1 %v9437_v63  ;;  %v7291_v11 = vcombine.high %v59_v9, %v59_v9  ;;  %v9471_v47 = vld [vmem:[%s11764_s1 + $0x1070] sm:$0xff]   ;;  %v9477_v53 = vld [vmem:[%s11764_s1 + $0x10f8] sm:$0xff]   ;;  %v7292_v55 = vcombine.low %v60_v54, %v60_v54  ;;  %v9481_v58 = vld [vmem:[%s11764_s1 + $0x1140] sm:$0xff]  }
 0x1fb   :  { %v9474_v50 = vld [vmem:[%s11764_s1 + $0x10b0] sm:$0xff]   ;;  %v9485_v63 = vld [vmem:[%s11764_s1 + $0x11c0] sm:$0xff]   ;;  %v9495_v9 = vld [vmem:[%s11764_s1 + $0x1158] sm:$0xff]  }
 0x1fc   :  { %v11260_v59 = vadd.f32 %v8352_v56, %v6212_v51  ;;  %8633 = vmatpush3.bf16.msra.mxu0 %v9436_v62  ;;  %6809 = vmatprep.mubr.bf16.mxu1 %v7291_v11  ;;  %v9475_v51 = vld [vmem:[%s11764_s1 + $0x1078] sm:$0xff]   ;;  %v7293_v56 = vcombine.high %v60_v54, %v60_v54  ;;  %v9484_v62 = vld [vmem:[%s11764_s1 + $0x1100] sm:$0xff]   ;;  %v9526_v54 = vld [vmem:[%s11764_s1 + $0x1288] sm:$0xff]  }
 0x1fd   :  { %8655 = vmatpush3.bf16.msra.mxu1 %v9438_v0  ;;  %8634 = vmatprep.subr.bf16.mxu0 %v9439_v1  ;;  %v9486_v0 = vld [vmem:[%s11764_s1 + $0x1180] sm:$0xff]   ;;  %v9487_v1 = vld [vmem:[%s11764_s1 + $0x1148] sm:$0xff]   ;;  %v9497_v11 = vld [vmem:[%s11764_s1 + $0x11d8] sm:$0xff]  }
 0x1fe   :  { %8656 = vmatprep.subr.bf16.mxu1 %v9441_v3  ;;  %v9489_v3 = vld [vmem:[%s11764_s1 + $0x11c8] sm:$0xff]  }
 0x200   :  { %8635 = vmatpush3.bf16.msra.mxu0 %v9440_v2  ;;  %v9488_v2 = vld [vmem:[%s11764_s1 + $0x1108] sm:$0xff]  }
 0x201   :  { %8657 = vmatpush3.bf16.msra.mxu1 %v9444_v7  ;;  %8664 = vmatprep.subr.bf16.mxu0 %v9445_v8  ;;  %v9493_v7 = vld [vmem:[%s11764_s1 + $0x11d0] sm:$0xff]  }
 0x202   :  { %8686 = vmatprep.subr.bf16.mxu1 %v9449_v13  ;;  %v9494_v8 = vld [vmem:[%s11764_s1 + $0x1190] sm:$0xff]   ;;  %v9499_v13 = vld [vmem:[%s11764_s1 + $0x1160] sm:$0xff]  }
 0x203   :  { %6770 = vmatmul.mubr.bf16.vlgmr.msra.gmra.mrb[60].mxu0 %v7288_v5  ;;  %v9491_v5 = vld [vmem:[%s11764_s1 + $0x1150] sm:$0xff]  }
 0x204   :  { %8665 = vmatpush3.bf16.msra.mxu0 %v9448_v12  ;;  %6810 = vmatmul.mubr.bf16.vlgmr.msra.gmra.mrb[60].mxu1 %v7290_v10  ;;  %v9496_v10 = vld [vmem:[%s11764_s1 + $0x1118] sm:$0xff]  }
 0x205   :  { %8687 = vmatpush3.bf16.msra.mxu1 %v9450_v14  ;;  %8666 = vmatprep.subr.bf16.mxu0 %v9451_v15  ;;  %v9498_v12 = vld [vmem:[%s11764_s1 + $0x1198] sm:$0xff]   ;;  %v9500_v14 = vld [vmem:[%s11764_s1 + $0x1120] sm:$0xff]  }
 0x206   :  { %8688 = vmatprep.subr.bf16.mxu1 %v9453_v17  ;;  %6849 = vmatprep.mubr.bf16.mxu0 %v7293_v56  ;;  %v9528_v56 = vld [vmem:[%s11764_s1 + $0x1210] sm:$0xff]  }
 0x208   :  { %8667 = vmatpush3.bf16.msra.mxu0 %v9452_v16  ;;  %v9501_v16 = vld [vmem:[%s11764_s1 + $0x11e0] sm:$0xff]  }
 0x209   :  { %8689 = vmatpush3.bf16.msra.mxu1 %v9454_v18  ;;  %8668 = vmatprep.subr.bf16.mxu0 %v9455_v19  ;;  %v9502_v18 = vld [vmem:[%s11764_s1 + $0x11a0] sm:$0xff]  }
 0x20a   :  { %8690 = vmatprep.subr.bf16.mxu1 %v9457_v21  ;;  %v9503_v21 = vld [vmem:[%s11764_s1 + $0x1168] sm:$0xff]  }
 0x20c   :  { %8669 = vmatpush3.bf16.msra.mxu0 %v9456_v20 }
 0x20d   :  { %8691 = vmatpush3.bf16.msra.mxu1 %v9458_v22  ;;  %8670 = vmatprep.subr.bf16.mxu0 %v9459_v23 }
 0x20e   :  { %8692 = vmatprep.subr.bf16.mxu1 %v9461_v25 }
 0x210   :  { %8671 = vmatpush3.bf16.msra.mxu0 %v9460_v24  ;;  %v9504_v24 = vld [vmem:[%s11764_s1 + $0x1128] sm:$0xff]  }
 0x211   :  { %8693 = vmatpush3.bf16.msra.mxu1 %v9462_v26  ;;  %8672 = vmatprep.subr.bf16.mxu0 %v9463_v27  ;;  %v9505_v27 = vld [vmem:[%s11764_s1 + $0x11e8] sm:$0xff]  }
 0x212   :  { %8694 = vmatprep.subr.bf16.mxu1 %v9465_v31  ;;  %v9507_v31 = vld [vmem:[%s11764_s1 + $0x1170] sm:$0xff]  }
 0x214   :  { %8673 = vmatpush3.bf16.msra.mxu0 %v9464_v29  ;;  %v9506_v29 = vld [vmem:[%s11764_s1 + $0x11a8] sm:$0xff]  }
 0x215   :  { %8695 = vmatpush3.bf16.msra.mxu1 %v9466_v34  ;;  %8674 = vmatprep.subr.bf16.mxu0 %v9467_v37  ;;  %v9508_v34 = vld [vmem:[%s11764_s1 + $0x1130] sm:$0xff]   ;;  %v9511_v37 = vld [vmem:[%s11764_s1 + $0x1178] sm:$0xff]  }
 0x216   :  { %v8372_v28 = vpop.f32.mrb[36].mxu0  ;;  %8696 = vmatprep.subr.bf16.mxu1 %v9469_v42 }
 0x217   :  { %v8373_v30 = vpop.f32.mrb[37].mxu0  ;;  %v8394_v35 = vpop.f32.mrb[36].mxu1 }
 0x218   :  { %v8374_v32 = vadd.f32 %v8373_v30, %v8372_v28  ;;  %v8375_v33 = vpop.f32.mrb[38].mxu0  ;;  %v8395_v40 = vpop.f32.mrb[37].mxu1  ;;  %8675 = vmatpush3.bf16.msra.mxu0 %v9468_v39  ;;  %v9513_v39 = vld [vmem:[%s11764_s1 + $0x11f8] sm:$0xff]  }
 0x219   :  { %v8376_v38 = vpop.f32.mrb[39].mxu0  ;;  %v8396_v41 = vadd.f32 %v8395_v40, %v8394_v35  ;;  %v8397_v43 = vpop.f32.mrb[38].mxu1  ;;  %8697 = vmatpush3.bf16.msra.mxu1 %v9470_v44  ;;  %8676 = vmatprep.subr.bf16.mxu0 %v9471_v47  ;;  %v9509_v35 = vld [vmem:[%s11764_s1 + $0x11f0] sm:$0xff]   ;;  %v9517_v44 = vld [vmem:[%s11764_s1 + $0x1240] sm:$0xff]  }
 0x21a   :  { %v6292_v36 = vadd.f32 %v8374_v32, %v11260_v59  ;;  %v8398_v45 = vpop.f32.mrb[39].mxu1  ;;  %8698 = vmatprep.subr.bf16.mxu1 %v9473_v49  ;;  %v61_v59 = vld [vmem:[%s11765_s0 + $0x108] sm:$0xff]  ;;  %v9512_v38 = vld [vmem:[%s11764_s1 + $0x1138] sm:$0xff]   ;;  %v62_v40 = vld [vmem:[%s11765_s0 + $0x110] sm:$0xff] }
 0x21b   :  { %v7294_v60 = vcombine.low %v61_v59, %v61_v59  ;;  %v7295_v61 = vcombine.high %v61_v59, %v61_v59  ;;  %v7297_v42 = vcombine.high %v62_v40, %v62_v40  ;;  %v9516_v43 = vld [vmem:[%s11764_s1 + $0x11b8] sm:$0xff]   ;;  %v9521_v49 = vld [vmem:[%s11764_s1 + $0x12c0] sm:$0xff]  }
 0x21c   :  { %v11365_v46 = vadd.f32 %v8396_v41, %v6292_v36  ;;  %8677 = vmatpush3.bf16.msra.mxu0 %v9472_v48  ;;  %v9510_v36 = vld [vmem:[%s11764_s1 + $0x11b0] sm:$0xff]   ;;  %v7296_v41 = vcombine.low %v62_v40, %v62_v40  ;;  %v63_v45 = vld [vmem:[%s11765_s0 + $0x118] sm:$0xff]  ;;  %v9520_v48 = vld [vmem:[%s11764_s1 + $0x1200] sm:$0xff]  }
 0x21d   :  { %8699 = vmatpush3.bf16.msra.mxu1 %v9474_v50  ;;  %8678 = vmatprep.subr.bf16.mxu0 %v9475_v51  ;;  %v7299_v47 = vcombine.high %v63_v45, %v63_v45  ;;  %v9522_v50 = vld [vmem:[%s11764_s1 + $0x1280] sm:$0xff]   ;;  %v9523_v51 = vld [vmem:[%s11764_s1 + $0x1248] sm:$0xff]   ;;  %v9531_v59 = vld [vmem:[%s11764_s1 + $0x1258] sm:$0xff]  }
 0x21e   :  { %8700 = vmatprep.subr.bf16.mxu1 %v9477_v53  ;;  %6889 = vmatprep.mubr.bf16.mxu1 %v7295_v61  ;;  %v9525_v53 = vld [vmem:[%s11764_s1 + $0x12c8] sm:$0xff]   ;;  %v9533_v61 = vld [vmem:[%s11764_s1 + $0x12d8] sm:$0xff]  }
 0x21f   :  { %v9562_v40 = vld [vmem:[%s11764_s1 + $0x1388] sm:$0xff]  }
 0x220   :  { %8679 = vmatpush3.bf16.msra.mxu0 %v9476_v52  ;;  %v9524_v52 = vld [vmem:[%s11764_s1 + $0x1208] sm:$0xff]  }
 0x221   :  { %8701 = vmatpush3.bf16.msra.mxu1 %v9480_v57  ;;  %8708 = vmatprep.subr.bf16.mxu0 %v9481_v58  ;;  %v9529_v57 = vld [vmem:[%s11764_s1 + $0x12d0] sm:$0xff]  }
 0x222   :  { %8730 = vmatprep.subr.bf16.mxu1 %v9485_v63  ;;  %v9530_v58 = vld [vmem:[%s11764_s1 + $0x1290] sm:$0xff]   ;;  %v9535_v63 = vld [vmem:[%s11764_s1 + $0x1260] sm:$0xff]  }
 0x223   :  { %6850 = vmatmul.mubr.bf16.vlgmr.msra.gmra.mrb[64].mxu0 %v7292_v55  ;;  %v9527_v55 = vld [vmem:[%s11764_s1 + $0x1250] sm:$0xff]  }
 0x224   :  { %8709 = vmatpush3.bf16.msra.mxu0 %v9484_v62  ;;  %6890 = vmatmul.mubr.bf16.vlgmr.msra.gmra.mrb[64].mxu1 %v7294_v60  ;;  %v9532_v60 = vld [vmem:[%s11764_s1 + $0x1218] sm:$0xff]  }
 0x225   :  { %8731 = vmatpush3.bf16.msra.mxu1 %v9486_v0  ;;  %8710 = vmatprep.subr.bf16.mxu0 %v9487_v1  ;;  %v9534_v62 = vld [vmem:[%s11764_s1 + $0x1298] sm:$0xff]   ;;  %v9536_v0 = vld [vmem:[%s11764_s1 + $0x1220] sm:$0xff]  }
 0x226   :  { %8732 = vmatprep.subr.bf16.mxu1 %v9489_v3  ;;  %6929 = vmatprep.mubr.bf16.mxu0 %v7297_v42  ;;  %v9564_v42 = vld [vmem:[%s11764_s1 + $0x1310] sm:$0xff]  }
 0x227   :  { %6969 = vmatprep.mubr.bf16.mxu1 %v7299_v47  ;;  %v9569_v47 = vld [vmem:[%s11764_s1 + $0x13d8] sm:$0xff]  }
 0x228   :  { %8711 = vmatpush3.bf16.msra.mxu0 %v9488_v2  ;;  %v9537_v2 = vld [vmem:[%s11764_s1 + $0x12e0] sm:$0xff]  }
 0x229   :  { %8733 = vmatpush3.bf16.msra.mxu1 %v9490_v4  ;;  %8712 = vmatprep.subr.bf16.mxu0 %v9491_v5  ;;  %v9538_v4 = vld [vmem:[%s11764_s1 + $0x12a0] sm:$0xff]  }
 0x22a   :  { %8734 = vmatprep.subr.bf16.mxu1 %v9493_v7  ;;  %v9539_v7 = vld [vmem:[%s11764_s1 + $0x1268] sm:$0xff]  }
 0x22c   :  { %8713 = vmatpush3.bf16.msra.mxu0 %v9492_v6 }
 0x22d   :  { %8735 = vmatpush3.bf16.msra.mxu1 %v9494_v8  ;;  %8714 = vmatprep.subr.bf16.mxu0 %v9495_v9 }
 0x22e   :  { %8736 = vmatprep.subr.bf16.mxu1 %v9497_v11 }
 0x230   :  { %8715 = vmatpush3.bf16.msra.mxu0 %v9496_v10  ;;  %v9540_v10 = vld [vmem:[%s11764_s1 + $0x1228] sm:$0xff]  }
 0x231   :  { %8737 = vmatpush3.bf16.msra.mxu1 %v9498_v12  ;;  %8716 = vmatprep.subr.bf16.mxu0 %v9499_v13  ;;  %v9541_v13 = vld [vmem:[%s11764_s1 + $0x12e8] sm:$0xff]  }
 0x232   :  { %8738 = vmatprep.subr.bf16.mxu1 %v9501_v16 }
 0x234   :  { %8717 = vmatpush3.bf16.msra.mxu0 %v9500_v14 }
 0x235   :  { %8739 = vmatpush3.bf16.msra.mxu1 %v9502_v18  ;;  %8718 = vmatprep.subr.bf16.mxu0 %v9503_v21  ;;  %v9543_v18 = vld [vmem:[%s11764_s1 + $0x1270] sm:$0xff]  }
 0x236   :  { %v8416_v15 = vpop.f32.mrb[40].mxu0  ;;  %8740 = vmatprep.subr.bf16.mxu1 %v9505_v27  ;;  %v9545_v21 = vld [vmem:[%s11764_s1 + $0x12f0] sm:$0xff]  }
 0x237   :  { %v8417_v17 = vpop.f32.mrb[41].mxu0  ;;  %v8438_v22 = vpop.f32.mrb[40].mxu1 }
 0x238   :  { %v8418_v19 = vadd.f32 %v8417_v17, %v8416_v15  ;;  %v8419_v20 = vpop.f32.mrb[42].mxu0  ;;  %v8439_v26 = vpop.f32.mrb[41].mxu1  ;;  %8719 = vmatpush3.bf16.msra.mxu0 %v9504_v24  ;;  %v9542_v15 = vld [vmem:[%s11764_s1 + $0x12a8] sm:$0xff]   ;;  %v9548_v24 = vld [vmem:[%s11764_s1 + $0x1238] sm:$0xff]  }
 0x239   :  { %v8420_v25 = vpop.f32.mrb[43].mxu0  ;;  %v8440_v28 = vadd.f32 %v8439_v26, %v8438_v22  ;;  %v8441_v30 = vpop.f32.mrb[42].mxu1  ;;  %8741 = vmatpush3.bf16.msra.mxu1 %v9506_v29  ;;  %8720 = vmatprep.subr.bf16.mxu0 %v9507_v31  ;;  %v9544_v20 = vld [vmem:[%s11764_s1 + $0x1230] sm:$0xff]   ;;  %v64_v26 = vld [vmem:[%s11765_s0 + $0x120] sm:$0xff]  ;;  %v9552_v29 = vld [vmem:[%s11764_s1 + $0x12b8] sm:$0xff]  }
 0x23a   :  { %v6372_v23 = vadd.f32 %v8418_v19, %v11365_v46  ;;  %v8442_v32 = vpop.f32.mrb[43].mxu1  ;;  %8742 = vmatprep.subr.bf16.mxu1 %v9509_v35  ;;  %v7298_v46 = vcombine.low %v63_v45, %v63_v45  ;;  %v9546_v22 = vld [vmem:[%s11764_s1 + $0x12b0] sm:$0xff]   ;;  %v9549_v25 = vld [vmem:[%s11764_s1 + $0x12f8] sm:$0xff]   ;;  %v7300_v27 = vcombine.low %v64_v26, %v64_v26  ;;  %v9553_v30 = vld [vmem:[%s11764_s1 + $0x1340] sm:$0xff]  }
 0x23b   :  { %v65_v31 = vld [vmem:[%s11765_s0 + $0x128] sm:$0xff]  ;;  %v9557_v35 = vld [vmem:[%s11764_s1 + $0x13c0] sm:$0xff]   ;;  %v9567_v45 = vld [vmem:[%s11764_s1 + $0x1358] sm:$0xff]  }
 0x23c   :  { %v11473_v33 = vadd.f32 %v8440_v28, %v6372_v23  ;;  %8721 = vmatpush3.bf16.msra.mxu0 %v9508_v34  ;;  %v9547_v23 = vld [vmem:[%s11764_s1 + $0x1278] sm:$0xff]   ;;  %v7301_v28 = vcombine.high %v64_v26, %v64_v26  ;;  %v7302_v32 = vcombine.low %v65_v31, %v65_v31  ;;  %v9556_v34 = vld [vmem:[%s11764_s1 + $0x1300] sm:$0xff]  }
 0x23d   :  { %8743 = vmatpush3.bf16.msra.mxu1 %v9510_v36  ;;  %8722 = vmatprep.subr.bf16.mxu0 %v9511_v37  ;;  %v9558_v36 = vld [vmem:[%s11764_s1 + $0x1380] sm:$0xff]   ;;  %v9559_v37 = vld [vmem:[%s11764_s1 + $0x1348] sm:$0xff]  }
 0x23e   :  { %8744 = vmatprep.subr.bf16.mxu1 %v9513_v39  ;;  %v9561_v39 = vld [vmem:[%s11764_s1 + $0x13c8] sm:$0xff]  }
 0x240   :  { %8723 = vmatpush3.bf16.msra.mxu0 %v9512_v38  ;;  %v9560_v38 = vld [vmem:[%s11764_s1 + $0x1308] sm:$0xff]  }
 0x241   :  { %8745 = vmatpush3.bf16.msra.mxu1 %v9516_v43  ;;  %8752 = vmatprep.subr.bf16.mxu0 %v9517_v44  ;;  %v9565_v43 = vld [vmem:[%s11764_s1 + $0x13d0] sm:$0xff]  }
 0x242   :  { %8774 = vmatprep.subr.bf16.mxu1 %v9521_v49  ;;  %v9566_v44 = vld [vmem:[%s11764_s1 + $0x1390] sm:$0xff]   ;;  %v9571_v49 = vld [vmem:[%s11764_s1 + $0x1360] sm:$0xff]  }
 0x243   :  { %6930 = vmatmul.mubr.bf16.vlgmr.msra.gmra.mrb[68].mxu0 %v7296_v41  ;;  %v9563_v41 = vld [vmem:[%s11764_s1 + $0x1350] sm:$0xff]  }
 0x244   :  { %8753 = vmatpush3.bf16.msra.mxu0 %v9520_v48  ;;  %6970 = vmatmul.mubr.bf16.vlgmr.msra.gmra.mrb[68].mxu1 %v7298_v46  ;;  %v9568_v46 = vld [vmem:[%s11764_s1 + $0x1318] sm:$0xff]  }
 0x245   :  { %8775 = vmatpush3.bf16.msra.mxu1 %v9522_v50  ;;  %8754 = vmatprep.subr.bf16.mxu0 %v9523_v51  ;;  %v9570_v48 = vld [vmem:[%s11764_s1 + $0x1398] sm:$0xff]   ;;  %v9572_v51 = vld [vmem:[%s11764_s1 + $0x1320] sm:$0xff]  }
 0x246   :  { %8776 = vmatprep.subr.bf16.mxu1 %v9525_v53  ;;  %7009 = vmatprep.mubr.bf16.mxu0 %v7301_v28  ;;  %v9573_v53 = vld [vmem:[%s11764_s1 + $0x13e0] sm:$0xff]  }
 0x248   :  { %8755 = vmatpush3.bf16.msra.mxu0 %v9524_v52 }
 0x249   :  { %8777 = vmatpush3.bf16.msra.mxu1 %v9526_v54  ;;  %8756 = vmatprep.subr.bf16.mxu0 %v9527_v55 }
 0x24a   :  { %8778 = vmatprep.subr.bf16.mxu1 %v9529_v57 }
 0x24c   :  { %8757 = vmatpush3.bf16.msra.mxu0 %v9528_v56  ;;  %v9574_v56 = vld [vmem:[%s11764_s1 + $0x13a0] sm:$0xff]  }
 0x24d   :  { %8779 = vmatpush3.bf16.msra.mxu1 %v9530_v58  ;;  %8758 = vmatprep.subr.bf16.mxu0 %v9531_v59  ;;  %v9575_v59 = vld [vmem:[%s11764_s1 + $0x1368] sm:$0xff]  }
 0x24e   :  { %8780 = vmatprep.subr.bf16.mxu1 %v9533_v61  ;;  %v9576_v61 = vld [vmem:[%s11764_s1 + $0x1328] sm:$0xff]  }
 0x250   :  { %8759 = vmatpush3.bf16.msra.mxu0 %v9532_v60 }
 0x251   :  { %8781 = vmatpush3.bf16.msra.mxu1 %v9534_v62  ;;  %8760 = vmatprep.subr.bf16.mxu0 %v9535_v63 }
 0x252   :  { %8782 = vmatprep.subr.bf16.mxu1 %v9537_v2  ;;  %v9578_v2 = vld [vmem:[%s11764_s1 + $0x13a8] sm:$0xff]  }
 0x254   :  { %8761 = vmatpush3.bf16.msra.mxu0 %v9536_v0  ;;  %v9577_v0 = vld [vmem:[%s11764_s1 + $0x13e8] sm:$0xff]  }
 0x255   :  { %8783 = vmatpush3.bf16.msra.mxu1 %v9538_v4  ;;  %8762 = vmatprep.subr.bf16.mxu0 %v9539_v7  ;;  %v9581_v7 = vld [vmem:[%s11764_s1 + $0x13f0] sm:$0xff]  }
 0x256   :  { %v8460_v1 = vpop.f32.mrb[44].mxu0  ;;  %8784 = vmatprep.subr.bf16.mxu1 %v9541_v13 }
 0x257   :  { %v8461_v3 = vpop.f32.mrb[45].mxu0  ;;  %v8482_v8 = vpop.f32.mrb[44].mxu1 }
 0x258   :  { %v8462_v5 = vadd.f32 %v8461_v3, %v8460_v1  ;;  %v8463_v6 = vpop.f32.mrb[46].mxu0  ;;  %v8483_v12 = vpop.f32.mrb[45].mxu1  ;;  %8763 = vmatpush3.bf16.msra.mxu0 %v9540_v10  ;;  %v9584_v10 = vld [vmem:[%s11764_s1 + $0x1338] sm:$0xff]  }
 0x259   :  { %v8464_v11 = vpop.f32.mrb[47].mxu0  ;;  %v8484_v14 = vadd.f32 %v8483_v12, %v8482_v8  ;;  %v8485_v16 = vpop.f32.mrb[46].mxu1  ;;  %8785 = vmatpush3.bf16.msra.mxu1 %v9542_v15  ;;  %8764 = vmatprep.subr.bf16.mxu0 %v9543_v18  ;;  %v9580_v6 = vld [vmem:[%s11764_s1 + $0x1330] sm:$0xff]   ;;  %v9588_v15 = vld [vmem:[%s11764_s1 + $0x13b8] sm:$0xff]  }
 0x25a   :  { %v6452_v9 = vadd.f32 %v8462_v5, %v11473_v33  ;;  %v8486_v19 = vpop.f32.mrb[47].mxu1  ;;  %8786 = vmatprep.subr.bf16.mxu1 %v9545_v21  ;;  %v7303_v33 = vcombine.high %v65_v31, %v65_v31  ;;  %v9579_v5 = vld [vmem:[%s11764_s1 + $0x1370] sm:$0xff]   ;;  %v9585_v11 = vld [vmem:[%s11764_s1 + $0x13f8] sm:$0xff]   ;;  %v9592_v21 = vld [vmem:[%s11764_s1 + $0x1408] sm:$0xff]  }
 0x25b   :  { %v9582_v8 = vld [vmem:[%s11764_s1 + $0x13b0] sm:$0xff]   ;;  %v67_v16 = vld [vmem:[%s11765_s0 + $0x138] sm:$0xff] }
 0x25c   :  { %v11575_v17 = vadd.f32 %v8484_v14, %v6452_v9  ;;  %8765 = vmatpush3.bf16.msra.mxu0 %v9544_v20  ;;  %7049 = vmatprep.mubr.bf16.mxu1 %v7303_v33  ;;  %v9583_v9 = vld [vmem:[%s11764_s1 + $0x1378] sm:$0xff]   ;;  %v66_v12 = vld [vmem:[%s11765_s0 + $0x130] sm:$0xff]  ;;  %v7306_v18 = vcombine.low %v67_v16, %v67_v16  ;;  %v7307_v19 = vcombine.high %v67_v16, %v67_v16  ;;  %v9591_v20 = vld [vmem:[%s11764_s1 + $0x1400] sm:$0xff]  }
 0x25d   :  { %8787 = vmatpush3.bf16.msra.mxu1 %v9546_v22  ;;  %8766 = vmatprep.subr.bf16.mxu0 %v9547_v23  ;;  %v7304_v13 = vcombine.low %v66_v12, %v66_v12  ;;  %v7305_v14 = vcombine.high %v66_v12, %v66_v12  ;;  %v9593_v22 = vld [vmem:[%s11764_s1 + $0x1410] sm:$0xff]   ;;  %v9594_v23 = vld [vmem:[%s11764_s1 + $0x1418] sm:$0xff]  }
 0x25e   :  { %8788 = vmatprep.subr.bf16.mxu1 %v9549_v25 }
 0x260   :  { %8767 = vmatpush3.bf16.msra.mxu0 %v9548_v24  ;;  %v9595_v24 = vld [vmem:[%s11764_s1 + $0x1420] sm:$0xff]  }
 0x261   :  { %8789 = vmatpush3.bf16.msra.mxu1 %v9552_v29  ;;  %8796 = vmatprep.subr.bf16.mxu0 %v9553_v30  ;;  %v9596_v30 = vld [vmem:[%s11764_s1 + $0x1428] sm:$0xff]  }
 0x262   :  { %8818 = vmatprep.subr.bf16.mxu1 %v9557_v35 }
 0x263   :  { %7010 = vmatmul.mubr.bf16.vlgmr.msra.gmra.mrb[72].mxu0 %v7300_v27 }
 0x264   :  { %8797 = vmatpush3.bf16.msra.mxu0 %v9556_v34  ;;  %7050 = vmatmul.mubr.bf16.vlgmr.msra.gmra.mrb[72].mxu1 %v7302_v32 }
 0x265   :  { %8819 = vmatpush3.bf16.msra.mxu1 %v9558_v36  ;;  %8798 = vmatprep.subr.bf16.mxu0 %v9559_v37 }
 0x266   :  { %8820 = vmatprep.subr.bf16.mxu1 %v9561_v39  ;;  %7089 = vmatprep.mubr.bf16.mxu0 %v7305_v14  ;;  %v9598_v39 = vld [vmem:[%s11764_s1 + $0x1438] sm:$0xff]  }
 0x267   :  { %7129 = vmatprep.mubr.bf16.mxu1 %v7307_v19 }
 0x268   :  { %8799 = vmatpush3.bf16.msra.mxu0 %v9560_v38  ;;  %v9597_v38 = vld [vmem:[%s11764_s1 + $0x1430] sm:$0xff]  }
 0x269   :  { %8821 = vmatpush3.bf16.msra.mxu1 %v9562_v40  ;;  %8800 = vmatprep.subr.bf16.mxu0 %v9563_v41  ;;  %v9599_v40 = vld [vmem:[%s11765_s0 + $0x140] ss:$0 sps:$4 sm:$0xff]  }
 0x26a   :  { %8822 = vmatprep.subr.bf16.mxu1 %v9565_v43 }
 0x26c   :  { %8801 = vmatpush3.bf16.msra.mxu0 %v9564_v42 }
 0x26d   :  { %8823 = vmatpush3.bf16.msra.mxu1 %v9566_v44  ;;  %8802 = vmatprep.subr.bf16.mxu0 %v9567_v45 }
 0x26e   :  { %8824 = vmatprep.subr.bf16.mxu1 %v9569_v47 }
 0x270   :  { %8803 = vmatpush3.bf16.msra.mxu0 %v9568_v46 }
 0x271   :  { %8825 = vmatpush3.bf16.msra.mxu1 %v9570_v48  ;;  %8804 = vmatprep.subr.bf16.mxu0 %v9571_v49 }
 0x272   :  { %8826 = vmatprep.subr.bf16.mxu1 %v9573_v53 }
 0x274   :  { %8805 = vmatpush3.bf16.msra.mxu0 %v9572_v51 }
 0x275   :  { %8827 = vmatpush3.bf16.msra.mxu1 %v9574_v56  ;;  %8806 = vmatprep.subr.bf16.mxu0 %v9575_v59 }
 0x276   :  { %v8504_v50 = vpop.f32.mrb[48].mxu0  ;;  %8828 = vmatprep.subr.bf16.mxu1 %v9577_v0 }
 0x277   :  { %v8505_v52 = vpop.f32.mrb[49].mxu0  ;;  %v8526_v57 = vpop.f32.mrb[48].mxu1 }
 0x278   :  { %v8506_v54 = vadd.f32 %v8505_v52, %v8504_v50  ;;  %v8507_v55 = vpop.f32.mrb[50].mxu0  ;;  %v8527_v62 = vpop.f32.mrb[49].mxu1  ;;  %8807 = vmatpush3.bf16.msra.mxu0 %v9576_v61 }
 0x279   :  { %v8508_v60 = vpop.f32.mrb[51].mxu0  ;;  %v8528_v63 = vadd.f32 %v8527_v62, %v8526_v57  ;;  %v8529_v1 = vpop.f32.mrb[50].mxu1  ;;  %8829 = vmatpush3.bf16.msra.mxu1 %v9578_v2  ;;  %8808 = vmatprep.subr.bf16.mxu0 %v9579_v5 }
 0x27a   :  { %v6532_v58 = vadd.f32 %v8506_v54, %v11575_v17  ;;  %v8530_v3 = vpop.f32.mrb[51].mxu1  ;;  %8830 = vmatprep.subr.bf16.mxu1 %v9581_v7  ;;  %v9602_v17 = vmov 0.0  }
 0x27b   :  { %26 = vst.msk [vmem:[#allocation2] sm:$0xff] %vm25_vm1, %v9602_v17 }
 0x27c   :  { %v6572_v4 = vadd.f32 %v8528_v63, %v6532_v58  ;;  %8809 = vmatpush3.bf16.msra.mxu0 %v9580_v6 }
 0x27d   :  { %8831 = vmatpush3.bf16.msra.mxu1 %v9582_v8  ;;  %8810 = vmatprep.subr.bf16.mxu0 %v9583_v9 }
 0x27e   :  { %8832 = vmatprep.subr.bf16.mxu1 %v9585_v11 }
 0x280   :  { %8811 = vmatpush3.bf16.msra.mxu0 %v9584_v10 }
 0x281   :  { %8849 = vmatprep.subr.bf16.mxu0 %v9602_v17  ;;  %8833 = vmatpush3.bf16.msra.mxu1 %v9588_v15 }
 0x283   :  { %7090 = vmatmul.mubr.bf16.vlgmr.msra.gmra.mrb[76].mxu0 %v7304_v13 }
 0x284   :  { %8850 = vmatpush3.bf16.msra.mxu0 %v9591_v20  ;;  %8865 = vmatprep.mubr.msk.bf16.mxu0 %vm9603_vm0, %v9602_v17 }
 0x285   :  { %7130 = vmatmul.mubr.bf16.vlgmr.msra.gmra.mrb[76].mxu1 %v7306_v18  ;;  %8851 = vmatprep.subr.bf16.mxu0 %v9602_v17 }
 0x288   :  { %8852 = vmatpush3.bf16.msra.mxu0 %v9592_v21 }
 0x289   :  { %8853 = vmatprep.subr.bf16.mxu0 %v9602_v17 }
 0x28c   :  { %8854 = vmatpush3.bf16.msra.mxu0 %v9593_v22 }
 0x28d   :  { %8855 = vmatprep.subr.bf16.mxu0 %v9602_v17 }
 0x290   :  { %8856 = vmatpush3.bf16.msra.mxu0 %v9594_v23 }
 0x291   :  { %8857 = vmatprep.subr.bf16.mxu0 %v9602_v17 }
 0x294   :  { %8858 = vmatpush3.bf16.msra.mxu0 %v9595_v24 }
 0x295   :  { %8859 = vmatprep.subr.bf16.mxu0 %v9602_v17 }
 0x296   :  { %v8548_v25 = vpop.f32.mrb[52].mxu0 }
 0x297   :  { %v8549_v26 = vpop.f32.mrb[53].mxu0  ;;  %v8570_v29 = vpop.f32.mrb[52].mxu1 }
 0x298   :  { %v8550_v27 = vadd.f32 %v8549_v26, %v8548_v25  ;;  %v8551_v28 = vpop.f32.mrb[54].mxu0  ;;  %v8571_v32 = vpop.f32.mrb[53].mxu1  ;;  %8860 = vmatpush3.bf16.msra.mxu0 %v9596_v30 }
 0x299   :  { %v8552_v31 = vpop.f32.mrb[55].mxu0  ;;  %v8572_v34 = vadd.f32 %v8571_v32, %v8570_v29  ;;  %v8573_v35 = vpop.f32.mrb[54].mxu1  ;;  %8861 = vmatprep.subr.bf16.mxu0 %v9602_v17 }
 0x29a   :  { %v6612_v33 = vadd.f32 %v8550_v27, %v6572_v4  ;;  %v8574_v36 = vpop.f32.mrb[55].mxu1 }
 0x29c   :  { %v6652_v37 = vadd.f32 %v8572_v34, %v6612_v33  ;;  %8862 = vmatpush3.bf16.msra.mxu0 %v9597_v38 }
 0x29d   :  { %8863 = vmatprep.subr.bf16.mxu0 %v9602_v17 }
 0x2a0   :  { %8864 = vmatpush3.bf16.msra.mxu0 %v9598_v39 }
 0x2a3   :  { %8866 = vmatmul.mubr.bf16.vlgmr.msra.gmra.mrb[80].mxu0 %v9599_v40 }
 0x2b6   :  { %v8592_v41 = vpop.f32.mrb[56].mxu0 }
 0x2b7   :  { %v8593_v42 = vpop.f32.mrb[57].mxu0  ;;  %v8614_v45 = vpop.f32.mrb[56].mxu1 }
 0x2b8   :  { %v8594_v43 = vadd.f32 %v8593_v42, %v8592_v41  ;;  %v8595_v44 = vpop.f32.mrb[58].mxu0  ;;  %v8615_v47 = vpop.f32.mrb[57].mxu1 }
 0x2b9   :  { %v8596_v46 = vpop.f32.mrb[59].mxu0  ;;  %v8616_v49 = vadd.f32 %v8615_v47, %v8614_v45  ;;  %v8617_v50 = vpop.f32.mrb[58].mxu1 }
 0x2ba   :  { %v6692_v48 = vadd.f32 %v8594_v43, %v6652_v37  ;;  %v8618_v51 = vpop.f32.mrb[59].mxu1 }
 0x2bc   :  { %v6732_v52 = vadd.f32 %v8616_v49, %v6692_v48  ;;  %v27_v49 = vld [vmem:[#allocation2] sm:$0xff] }
 0x2d6   :  { %v8636_v53 = vpop.f32.mrb[60].mxu0 }
 0x2d7   :  { %v8637_v54 = vpop.f32.mrb[61].mxu0  ;;  %v8658_v57 = vpop.f32.mrb[60].mxu1 }
 0x2d8   :  { %v8638_v55 = vadd.f32 %v8637_v54, %v8636_v53  ;;  %v8639_v56 = vpop.f32.mrb[62].mxu0  ;;  %v8659_v60 = vpop.f32.mrb[61].mxu1 }
 0x2d9   :  { %v8640_v58 = vpop.f32.mrb[63].mxu0  ;;  %v8660_v61 = vadd.f32 %v8659_v60, %v8658_v57  ;;  %v8661_v62 = vpop.f32.mrb[62].mxu1  ;;  %v7957_v56 = vld [vmem:[%s11766_s2] ss:$0 sm:$0xff] }
 0x2da   :  { %v6772_v59 = vadd.f32 %v8638_v55, %v6732_v52  ;;  %v8662_v63 = vpop.f32.mrb[63].mxu1 }
 0x2dc   :  { %v6812_v0 = vadd.f32 %v8660_v61, %v6772_v59 }
 0x2f6   :  { %v8680_v1 = vpop.f32.mrb[64].mxu0 }
 0x2f7   :  { %v8681_v2 = vpop.f32.mrb[65].mxu0  ;;  %v8702_v5 = vpop.f32.mrb[64].mxu1 }
 0x2f8   :  { %v8682_v3 = vadd.f32 %v8681_v2, %v8680_v1  ;;  %v8683_v4 = vpop.f32.mrb[66].mxu0  ;;  %v8703_v7 = vpop.f32.mrb[65].mxu1 }
 0x2f9   :  { %v8684_v6 = vpop.f32.mrb[67].mxu0  ;;  %v8704_v9 = vadd.f32 %v8703_v7, %v8702_v5  ;;  %v8705_v10 = vpop.f32.mrb[66].mxu1  ;;  %v7958_v5 = vld [vmem:[%s11767_s3] ss:$0 sm:$0xff] }
 0x2fa   :  { %v6852_v8 = vadd.f32 %v8682_v3, %v6812_v0  ;;  %v8706_v11 = vpop.f32.mrb[67].mxu1  ;;  %v7959_v7 = vld [vmem:[%s11768_s4] ss:$0 sm:$0xff] }
 0x2fc   :  { %v6892_v12 = vadd.f32 %v8704_v9, %v6852_v8 }
 0x316   :  { %v8724_v13 = vpop.f32.mrb[68].mxu0 }
 0x317   :  { %v8725_v14 = vpop.f32.mrb[69].mxu0  ;;  %v8746_v18 = vpop.f32.mrb[68].mxu1 }
 0x318   :  { %v8726_v15 = vadd.f32 %v8725_v14, %v8724_v13  ;;  %v8727_v16 = vpop.f32.mrb[70].mxu0  ;;  %v8747_v20 = vpop.f32.mrb[69].mxu1 }
 0x319   :  { %v8728_v19 = vpop.f32.mrb[71].mxu0  ;;  %v8748_v21 = vadd.f32 %v8747_v20, %v8746_v18  ;;  %v8749_v22 = vpop.f32.mrb[70].mxu1 }
 0x31a   :  { %v6932_v17 = vadd.f32 %v8726_v15, %v6892_v12  ;;  %v8750_v23 = vpop.f32.mrb[71].mxu1 }
 0x31c   :  { %v6972_v24 = vadd.f32 %v8748_v21, %v6932_v17 }
 0x336   :  { %v8768_v25 = vpop.f32.mrb[72].mxu0 }
 0x337   :  { %v8769_v26 = vpop.f32.mrb[73].mxu0  ;;  %v8790_v29 = vpop.f32.mrb[72].mxu1 }
 0x338   :  { %v8770_v27 = vadd.f32 %v8769_v26, %v8768_v25  ;;  %v8771_v28 = vpop.f32.mrb[74].mxu0  ;;  %v8791_v32 = vpop.f32.mrb[73].mxu1 }
 0x339   :  { %v8772_v30 = vpop.f32.mrb[75].mxu0  ;;  %v8792_v33 = vadd.f32 %v8791_v32, %v8790_v29  ;;  %v8793_v34 = vpop.f32.mrb[74].mxu1 }
 0x33a   :  { %v7012_v31 = vadd.f32 %v8770_v27, %v6972_v24  ;;  %v8794_v35 = vpop.f32.mrb[75].mxu1 }
 0x33c   :  { %v7052_v36 = vadd.f32 %v8792_v33, %v7012_v31 }
 0x356   :  { %v8812_v37 = vpop.f32.mrb[76].mxu0 }
 0x357   :  { %v8813_v38 = vpop.f32.mrb[77].mxu0 }
 0x358   :  { %v8814_v39 = vadd.f32 %v8813_v38, %v8812_v37  ;;  %v8815_v40 = vpop.f32.mrb[78].mxu0  ;;  %v8834_v41 = vpop.f32.mrb[76].mxu1 }
 0x359   :  { %v8816_v42 = vpop.f32.mrb[79].mxu0  ;;  %v8835_v43 = vpop.f32.mrb[77].mxu1 }
 0x35a   :  { %v7092_v44 = vadd.f32 %v8814_v39, %v7052_v36  ;;  %v8836_v45 = vadd.f32 %v8835_v43, %v8834_v41  ;;  %v8837_v46 = vpop.f32.mrb[78].mxu1 }
 0x35b   :  { %v8838_v47 = vpop.f32.mrb[79].mxu1 }
 0x35c   :  { %v7132_v48 = vadd.f32 %v8836_v45, %v7092_v44 }
 0x376   :  { %v7171_v50 = vpop.f32.mrb[80].mxu0 }
 0x377   :  { %v7172_v51 = vadd.f32 %v7171_v50, %v7132_v48  ;;  %v8867_v52 = vpop.f32.mrb[81].mxu0 }
 0x378   :  { %v7174_v53 = vpop.f32.mrb[82].mxu0 }
 0x379   :  { %v7177_v54 = vadd.f32 %v7172_v51, %v27_v49  ;;  %v8868_v55 = vpop.f32.mrb[83].mxu0 }
 0x37b   :  { %7179 = vst.msk [vmem:[#allocation2] sm:$0xff] %vm25_vm1, %v7177_v54 }
 0x382   :  { %v7183_v57 = vld [vmem:[#allocation2] sm:$0xff] }
 0x383   :  { %v7191_v58 = vadd.f32 %v7957_v56, %v7183_v57 }
 0x385   :  { %v7192_v59 = vsel %vm25_vm1, %v7191_v58, 0.0 }
 0x386   :  { %7193 = vadd.xlane.f32.xlu0 %v7192_v59 }
 0x413   :  { %v7194_v60 = vpop.xlane.xlu0 %7193 }
 0x414   :  { %v7196_v61 = vmul.f32 0.03125, %v7194_v60 }
 0x416   :  { %v7197_v62 = vsub.f32 %v7191_v58, %v7196_v61 }
 0x418   :  { %v7198_v63 = vmul.f32 %v7197_v62, %v7197_v62 }
 0x41a   :  { %v7199_v0 = vsel %vm25_vm1, %v7198_v63, 0.0 }
 0x41b   :  { %7200 = vadd.xlane.f32.xlu0 %v7199_v0 }
 0x4a8   :  { %v7201_v1 = vpop.xlane.xlu0 %7200 }
 0x4a9   :  { %v7202_v2 = vmul.f32 0.03125, %v7201_v1 }
 0x4ab   :  { %v7203_v3 = vadd.f32 1e-05, %v7202_v2 }
 0x4ad   :  { %9600 = vrsqrt.f32 %v7203_v3 }
 0x4b7   :  { %v9601_v4 = vpop.eup %9600 }
 0x4b8   :  { %v7205_v6 = vmul.f32 %v9601_v4, %v7197_v62 }
 0x4ba   :  { %v7213_v8 = vmul.f32 %v7958_v5, %v7205_v6 }
 0x4bc   :  { %v7221_v9 = vadd.f32 %v7959_v7, %v7213_v8 }
 0x4be   :  { %v7222_v10 = vmax.f32 %v7221_v9, 0.0 }
 0x4c0   :  { %7223 = vst.msk [vmem:[%s11769_s5] sm:$0xff] %vm25_vm1, %v7222_v10 }

</bundles_post_ra>
